<compile_context>
chip_gen: v5e
topology: v5e:2x2
jax: 0.10.0
libtpu: 0.0.40
codegen_flags: <defaults>
</compile_context>

<pallas_src>
import functools

import jax
import jax.numpy as jnp
from jax.experimental import pallas as pl
from jax.experimental.pallas import tpu as pltpu


def _sigmoid(z):
    return 1.0 / (1.0 + jnp.exp(-z))


# ---------------------------------------------------------------------------
# Host-side weight packing (done once, outside the jitted forward)
# ---------------------------------------------------------------------------
def conv_to_banded(w, b, F):
    """Express Conv2d(Cin->Cout, kernel (3,1), padding (1,0)) along the F axis as a
    banded matmul: for a row vector x laid out as [ci*F + j],
        conv(x)[co*F + i] = (x @ M)[co*F + i] + bias[co*F + i].
    Mathematically identical to the conv (cross-correlation, zero padding of 1)."""
    cout, cin = int(w.shape[0]), int(w.shape[1])
    M = jnp.zeros((cin * F, cout * F), jnp.float32)
    i = jnp.arange(F)
    for co in range(cout):
        for ci in range(cin):
            for k in range(3):
                j = i + k - 1                           # input index feeding output i
                valid = (j >= 0) & (j < F)
                rows = ci * F + jnp.clip(j, 0, F - 1)
                cols = co * F + i
                M = M.at[rows, cols].add(jnp.where(valid, w[co, ci, k, 0], 0.0))
    bias = jnp.repeat(b.astype(jnp.float32), F)          # [b[co]] * F, co-major
    return M, bias


def pack_lstm_direction(w_ih, w_hh, b_ih, b_hh, d, H):
    """Pack one LSTM direction (PyTorch gate order i,f,g,o) into a gate-major 8H-wide
    layout: column block [g*2H + d*H : g*2H + (d+1)*H] holds gate g of direction d.
    Both directions then share one recurrence matmul per step, with hidden/cell state
    packed as [h_fwd | h_bwd]."""
    IN = int(w_ih.shape[1])
    wih = jnp.zeros((IN, 8 * H), jnp.float32)
    whh = jnp.zeros((2 * H, 8 * H), jnp.float32)
    bias = jnp.zeros((8 * H,), jnp.float32)
    for g in range(4):
        c0 = g * 2 * H + d * H
        wih = wih.at[:, c0:c0 + H].set(w_ih[g * H:(g + 1) * H, :].T)
        whh = whh.at[d * H:(d + 1) * H, c0:c0 + H].set(w_hh[g * H:(g + 1) * H, :].T)
        bias = bias.at[c0:c0 + H].set(b_ih[g * H:(g + 1) * H] + b_hh[g * H:(g + 1) * H])
    return wih, whh, bias


def pack_params(params, f, hidden_size, num_layers):
    F, H = f, hidden_size
    m1, b1v = conv_to_banded(params['conv1_w'], params['conv1_b'], F)
    m2, b2v = conv_to_banded(params['conv2_w'], params['conv2_b'], F)

    # Lane-pad the final projection to a multiple of 128 so the kernel's output store is
    # a full unmasked vst (wrapper slices the pad columns off).
    num_classes = int(params['mlp2_w'].shape[0])
    middle = int(params['mlp2_w'].shape[1])
    out_pad = ((num_classes + 127) // 128) * 128
    w2 = jnp.zeros((middle, out_pad), jnp.float32)
    w2 = w2.at[:, :num_classes].set(params['mlp2_w'].T.astype(jnp.float32))
    b2 = jnp.zeros((1, out_pad), jnp.float32)
    b2 = b2.at[0, :num_classes].set(params['mlp2_b'].astype(jnp.float32))

    packed = {
        'm1': m1, 'b1v': b1v.reshape(1, -1),
        'm2': m2, 'b2v': b2v.reshape(1, -1),
        'lstm': [],
        'mlp_w1': params['mlp1_w'].T.astype(jnp.float32),     # (2H, middle)
        'mlp_b1': params['mlp1_b'].reshape(1, -1).astype(jnp.float32),
        'mlp_w2': w2,                                          # (middle, out_pad)
        'mlp_b2': b2,                                          # (1, out_pad)
    }
    for l in range(num_layers):
        p = params['lstm'][l]
        wihf, whhf, bf = pack_lstm_direction(p['w_ih_f'], p['w_hh_f'],
                                             p['b_ih_f'], p['b_hh_f'], 0, H)
        wihb, whhb, bb = pack_lstm_direction(p['w_ih_b'], p['w_hh_b'],
                                             p['b_ih_b'], p['b_hh_b'], 1, H)
        packed['lstm'].append({
            'wihf': wihf, 'wihb': wihb, 'whh': whhf + whhb,   # disjoint blocks
            'bf': bf.reshape(1, -1), 'bb': bb.reshape(1, -1),
        })
    return packed


# ---------------------------------------------------------------------------
# Fused forward kernel: conv embedding -> BiLSTM stack -> MLP, one pallas_call
# ---------------------------------------------------------------------------
def fused_net_kernel(*refs, seq_len, batch, hidden, num_layers):
    T, B, H = seq_len, batch, hidden
    H2 = 2 * H

    x_ref, m1_ref, b1_ref, m2_ref, b2_ref = refs[0:5]
    pos = 5
    layer_refs = []
    for _ in range(num_layers):
        layer_refs.append(refs[pos:pos + 5])
        pos += 5
    w1_ref, mb1_ref, w2_ref, mb2_ref = refs[pos:pos + 4]
    pos += 4
    out_ref = refs[pos]
    pos += 1
    # VMEM scratch, reused across layers:
    #   hA: row t holds [h_f(t)     | h_b(T-1-t)]   -> fwd hidden time-ordered in cols 0:H
    #   hR: row t holds [h_f(T-1-t) | h_b(t)    ]   -> bwd hidden time-ordered in cols H:2H
    #   gF/gB: hoisted input-gate projections (fwd / bwd direction blocks), (T*B, 8H)
    hA_ref, hR_ref, gF_ref, gB_ref = refs[pos:pos + 4]

    def dot(a, b):
        return jnp.dot(a, b, preferred_element_type=jnp.float32)

    # Conv embedding as two lane-dense banded matmuls + ReLU (features on lanes).
    x = x_ref[...]                                                     # (T*B, F)
    h1 = jnp.maximum(dot(x, m1_ref[...]) + b1_ref[...], 0.0)           # (T*B, 2F)
    feat = jnp.maximum(dot(h1, m2_ref[...]) + b2_ref[...], 0.0)        # (T*B, 4F)

    for l in range(num_layers):
        wihf_ref, wihb_ref, whh_ref, bf_ref, bb_ref = layer_refs[l]

        # Batched input projections for both directions, hoisted out of the recurrence
        # (biases folded in; each direction's bias added exactly once), staged in VMEM.
        if l == 0:
            gF_ref[...] = dot(feat, wihf_ref[...]) + bf_ref[...]        # (T*B, 8H)
            gB_ref[...] = dot(feat, wihb_ref[...]) + bb_ref[...]
        else:
            Af = hA_ref[...][:, 0:H]            # previous layer fwd hidden, time-ordered
            Bb = hR_ref[...][:, H:H2]           # previous layer bwd hidden, time-ordered
            wf = wihf_ref[...]
            wb = wihb_ref[...]
            gF_ref[...] = dot(Af, wf[0:H, :]) + dot(Bb, wf[H:H2, :]) + bf_ref[...]
            gB_ref[...] = dot(Af, wb[0:H, :]) + dot(Bb, wb[H:H2, :]) + bb_ref[...]

        whh = whh_ref[...]                      # (2H, 8H), loaded once per layer
        h = jnp.zeros((B, H2), jnp.float32)     # packed [h_fwd | h_bwd]
        c = jnp.zeros((B, H2), jnp.float32)
        for s in range(T):                      # fully unrolled, all indices static
            rf = slice(s * B, (s + 1) * B)              # fwd processes time s
            rb = slice((T - 1 - s) * B, (T - s) * B)    # bwd processes time T-1-s
            gates = gF_ref[rf, :] + gB_ref[rb, :] + dot(h, whh)         # (B, 8H)
            i_g = _sigmoid(gates[:, 0 * H2:1 * H2])
            f_g = _sigmoid(gates[:, 1 * H2:2 * H2])
            g_g = jnp.tanh(gates[:, 2 * H2:3 * H2])
            o_g = _sigmoid(gates[:, 3 * H2:4 * H2])
            c = f_g * c + i_g * g_g
            h = o_g * jnp.tanh(c)
            hA_ref[rf, :] = h
            hR_ref[rb, :] = h

    # MLP epilogue on the VMEM-resident BiLSTM output (the fwd/bwd concat is never
    # materialized -- the Linear is split over the two halves instead). Output is
    # lane-padded to a multiple of 128 -> unmasked stores.
    Af = hA_ref[...][:, 0:H]
    Bb = hR_ref[...][:, H:H2]
    w1 = w1_ref[...]
    hm = jnp.maximum(dot(Af, w1[0:H, :]) + dot(Bb, w1[H:H2, :]) + mb1_ref[...], 0.0)
    out_ref[...] = dot(hm, w2_ref[...]) + mb2_ref[...]


def net_forward(x, packed, hidden_size, num_layers, num_classes):
    B, T, F = x.shape
    # PyTorch `datas.view(batch, 1, f, t)` is a pure memory reinterpretation; we then lay
    # the conv input out time-major and lane-dense as (T*B, F), rows ordered t*B + b.
    xt = jnp.transpose(x.reshape(B, F, T), (2, 0, 1)).reshape(T * B, F)

    args = [xt, packed['m1'], packed['b1v'], packed['m2'], packed['b2v']]
    for l in range(num_layers):
        q = packed['lstm'][l]
        args += [q['wihf'], q['wihb'], q['whh'], q['bf'], q['bb']]
    args += [packed['mlp_w1'], packed['mlp_b1'], packed['mlp_w2'], packed['mlp_b2']]

    out_pad = packed['mlp_w2'].shape[1]
    scratch = [pltpu.VMEM((T * B, 2 * hidden_size), jnp.float32),   # hA
               pltpu.VMEM((T * B, 2 * hidden_size), jnp.float32),   # hR
               pltpu.VMEM((T * B, 8 * hidden_size), jnp.float32),   # gF
               pltpu.VMEM((T * B, 8 * hidden_size), jnp.float32)]   # gB

    kernel = functools.partial(fused_net_kernel, seq_len=T, batch=B,
                               hidden=hidden_size, num_layers=num_layers)
    y = pl.pallas_call(
        kernel,
        out_shape=jax.ShapeDtypeStruct((T * B, out_pad), jnp.float32),
        in_specs=[pl.BlockSpec(memory_space=pltpu.MemorySpace.VMEM)] * len(args),
        out_specs=pl.BlockSpec(memory_space=pltpu.MemorySpace.VMEM),
        scratch_shapes=scratch,
    )(*args)
    return y[:, :num_classes].reshape(T, B, num_classes)


# ---------------------------------------------------------------------------
# Parameter init (PyTorch layouts) + demo
# ---------------------------------------------------------------------------
def init_params(key, f, num_classes, hidden_size, num_layers, middle_feature):
    keys = jax.random.split(key, 64)
    ki = iter(keys)

    def rnd(shape, scale):
        return (scale * jax.random.normal(next(ki), shape)).astype(jnp.float32)

    params = {}
    params['conv1_w'] = rnd((2, 1, 3, 1), 0.5)       # PyTorch (Cout, Cin, KH, KW)
    params['conv1_b'] = rnd((2,), 0.1)
    params['conv2_w'] = rnd((4, 2, 3, 1), 0.5)
    params['conv2_b'] = rnd((4,), 0.1)

    emb_dim = 4 * f                                   # module hardcodes 129 * 4
    lstm = []
    for l in range(num_layers):
        in_dim = emb_dim if l == 0 else 2 * hidden_size
        layer = {}
        for d in ('f', 'b'):
            layer[f'w_ih_{d}'] = rnd((4 * hidden_size, in_dim), 1.0 / float(in_dim) ** 0.5)
            layer[f'w_hh_{d}'] = rnd((4 * hidden_size, hidden_size), 1.0 / float(hidden_size) ** 0.5)
            layer[f'b_ih_{d}'] = rnd((4 * hidden_size,), 0.1)
            layer[f'b_hh_{d}'] = rnd((4 * hidden_size,), 0.1)
        lstm.append(layer)
    params['lstm'] = lstm

    # TODO(synk): source module declares Linear(hidden_size, middle_feature) but the
    # bidirectional LSTM emits 2*hidden_size features (shape bug in the PyTorch code);
    # we use input dim 2*hidden_size so the forward pass is well-defined.
    params['mlp1_w'] = rnd((middle_feature, 2 * hidden_size), 0.2)
    params['mlp1_b'] = rnd((middle_feature,), 0.1)
    params['mlp2_w'] = rnd((num_classes, middle_feature), 0.2)
    params['mlp2_b'] = rnd((num_classes,), 0.1)
    return params


if __name__ == "__main__":
    num_classes, hidden_size, num_layers, middle_feature = 4, 32, 2, 32
    B, T, F = 2, 8, 129      # F = 129 so 4*F matches the module's hardcoded embedding_dim

    key = jax.random.PRNGKey(0)
    k_x, k_p = jax.random.split(key)
    x = jax.random.normal(k_x, (B, T, F), dtype=jnp.float32)
    params = init_params(k_p, F, num_classes, hidden_size, num_layers, middle_feature)

    # One-time host-side packing (banded conv matrices, fused-direction gate layout,
    # lane-padded output projection).
    packed = pack_params(params, F, hidden_size, num_layers)

    # TODO(synk): nn.LSTM dropout(0.2) between layers is train-mode-only stochastic;
    # eval/inference semantics are used here, so it is an identity.
    fwd = jax.jit(functools.partial(net_forward, hidden_size=hidden_size,
                                    num_layers=num_layers, num_classes=num_classes))
    out = fwd(x, packed)
    jax.block_until_ready(out)
    assert out.shape == (T, B, num_classes), out.shape
    print("KERNEL_OK")
</pallas_src>

<mosaic_0001>
module attributes {stable_mosaic.version = 11 : i64} {
  func.func @fused_net_kernel(%arg0: memref<16x129xf32, #tpu.memory_space<vmem>>, %arg1: memref<129x258xf32, #tpu.memory_space<vmem>>, %arg2: memref<1x258xf32, #tpu.memory_space<vmem>>, %arg3: memref<258x516xf32, #tpu.memory_space<vmem>>, %arg4: memref<1x516xf32, #tpu.memory_space<vmem>>, %arg5: memref<516x256xf32, #tpu.memory_space<vmem>>, %arg6: memref<516x256xf32, #tpu.memory_space<vmem>>, %arg7: memref<64x256xf32, #tpu.memory_space<vmem>>, %arg8: memref<1x256xf32, #tpu.memory_space<vmem>>, %arg9: memref<1x256xf32, #tpu.memory_space<vmem>>, %arg10: memref<64x256xf32, #tpu.memory_space<vmem>>, %arg11: memref<64x256xf32, #tpu.memory_space<vmem>>, %arg12: memref<64x256xf32, #tpu.memory_space<vmem>>, %arg13: memref<1x256xf32, #tpu.memory_space<vmem>>, %arg14: memref<1x256xf32, #tpu.memory_space<vmem>>, %arg15: memref<64x32xf32, #tpu.memory_space<vmem>>, %arg16: memref<1x32xf32, #tpu.memory_space<vmem>>, %arg17: memref<32x128xf32, #tpu.memory_space<vmem>>, %arg18: memref<1x128xf32, #tpu.memory_space<vmem>>, %arg19: memref<16x128xf32, #tpu.memory_space<vmem>>, %arg20: memref<16x64xf32, #tpu.memory_space<vmem>>, %arg21: memref<16x64xf32, #tpu.memory_space<vmem>>, %arg22: memref<16x256xf32, #tpu.memory_space<vmem>>, %arg23: memref<16x256xf32, #tpu.memory_space<vmem>>) attributes {dimension_semantics = [], scalar_prefetch = 0 : i64, scratch_operands = 4 : i64, tpu.core_type = #tpu.core_type<tc>} {
    %c0 = arith.constant 0 : index
    %c0_0 = arith.constant 0 : index
    %0 = vector.load %arg0[%c0, %c0_0] : memref<16x129xf32, #tpu.memory_space<vmem>>, vector<16x129xf32>
    %c0_1 = arith.constant 0 : index
    %c0_2 = arith.constant 0 : index
    %1 = vector.load %arg1[%c0_1, %c0_2] : memref<129x258xf32, #tpu.memory_space<vmem>>, vector<129x258xf32>
    %cst = arith.constant dense<0.000000e+00> : vector<16x258xf32>
    %2 = tpu.matmul %0, %1, %cst {dimension_numbers = #tpu.dot_dimension_numbers<[1], [0], [0], [1], [0, 0, 1, 1], [], []>} : vector<16x129xf32>, vector<129x258xf32>, vector<16x258xf32> -> vector<16x258xf32>
    %c0_3 = arith.constant 0 : index
    %c0_4 = arith.constant 0 : index
    %3 = vector.load %arg2[%c0_3, %c0_4] : memref<1x258xf32, #tpu.memory_space<vmem>>, vector<1x258xf32>
    %4 = vector.broadcast %3 : vector<1x258xf32> to vector<16x258xf32>
    %5 = arith.addf %2, %4 : vector<16x258xf32>
    %cst_5 = arith.constant 0.000000e+00 : f32
    %6 = vector.broadcast %cst_5 : f32 to vector<16x258xf32>
    %7 = arith.maximumf %5, %6 : vector<16x258xf32>
    %c0_6 = arith.constant 0 : index
    %c0_7 = arith.constant 0 : index
    %8 = vector.load %arg3[%c0_6, %c0_7] : memref<258x516xf32, #tpu.memory_space<vmem>>, vector<258x516xf32>
    %cst_8 = arith.constant dense<0.000000e+00> : vector<16x516xf32>
    %9 = tpu.matmul %7, %8, %cst_8 {dimension_numbers = #tpu.dot_dimension_numbers<[1], [0], [0], [1], [0, 0, 1, 1], [], []>} : vector<16x258xf32>, vector<258x516xf32>, vector<16x516xf32> -> vector<16x516xf32>
    %c0_9 = arith.constant 0 : index
    %c0_10 = arith.constant 0 : index
    %10 = vector.load %arg4[%c0_9, %c0_10] : memref<1x516xf32, #tpu.memory_space<vmem>>, vector<1x516xf32>
    %11 = vector.broadcast %10 : vector<1x516xf32> to vector<16x516xf32>
    %12 = arith.addf %9, %11 : vector<16x516xf32>
    %cst_11 = arith.constant 0.000000e+00 : f32
    %13 = vector.broadcast %cst_11 : f32 to vector<16x516xf32>
    %14 = arith.maximumf %12, %13 : vector<16x516xf32>
    %c0_12 = arith.constant 0 : index
    %c0_13 = arith.constant 0 : index
    %15 = vector.load %arg5[%c0_12, %c0_13] : memref<516x256xf32, #tpu.memory_space<vmem>>, vector<516x256xf32>
    %cst_14 = arith.constant dense<0.000000e+00> : vector<16x256xf32>
    %16 = tpu.matmul %14, %15, %cst_14 {dimension_numbers = #tpu.dot_dimension_numbers<[1], [0], [0], [1], [0, 0, 1, 1], [], []>} : vector<16x516xf32>, vector<516x256xf32>, vector<16x256xf32> -> vector<16x256xf32>
    %c0_15 = arith.constant 0 : index
    %c0_16 = arith.constant 0 : index
    %17 = vector.load %arg8[%c0_15, %c0_16] : memref<1x256xf32, #tpu.memory_space<vmem>>, vector<1x256xf32>
    %18 = vector.broadcast %17 : vector<1x256xf32> to vector<16x256xf32>
    %19 = arith.addf %16, %18 : vector<16x256xf32>
    %c0_17 = arith.constant 0 : index
    %c0_18 = arith.constant 0 : index
    %20 = vector.load %arg22[%c0_17, %c0_18] : memref<16x256xf32, #tpu.memory_space<vmem>>, vector<16x256xf32>
    tpu.vector_store %arg22[%c0_17, %c0_18], %19 {strides = array<i32>} : memref<16x256xf32, #tpu.memory_space<vmem>>, vector<16x256xf32>,
    %c0_19 = arith.constant 0 : index
    %c0_20 = arith.constant 0 : index
    %21 = vector.load %arg6[%c0_19, %c0_20] : memref<516x256xf32, #tpu.memory_space<vmem>>, vector<516x256xf32>
    %cst_21 = arith.constant dense<0.000000e+00> : vector<16x256xf32>
    %22 = tpu.matmul %14, %21, %cst_21 {dimension_numbers = #tpu.dot_dimension_numbers<[1], [0], [0], [1], [0, 0, 1, 1], [], []>} : vector<16x516xf32>, vector<516x256xf32>, vector<16x256xf32> -> vector<16x256xf32>
    %c0_22 = arith.constant 0 : index
    %c0_23 = arith.constant 0 : index
    %23 = vector.load %arg9[%c0_22, %c0_23] : memref<1x256xf32, #tpu.memory_space<vmem>>, vector<1x256xf32>
    %24 = vector.broadcast %23 : vector<1x256xf32> to vector<16x256xf32>
    %25 = arith.addf %22, %24 : vector<16x256xf32>
    %c0_24 = arith.constant 0 : index
    %c0_25 = arith.constant 0 : index
    %26 = vector.load %arg23[%c0_24, %c0_25] : memref<16x256xf32, #tpu.memory_space<vmem>>, vector<16x256xf32>
    tpu.vector_store %arg23[%c0_24, %c0_25], %25 {strides = array<i32>} : memref<16x256xf32, #tpu.memory_space<vmem>>, vector<16x256xf32>,
    %c0_26 = arith.constant 0 : index
    %c0_27 = arith.constant 0 : index
    %27 = vector.load %arg7[%c0_26, %c0_27] : memref<64x256xf32, #tpu.memory_space<vmem>>, vector<64x256xf32>
    %cst_28 = arith.constant 0.000000e+00 : f32
    %28 = vector.broadcast %cst_28 : f32 to vector<2x64xf32>
    %cst_29 = arith.constant 0.000000e+00 : f32
    %29 = vector.broadcast %cst_29 : f32 to vector<2x64xf32>
    %c0_30 = arith.constant 0 : index
    %c0_31 = arith.constant 0 : index
    %30 = vector.load %arg22[%c0_30, %c0_31] : memref<16x256xf32, #tpu.memory_space<vmem>>, vector<2x256xf32>
    %c14 = arith.constant 14 : index
    %c0_32 = arith.constant 0 : index
    %31 = vector.load %arg23[%c14, %c0_32] : memref<16x256xf32, #tpu.memory_space<vmem>>, vector<2x256xf32>
    %32 = arith.addf %30, %31 : vector<2x256xf32>
    %cst_33 = arith.constant dense<0.000000e+00> : vector<2x256xf32>
    %33 = tpu.matmul %28, %27, %cst_33 {dimension_numbers = #tpu.dot_dimension_numbers<[1], [0], [0], [1], [0, 0, 1, 1], [], []>} : vector<2x64xf32>, vector<64x256xf32>, vector<2x256xf32> -> vector<2x256xf32>
    %34 = arith.addf %32, %33 : vector<2x256xf32>
    %35 = vector.extract_strided_slice %34 {offsets = [0, 0], sizes = [2, 64], strides = [1, 1]} : vector<2x256xf32> to vector<2x64xf32>
    %cst_34 = arith.constant 0.000000e+00 : f32
    %36 = vector.broadcast %cst_34 : f32 to vector<2x64xf32>
    %37 = arith.subf %36, %35 : vector<2x64xf32>
    %38 = math.exp %37 : vector<2x64xf32>
    %cst_35 = arith.constant 1.000000e+00 : f32
    %39 = vector.broadcast %cst_35 : f32 to vector<2x64xf32>
    %40 = arith.addf %39, %38 : vector<2x64xf32>
    %cst_36 = arith.constant 1.000000e+00 : f32
    %41 = vector.broadcast %cst_36 : f32 to vector<2x64xf32>
    %42 = arith.divf %41, %40 : vector<2x64xf32>
    %43 = vector.extract_strided_slice %34 {offsets = [0, 64], sizes = [2, 64], strides = [1, 1]} : vector<2x256xf32> to vector<2x64xf32>
    %cst_37 = arith.constant 0.000000e+00 : f32
    %44 = vector.broadcast %cst_37 : f32 to vector<2x64xf32>
    %45 = arith.subf %44, %43 : vector<2x64xf32>
    %46 = math.exp %45 : vector<2x64xf32>
    %cst_38 = arith.constant 1.000000e+00 : f32
    %47 = vector.broadcast %cst_38 : f32 to vector<2x64xf32>
    %48 = arith.addf %47, %46 : vector<2x64xf32>
    %cst_39 = arith.constant 1.000000e+00 : f32
    %49 = vector.broadcast %cst_39 : f32 to vector<2x64xf32>
    %50 = arith.divf %49, %48 : vector<2x64xf32>
    %51 = vector.extract_strided_slice %34 {offsets = [0, 128], sizes = [2, 64], strides = [1, 1]} : vector<2x256xf32> to vector<2x64xf32>
    %52 = math.tanh %51 : vector<2x64xf32>
    %53 = vector.extract_strided_slice %34 {offsets = [0, 192], sizes = [2, 64], strides = [1, 1]} : vector<2x256xf32> to vector<2x64xf32>
    %cst_40 = arith.constant 0.000000e+00 : f32
    %54 = vector.broadcast %cst_40 : f32 to vector<2x64xf32>
    %55 = arith.subf %54, %53 : vector<2x64xf32>
    %56 = math.exp %55 : vector<2x64xf32>
    %cst_41 = arith.constant 1.000000e+00 : f32
    %57 = vector.broadcast %cst_41 : f32 to vector<2x64xf32>
    %58 = arith.addf %57, %56 : vector<2x64xf32>
    %cst_42 = arith.constant 1.000000e+00 : f32
    %59 = vector.broadcast %cst_42 : f32 to vector<2x64xf32>
    %60 = arith.divf %59, %58 : vector<2x64xf32>
    %61 = arith.mulf %50, %29 : vector<2x64xf32>
    %62 = arith.mulf %42, %52 : vector<2x64xf32>
    %63 = arith.addf %61, %62 : vector<2x64xf32>
    %64 = math.tanh %63 : vector<2x64xf32>
    %65 = arith.mulf %60, %64 : vector<2x64xf32>
    %c0_43 = arith.constant 0 : index
    %c0_44 = arith.constant 0 : index
    %66 = vector.load %arg20[%c0_43, %c0_44] : memref<16x64xf32, #tpu.memory_space<vmem>>, vector<2x64xf32>
    tpu.vector_store %arg20[%c0_43, %c0_44], %65 {strides = array<i32>} : memref<16x64xf32, #tpu.memory_space<vmem>>, vector<2x64xf32>,
    %c14_45 = arith.constant 14 : index
    %c0_46 = arith.constant 0 : index
    %67 = vector.load %arg21[%c14_45, %c0_46] : memref<16x64xf32, #tpu.memory_space<vmem>>, vector<2x64xf32>
    tpu.vector_store %arg21[%c14_45, %c0_46], %65 {strides = array<i32>} : memref<16x64xf32, #tpu.memory_space<vmem>>, vector<2x64xf32>,
    %c2 = arith.constant 2 : index
    %c0_47 = arith.constant 0 : index
    %68 = vector.load %arg22[%c2, %c0_47] : memref<16x256xf32, #tpu.memory_space<vmem>>, vector<2x256xf32>
    %c12 = arith.constant 12 : index
    %c0_48 = arith.constant 0 : index
    %69 = vector.load %arg23[%c12, %c0_48] : memref<16x256xf32, #tpu.memory_space<vmem>>, vector<2x256xf32>
    %70 = arith.addf %68, %69 : vector<2x256xf32>
    %cst_49 = arith.constant dense<0.000000e+00> : vector<2x256xf32>
    %71 = tpu.matmul %65, %27, %cst_49 {dimension_numbers = #tpu.dot_dimension_numbers<[1], [0], [0], [1], [0, 0, 1, 1], [], []>} : vector<2x64xf32>, vector<64x256xf32>, vector<2x256xf32> -> vector<2x256xf32>
    %72 = arith.addf %70, %71 : vector<2x256xf32>
    %73 = vector.extract_strided_slice %72 {offsets = [0, 0], sizes = [2, 64], strides = [1, 1]} : vector<2x256xf32> to vector<2x64xf32>
    %cst_50 = arith.constant 0.000000e+00 : f32
    %74 = vector.broadcast %cst_50 : f32 to vector<2x64xf32>
    %75 = arith.subf %74, %73 : vector<2x64xf32>
    %76 = math.exp %75 : vector<2x64xf32>
    %cst_51 = arith.constant 1.000000e+00 : f32
    %77 = vector.broadcast %cst_51 : f32 to vector<2x64xf32>
    %78 = arith.addf %77, %76 : vector<2x64xf32>
    %cst_52 = arith.constant 1.000000e+00 : f32
    %79 = vector.broadcast %cst_52 : f32 to vector<2x64xf32>
    %80 = arith.divf %79, %78 : vector<2x64xf32>
    %81 = vector.extract_strided_slice %72 {offsets = [0, 64], sizes = [2, 64], strides = [1, 1]} : vector<2x256xf32> to vector<2x64xf32>
    %cst_53 = arith.constant 0.000000e+00 : f32
    %82 = vector.broadcast %cst_53 : f32 to vector<2x64xf32>
    %83 = arith.subf %82, %81 : vector<2x64xf32>
    %84 = math.exp %83 : vector<2x64xf32>
    %cst_54 = arith.constant 1.000000e+00 : f32
    %85 = vector.broadcast %cst_54 : f32 to vector<2x64xf32>
    %86 = arith.addf %85, %84 : vector<2x64xf32>
    %cst_55 = arith.constant 1.000000e+00 : f32
    %87 = vector.broadcast %cst_55 : f32 to vector<2x64xf32>
    %88 = arith.divf %87, %86 : vector<2x64xf32>
    %89 = vector.extract_strided_slice %72 {offsets = [0, 128], sizes = [2, 64], strides = [1, 1]} : vector<2x256xf32> to vector<2x64xf32>
    %90 = math.tanh %89 : vector<2x64xf32>
    %91 = vector.extract_strided_slice %72 {offsets = [0, 192], sizes = [2, 64], strides = [1, 1]} : vector<2x256xf32> to vector<2x64xf32>
    %cst_56 = arith.constant 0.000000e+00 : f32
    %92 = vector.broadcast %cst_56 : f32 to vector<2x64xf32>
    %93 = arith.subf %92, %91 : vector<2x64xf32>
    %94 = math.exp %93 : vector<2x64xf32>
    %cst_57 = arith.constant 1.000000e+00 : f32
    %95 = vector.broadcast %cst_57 : f32 to vector<2x64xf32>
    %96 = arith.addf %95, %94 : vector<2x64xf32>
    %cst_58 = arith.constant 1.000000e+00 : f32
    %97 = vector.broadcast %cst_58 : f32 to vector<2x64xf32>
    %98 = arith.divf %97, %96 : vector<2x64xf32>
    %99 = arith.mulf %88, %63 : vector<2x64xf32>
    %100 = arith.mulf %80, %90 : vector<2x64xf32>
    %101 = arith.addf %99, %100 : vector<2x64xf32>
    %102 = math.tanh %101 : vector<2x64xf32>
    %103 = arith.mulf %98, %102 : vector<2x64xf32>
    %c2_59 = arith.constant 2 : index
    %c0_60 = arith.constant 0 : index
    %104 = vector.load %arg20[%c2_59, %c0_60] : memref<16x64xf32, #tpu.memory_space<vmem>>, vector<2x64xf32>
    tpu.vector_store %arg20[%c2_59, %c0_60], %103 {strides = array<i32>} : memref<16x64xf32, #tpu.memory_space<vmem>>, vector<2x64xf32>,
    %c12_61 = arith.constant 12 : index
    %c0_62 = arith.constant 0 : index
    %105 = vector.load %arg21[%c12_61, %c0_62] : memref<16x64xf32, #tpu.memory_space<vmem>>, vector<2x64xf32>
    tpu.vector_store %arg21[%c12_61, %c0_62], %103 {strides = array<i32>} : memref<16x64xf32, #tpu.memory_space<vmem>>, vector<2x64xf32>,
    %c4 = arith.constant 4 : index
    %c0_63 = arith.constant 0 : index
    %106 = vector.load %arg22[%c4, %c0_63] : memref<16x256xf32, #tpu.memory_space<vmem>>, vector<2x256xf32>
    %c10 = arith.constant 10 : index
    %c0_64 = arith.constant 0 : index
    %107 = vector.load %arg23[%c10, %c0_64] : memref<16x256xf32, #tpu.memory_space<vmem>>, vector<2x256xf32>
    %108 = arith.addf %106, %107 : vector<2x256xf32>
    %cst_65 = arith.constant dense<0.000000e+00> : vector<2x256xf32>
    %109 = tpu.matmul %103, %27, %cst_65 {dimension_numbers = #tpu.dot_dimension_numbers<[1], [0], [0], [1], [0, 0, 1, 1], [], []>} : vector<2x64xf32>, vector<64x256xf32>, vector<2x256xf32> -> vector<2x256xf32>
    %110 = arith.addf %108, %109 : vector<2x256xf32>
    %111 = vector.extract_strided_slice %110 {offsets = [0, 0], sizes = [2, 64], strides = [1, 1]} : vector<2x256xf32> to vector<2x64xf32>
    %cst_66 = arith.constant 0.000000e+00 : f32
    %112 = vector.broadcast %cst_66 : f32 to vector<2x64xf32>
    %113 = arith.subf %112, %111 : vector<2x64xf32>
    %114 = math.exp %113 : vector<2x64xf32>
    %cst_67 = arith.constant 1.000000e+00 : f32
    %115 = vector.broadcast %cst_67 : f32 to vector<2x64xf32>
    %116 = arith.addf %115, %114 : vector<2x64xf32>
    %cst_68 = arith.constant 1.000000e+00 : f32
    %117 = vector.broadcast %cst_68 : f32 to vector<2x64xf32>
    %118 = arith.divf %117, %116 : vector<2x64xf32>
    %119 = vector.extract_strided_slice %110 {offsets = [0, 64], sizes = [2, 64], strides = [1, 1]} : vector<2x256xf32> to vector<2x64xf32>
    %cst_69 = arith.constant 0.000000e+00 : f32
    %120 = vector.broadcast %cst_69 : f32 to vector<2x64xf32>
    %121 = arith.subf %120, %119 : vector<2x64xf32>
    %122 = math.exp %121 : vector<2x64xf32>
    %cst_70 = arith.constant 1.000000e+00 : f32
    %123 = vector.broadcast %cst_70 : f32 to vector<2x64xf32>
    %124 = arith.addf %123, %122 : vector<2x64xf32>
    %cst_71 = arith.constant 1.000000e+00 : f32
    %125 = vector.broadcast %cst_71 : f32 to vector<2x64xf32>
    %126 = arith.divf %125, %124 : vector<2x64xf32>
    %127 = vector.extract_strided_slice %110 {offsets = [0, 128], sizes = [2, 64], strides = [1, 1]} : vector<2x256xf32> to vector<2x64xf32>
    %128 = math.tanh %127 : vector<2x64xf32>
    %129 = vector.extract_strided_slice %110 {offsets = [0, 192], sizes = [2, 64], strides = [1, 1]} : vector<2x256xf32> to vector<2x64xf32>
    %cst_72 = arith.constant 0.000000e+00 : f32
    %130 = vector.broadcast %cst_72 : f32 to vector<2x64xf32>
    %131 = arith.subf %130, %129 : vector<2x64xf32>
    %132 = math.exp %131 : vector<2x64xf32>
    %cst_73 = arith.constant 1.000000e+00 : f32
    %133 = vector.broadcast %cst_73 : f32 to vector<2x64xf32>
    %134 = arith.addf %133, %132 : vector<2x64xf32>
    %cst_74 = arith.constant 1.000000e+00 : f32
    %135 = vector.broadcast %cst_74 : f32 to vector<2x64xf32>
    %136 = arith.divf %135, %134 : vector<2x64xf32>
    %137 = arith.mulf %126, %101 : vector<2x64xf32>
    %138 = arith.mulf %118, %128 : vector<2x64xf32>
    %139 = arith.addf %137, %138 : vector<2x64xf32>
    %140 = math.tanh %139 : vector<2x64xf32>
    %141 = arith.mulf %136, %140 : vector<2x64xf32>
    %c4_75 = arith.constant 4 : index
    %c0_76 = arith.constant 0 : index
    %142 = vector.load %arg20[%c4_75, %c0_76] : memref<16x64xf32, #tpu.memory_space<vmem>>, vector<2x64xf32>
    tpu.vector_store %arg20[%c4_75, %c0_76], %141 {strides = array<i32>} : memref<16x64xf32, #tpu.memory_space<vmem>>, vector<2x64xf32>,
    %c10_77 = arith.constant 10 : index
    %c0_78 = arith.constant 0 : index
    %143 = vector.load %arg21[%c10_77, %c0_78] : memref<16x64xf32, #tpu.memory_space<vmem>>, vector<2x64xf32>
    tpu.vector_store %arg21[%c10_77, %c0_78], %141 {strides = array<i32>} : memref<16x64xf32, #tpu.memory_space<vmem>>, vector<2x64xf32>,
    %c6 = arith.constant 6 : index
    %c0_79 = arith.constant 0 : index
    %144 = vector.load %arg22[%c6, %c0_79] : memref<16x256xf32, #tpu.memory_space<vmem>>, vector<2x256xf32>
    %c8 = arith.constant 8 : index
    %c0_80 = arith.constant 0 : index
    %145 = vector.load %arg23[%c8, %c0_80] : memref<16x256xf32, #tpu.memory_space<vmem>>, vector<2x256xf32>
    %146 = arith.addf %144, %145 : vector<2x256xf32>
    %cst_81 = arith.constant dense<0.000000e+00> : vector<2x256xf32>
    %147 = tpu.matmul %141, %27, %cst_81 {dimension_numbers = #tpu.dot_dimension_numbers<[1], [0], [0], [1], [0, 0, 1, 1], [], []>} : vector<2x64xf32>, vector<64x256xf32>, vector<2x256xf32> -> vector<2x256xf32>
    %148 = arith.addf %146, %147 : vector<2x256xf32>
    %149 = vector.extract_strided_slice %148 {offsets = [0, 0], sizes = [2, 64], strides = [1, 1]} : vector<2x256xf32> to vector<2x64xf32>
    %cst_82 = arith.constant 0.000000e+00 : f32
    %150 = vector.broadcast %cst_82 : f32 to vector<2x64xf32>
    %151 = arith.subf %150, %149 : vector<2x64xf32>
    %152 = math.exp %151 : vector<2x64xf32>
    %cst_83 = arith.constant 1.000000e+00 : f32
    %153 = vector.broadcast %cst_83 : f32 to vector<2x64xf32>
    %154 = arith.addf %153, %152 : vector<2x64xf32>
    %cst_84 = arith.constant 1.000000e+00 : f32
    %155 = vector.broadcast %cst_84 : f32 to vector<2x64xf32>
    %156 = arith.divf %155, %154 : vector<2x64xf32>
    %157 = vector.extract_strided_slice %148 {offsets = [0, 64], sizes = [2, 64], strides = [1, 1]} : vector<2x256xf32> to vector<2x64xf32>
    %cst_85 = arith.constant 0.000000e+00 : f32
    %158 = vector.broadcast %cst_85 : f32 to vector<2x64xf32>
    %159 = arith.subf %158, %157 : vector<2x64xf32>
    %160 = math.exp %159 : vector<2x64xf32>
    %cst_86 = arith.constant 1.000000e+00 : f32
    %161 = vector.broadcast %cst_86 : f32 to vector<2x64xf32>
    %162 = arith.addf %161, %160 : vector<2x64xf32>
    %cst_87 = arith.constant 1.000000e+00 : f32
    %163 = vector.broadcast %cst_87 : f32 to vector<2x64xf32>
    %164 = arith.divf %163, %162 : vector<2x64xf32>
    %165 = vector.extract_strided_slice %148 {offsets = [0, 128], sizes = [2, 64], strides = [1, 1]} : vector<2x256xf32> to vector<2x64xf32>
    %166 = math.tanh %165 : vector<2x64xf32>
    %167 = vector.extract_strided_slice %148 {offsets = [0, 192], sizes = [2, 64], strides = [1, 1]} : vector<2x256xf32> to vector<2x64xf32>
    %cst_88 = arith.constant 0.000000e+00 : f32
    %168 = vector.broadcast %cst_88 : f32 to vector<2x64xf32>
    %169 = arith.subf %168, %167 : vector<2x64xf32>
    %170 = math.exp %169 : vector<2x64xf32>
    %cst_89 = arith.constant 1.000000e+00 : f32
    %171 = vector.broadcast %cst_89 : f32 to vector<2x64xf32>
    %172 = arith.addf %171, %170 : vector<2x64xf32>
    %cst_90 = arith.constant 1.000000e+00 : f32
    %173 = vector.broadcast %cst_90 : f32 to vector<2x64xf32>
    %174 = arith.divf %173, %172 : vector<2x64xf32>
    %175 = arith.mulf %164, %139 : vector<2x64xf32>
    %176 = arith.mulf %156, %166 : vector<2x64xf32>
    %177 = arith.addf %175, %176 : vector<2x64xf32>
    %178 = math.tanh %177 : vector<2x64xf32>
    %179 = arith.mulf %174, %178 : vector<2x64xf32>
    %c6_91 = arith.constant 6 : index
    %c0_92 = arith.constant 0 : index
    %180 = vector.load %arg20[%c6_91, %c0_92] : memref<16x64xf32, #tpu.memory_space<vmem>>, vector<2x64xf32>
    tpu.vector_store %arg20[%c6_91, %c0_92], %179 {strides = array<i32>} : memref<16x64xf32, #tpu.memory_space<vmem>>, vector<2x64xf32>,
    %c8_93 = arith.constant 8 : index
    %c0_94 = arith.constant 0 : index
    %181 = vector.load %arg21[%c8_93, %c0_94] : memref<16x64xf32, #tpu.memory_space<vmem>>, vector<2x64xf32>
    tpu.vector_store %arg21[%c8_93, %c0_94], %179 {strides = array<i32>} : memref<16x64xf32, #tpu.memory_space<vmem>>, vector<2x64xf32>,
    %c8_95 = arith.constant 8 : index
    %c0_96 = arith.constant 0 : index
    %182 = vector.load %arg22[%c8_95, %c0_96] : memref<16x256xf32, #tpu.memory_space<vmem>>, vector<2x256xf32>
    %c6_97 = arith.constant 6 : index
    %c0_98 = arith.constant 0 : index
    %183 = vector.load %arg23[%c6_97, %c0_98] : memref<16x256xf32, #tpu.memory_space<vmem>>, vector<2x256xf32>
    %184 = arith.addf %182, %183 : vector<2x256xf32>
    %cst_99 = arith.constant dense<0.000000e+00> : vector<2x256xf32>
    %185 = tpu.matmul %179, %27, %cst_99 {dimension_numbers = #tpu.dot_dimension_numbers<[1], [0], [0], [1], [0, 0, 1, 1], [], []>} : vector<2x64xf32>, vector<64x256xf32>, vector<2x256xf32> -> vector<2x256xf32>
    %186 = arith.addf %184, %185 : vector<2x256xf32>
    %187 = vector.extract_strided_slice %186 {offsets = [0, 0], sizes = [2, 64], strides = [1, 1]} : vector<2x256xf32> to vector<2x64xf32>
    %cst_100 = arith.constant 0.000000e+00 : f32
    %188 = vector.broadcast %cst_100 : f32 to vector<2x64xf32>
    %189 = arith.subf %188, %187 : vector<2x64xf32>
    %190 = math.exp %189 : vector<2x64xf32>
    %cst_101 = arith.constant 1.000000e+00 : f32
    %191 = vector.broadcast %cst_101 : f32 to vector<2x64xf32>
    %192 = arith.addf %191, %190 : vector<2x64xf32>
    %cst_102 = arith.constant 1.000000e+00 : f32
    %193 = vector.broadcast %cst_102 : f32 to vector<2x64xf32>
    %194 = arith.divf %193, %192 : vector<2x64xf32>
    %195 = vector.extract_strided_slice %186 {offsets = [0, 64], sizes = [2, 64], strides = [1, 1]} : vector<2x256xf32> to vector<2x64xf32>
    %cst_103 = arith.constant 0.000000e+00 : f32
    %196 = vector.broadcast %cst_103 : f32 to vector<2x64xf32>
    %197 = arith.subf %196, %195 : vector<2x64xf32>
    %198 = math.exp %197 : vector<2x64xf32>
    %cst_104 = arith.constant 1.000000e+00 : f32
    %199 = vector.broadcast %cst_104 : f32 to vector<2x64xf32>
    %200 = arith.addf %199, %198 : vector<2x64xf32>
    %cst_105 = arith.constant 1.000000e+00 : f32
    %201 = vector.broadcast %cst_105 : f32 to vector<2x64xf32>
    %202 = arith.divf %201, %200 : vector<2x64xf32>
    %203 = vector.extract_strided_slice %186 {offsets = [0, 128], sizes = [2, 64], strides = [1, 1]} : vector<2x256xf32> to vector<2x64xf32>
    %204 = math.tanh %203 : vector<2x64xf32>
    %205 = vector.extract_strided_slice %186 {offsets = [0, 192], sizes = [2, 64], strides = [1, 1]} : vector<2x256xf32> to vector<2x64xf32>
    %cst_106 = arith.constant 0.000000e+00 : f32
    %206 = vector.broadcast %cst_106 : f32 to vector<2x64xf32>
    %207 = arith.subf %206, %205 : vector<2x64xf32>
    %208 = math.exp %207 : vector<2x64xf32>
    %cst_107 = arith.constant 1.000000e+00 : f32
    %209 = vector.broadcast %cst_107 : f32 to vector<2x64xf32>
    %210 = arith.addf %209, %208 : vector<2x64xf32>
    %cst_108 = arith.constant 1.000000e+00 : f32
    %211 = vector.broadcast %cst_108 : f32 to vector<2x64xf32>
    %212 = arith.divf %211, %210 : vector<2x64xf32>
    %213 = arith.mulf %202, %177 : vector<2x64xf32>
    %214 = arith.mulf %194, %204 : vector<2x64xf32>
    %215 = arith.addf %213, %214 : vector<2x64xf32>
    %216 = math.tanh %215 : vector<2x64xf32>
    %217 = arith.mulf %212, %216 : vector<2x64xf32>
    %c8_109 = arith.constant 8 : index
    %c0_110 = arith.constant 0 : index
    %218 = vector.load %arg20[%c8_109, %c0_110] : memref<16x64xf32, #tpu.memory_space<vmem>>, vector<2x64xf32>
    tpu.vector_store %arg20[%c8_109, %c0_110], %217 {strides = array<i32>} : memref<16x64xf32, #tpu.memory_space<vmem>>, vector<2x64xf32>,
    %c6_111 = arith.constant 6 : index
    %c0_112 = arith.constant 0 : index
    %219 = vector.load %arg21[%c6_111, %c0_112] : memref<16x64xf32, #tpu.memory_space<vmem>>, vector<2x64xf32>
    tpu.vector_store %arg21[%c6_111, %c0_112], %217 {strides = array<i32>} : memref<16x64xf32, #tpu.memory_space<vmem>>, vector<2x64xf32>,
    %c10_113 = arith.constant 10 : index
    %c0_114 = arith.constant 0 : index
    %220 = vector.load %arg22[%c10_113, %c0_114] : memref<16x256xf32, #tpu.memory_space<vmem>>, vector<2x256xf32>
    %c4_115 = arith.constant 4 : index
    %c0_116 = arith.constant 0 : index
    %221 = vector.load %arg23[%c4_115, %c0_116] : memref<16x256xf32, #tpu.memory_space<vmem>>, vector<2x256xf32>
    %222 = arith.addf %220, %221 : vector<2x256xf32>
    %cst_117 = arith.constant dense<0.000000e+00> : vector<2x256xf32>
    %223 = tpu.matmul %217, %27, %cst_117 {dimension_numbers = #tpu.dot_dimension_numbers<[1], [0], [0], [1], [0, 0, 1, 1], [], []>} : vector<2x64xf32>, vector<64x256xf32>, vector<2x256xf32> -> vector<2x256xf32>
    %224 = arith.addf %222, %223 : vector<2x256xf32>
    %225 = vector.extract_strided_slice %224 {offsets = [0, 0], sizes = [2, 64], strides = [1, 1]} : vector<2x256xf32> to vector<2x64xf32>
    %cst_118 = arith.constant 0.000000e+00 : f32
    %226 = vector.broadcast %cst_118 : f32 to vector<2x64xf32>
    %227 = arith.subf %226, %225 : vector<2x64xf32>
    %228 = math.exp %227 : vector<2x64xf32>
    %cst_119 = arith.constant 1.000000e+00 : f32
    %229 = vector.broadcast %cst_119 : f32 to vector<2x64xf32>
    %230 = arith.addf %229, %228 : vector<2x64xf32>
    %cst_120 = arith.constant 1.000000e+00 : f32
    %231 = vector.broadcast %cst_120 : f32 to vector<2x64xf32>
    %232 = arith.divf %231, %230 : vector<2x64xf32>
    %233 = vector.extract_strided_slice %224 {offsets = [0, 64], sizes = [2, 64], strides = [1, 1]} : vector<2x256xf32> to vector<2x64xf32>
    %cst_121 = arith.constant 0.000000e+00 : f32
    %234 = vector.broadcast %cst_121 : f32 to vector<2x64xf32>
    %235 = arith.subf %234, %233 : vector<2x64xf32>
    %236 = math.exp %235 : vector<2x64xf32>
    %cst_122 = arith.constant 1.000000e+00 : f32
    %237 = vector.broadcast %cst_122 : f32 to vector<2x64xf32>
    %238 = arith.addf %237, %236 : vector<2x64xf32>
    %cst_123 = arith.constant 1.000000e+00 : f32
    %239 = vector.broadcast %cst_123 : f32 to vector<2x64xf32>
    %240 = arith.divf %239, %238 : vector<2x64xf32>
    %241 = vector.extract_strided_slice %224 {offsets = [0, 128], sizes = [2, 64], strides = [1, 1]} : vector<2x256xf32> to vector<2x64xf32>
    %242 = math.tanh %241 : vector<2x64xf32>
    %243 = vector.extract_strided_slice %224 {offsets = [0, 192], sizes = [2, 64], strides = [1, 1]} : vector<2x256xf32> to vector<2x64xf32>
    %cst_124 = arith.constant 0.000000e+00 : f32
    %244 = vector.broadcast %cst_124 : f32 to vector<2x64xf32>
    %245 = arith.subf %244, %243 : vector<2x64xf32>
    %246 = math.exp %245 : vector<2x64xf32>
    %cst_125 = arith.constant 1.000000e+00 : f32
    %247 = vector.broadcast %cst_125 : f32 to vector<2x64xf32>
    %248 = arith.addf %247, %246 : vector<2x64xf32>
    %cst_126 = arith.constant 1.000000e+00 : f32
    %249 = vector.broadcast %cst_126 : f32 to vector<2x64xf32>
    %250 = arith.divf %249, %248 : vector<2x64xf32>
    %251 = arith.mulf %240, %215 : vector<2x64xf32>
    %252 = arith.mulf %232, %242 : vector<2x64xf32>
    %253 = arith.addf %251, %252 : vector<2x64xf32>
    %254 = math.tanh %253 : vector<2x64xf32>
    %255 = arith.mulf %250, %254 : vector<2x64xf32>
    %c10_127 = arith.constant 10 : index
    %c0_128 = arith.constant 0 : index
    %256 = vector.load %arg20[%c10_127, %c0_128] : memref<16x64xf32, #tpu.memory_space<vmem>>, vector<2x64xf32>
    tpu.vector_store %arg20[%c10_127, %c0_128], %255 {strides = array<i32>} : memref<16x64xf32, #tpu.memory_space<vmem>>, vector<2x64xf32>,
    %c4_129 = arith.constant 4 : index
    %c0_130 = arith.constant 0 : index
    %257 = vector.load %arg21[%c4_129, %c0_130] : memref<16x64xf32, #tpu.memory_space<vmem>>, vector<2x64xf32>
    tpu.vector_store %arg21[%c4_129, %c0_130], %255 {strides = array<i32>} : memref<16x64xf32, #tpu.memory_space<vmem>>, vector<2x64xf32>,
    %c12_131 = arith.constant 12 : index
    %c0_132 = arith.constant 0 : index
    %258 = vector.load %arg22[%c12_131, %c0_132] : memref<16x256xf32, #tpu.memory_space<vmem>>, vector<2x256xf32>
    %c2_133 = arith.constant 2 : index
    %c0_134 = arith.constant 0 : index
    %259 = vector.load %arg23[%c2_133, %c0_134] : memref<16x256xf32, #tpu.memory_space<vmem>>, vector<2x256xf32>
    %260 = arith.addf %258, %259 : vector<2x256xf32>
    %cst_135 = arith.constant dense<0.000000e+00> : vector<2x256xf32>
    %261 = tpu.matmul %255, %27, %cst_135 {dimension_numbers = #tpu.dot_dimension_numbers<[1], [0], [0], [1], [0, 0, 1, 1], [], []>} : vector<2x64xf32>, vector<64x256xf32>, vector<2x256xf32> -> vector<2x256xf32>
    %262 = arith.addf %260, %261 : vector<2x256xf32>
    %263 = vector.extract_strided_slice %262 {offsets = [0, 0], sizes = [2, 64], strides = [1, 1]} : vector<2x256xf32> to vector<2x64xf32>
    %cst_136 = arith.constant 0.000000e+00 : f32
    %264 = vector.broadcast %cst_136 : f32 to vector<2x64xf32>
    %265 = arith.subf %264, %263 : vector<2x64xf32>
    %266 = math.exp %265 : vector<2x64xf32>
    %cst_137 = arith.constant 1.000000e+00 : f32
    %267 = vector.broadcast %cst_137 : f32 to vector<2x64xf32>
    %268 = arith.addf %267, %266 : vector<2x64xf32>
    %cst_138 = arith.constant 1.000000e+00 : f32
    %269 = vector.broadcast %cst_138 : f32 to vector<2x64xf32>
    %270 = arith.divf %269, %268 : vector<2x64xf32>
    %271 = vector.extract_strided_slice %262 {offsets = [0, 64], sizes = [2, 64], strides = [1, 1]} : vector<2x256xf32> to vector<2x64xf32>
    %cst_139 = arith.constant 0.000000e+00 : f32
    %272 = vector.broadcast %cst_139 : f32 to vector<2x64xf32>
    %273 = arith.subf %272, %271 : vector<2x64xf32>
    %274 = math.exp %273 : vector<2x64xf32>
    %cst_140 = arith.constant 1.000000e+00 : f32
    %275 = vector.broadcast %cst_140 : f32 to vector<2x64xf32>
    %276 = arith.addf %275, %274 : vector<2x64xf32>
    %cst_141 = arith.constant 1.000000e+00 : f32
    %277 = vector.broadcast %cst_141 : f32 to vector<2x64xf32>
    %278 = arith.divf %277, %276 : vector<2x64xf32>
    %279 = vector.extract_strided_slice %262 {offsets = [0, 128], sizes = [2, 64], strides = [1, 1]} : vector<2x256xf32> to vector<2x64xf32>
    %280 = math.tanh %279 : vector<2x64xf32>
    %281 = vector.extract_strided_slice %262 {offsets = [0, 192], sizes = [2, 64], strides = [1, 1]} : vector<2x256xf32> to vector<2x64xf32>
    %cst_142 = arith.constant 0.000000e+00 : f32
    %282 = vector.broadcast %cst_142 : f32 to vector<2x64xf32>
    %283 = arith.subf %282, %281 : vector<2x64xf32>
    %284 = math.exp %283 : vector<2x64xf32>
    %cst_143 = arith.constant 1.000000e+00 : f32
    %285 = vector.broadcast %cst_143 : f32 to vector<2x64xf32>
    %286 = arith.addf %285, %284 : vector<2x64xf32>
    %cst_144 = arith.constant 1.000000e+00 : f32
    %287 = vector.broadcast %cst_144 : f32 to vector<2x64xf32>
    %288 = arith.divf %287, %286 : vector<2x64xf32>
    %289 = arith.mulf %278, %253 : vector<2x64xf32>
    %290 = arith.mulf %270, %280 : vector<2x64xf32>
    %291 = arith.addf %289, %290 : vector<2x64xf32>
    %292 = math.tanh %291 : vector<2x64xf32>
    %293 = arith.mulf %288, %292 : vector<2x64xf32>
    %c12_145 = arith.constant 12 : index
    %c0_146 = arith.constant 0 : index
    %294 = vector.load %arg20[%c12_145, %c0_146] : memref<16x64xf32, #tpu.memory_space<vmem>>, vector<2x64xf32>
    tpu.vector_store %arg20[%c12_145, %c0_146], %293 {strides = array<i32>} : memref<16x64xf32, #tpu.memory_space<vmem>>, vector<2x64xf32>,
    %c2_147 = arith.constant 2 : index
    %c0_148 = arith.constant 0 : index
    %295 = vector.load %arg21[%c2_147, %c0_148] : memref<16x64xf32, #tpu.memory_space<vmem>>, vector<2x64xf32>
    tpu.vector_store %arg21[%c2_147, %c0_148], %293 {strides = array<i32>} : memref<16x64xf32, #tpu.memory_space<vmem>>, vector<2x64xf32>,
    %c14_149 = arith.constant 14 : index
    %c0_150 = arith.constant 0 : index
    %296 = vector.load %arg22[%c14_149, %c0_150] : memref<16x256xf32, #tpu.memory_space<vmem>>, vector<2x256xf32>
    %c0_151 = arith.constant 0 : index
    %c0_152 = arith.constant 0 : index
    %297 = vector.load %arg23[%c0_151, %c0_152] : memref<16x256xf32, #tpu.memory_space<vmem>>, vector<2x256xf32>
    %298 = arith.addf %296, %297 : vector<2x256xf32>
    %cst_153 = arith.constant dense<0.000000e+00> : vector<2x256xf32>
    %299 = tpu.matmul %293, %27, %cst_153 {dimension_numbers = #tpu.dot_dimension_numbers<[1], [0], [0], [1], [0, 0, 1, 1], [], []>} : vector<2x64xf32>, vector<64x256xf32>, vector<2x256xf32> -> vector<2x256xf32>
    %300 = arith.addf %298, %299 : vector<2x256xf32>
    %301 = vector.extract_strided_slice %300 {offsets = [0, 0], sizes = [2, 64], strides = [1, 1]} : vector<2x256xf32> to vector<2x64xf32>
    %cst_154 = arith.constant 0.000000e+00 : f32
    %302 = vector.broadcast %cst_154 : f32 to vector<2x64xf32>
    %303 = arith.subf %302, %301 : vector<2x64xf32>
    %304 = math.exp %303 : vector<2x64xf32>
    %cst_155 = arith.constant 1.000000e+00 : f32
    %305 = vector.broadcast %cst_155 : f32 to vector<2x64xf32>
    %306 = arith.addf %305, %304 : vector<2x64xf32>
    %cst_156 = arith.constant 1.000000e+00 : f32
    %307 = vector.broadcast %cst_156 : f32 to vector<2x64xf32>
    %308 = arith.divf %307, %306 : vector<2x64xf32>
    %309 = vector.extract_strided_slice %300 {offsets = [0, 64], sizes = [2, 64], strides = [1, 1]} : vector<2x256xf32> to vector<2x64xf32>
    %cst_157 = arith.constant 0.000000e+00 : f32
    %310 = vector.broadcast %cst_157 : f32 to vector<2x64xf32>
    %311 = arith.subf %310, %309 : vector<2x64xf32>
    %312 = math.exp %311 : vector<2x64xf32>
    %cst_158 = arith.constant 1.000000e+00 : f32
    %313 = vector.broadcast %cst_158 : f32 to vector<2x64xf32>
    %314 = arith.addf %313, %312 : vector<2x64xf32>
    %cst_159 = arith.constant 1.000000e+00 : f32
    %315 = vector.broadcast %cst_159 : f32 to vector<2x64xf32>
    %316 = arith.divf %315, %314 : vector<2x64xf32>
    %317 = vector.extract_strided_slice %300 {offsets = [0, 128], sizes = [2, 64], strides = [1, 1]} : vector<2x256xf32> to vector<2x64xf32>
    %318 = math.tanh %317 : vector<2x64xf32>
    %319 = vector.extract_strided_slice %300 {offsets = [0, 192], sizes = [2, 64], strides = [1, 1]} : vector<2x256xf32> to vector<2x64xf32>
    %cst_160 = arith.constant 0.000000e+00 : f32
    %320 = vector.broadcast %cst_160 : f32 to vector<2x64xf32>
    %321 = arith.subf %320, %319 : vector<2x64xf32>
    %322 = math.exp %321 : vector<2x64xf32>
    %cst_161 = arith.constant 1.000000e+00 : f32
    %323 = vector.broadcast %cst_161 : f32 to vector<2x64xf32>
    %324 = arith.addf %323, %322 : vector<2x64xf32>
    %cst_162 = arith.constant 1.000000e+00 : f32
    %325 = vector.broadcast %cst_162 : f32 to vector<2x64xf32>
    %326 = arith.divf %325, %324 : vector<2x64xf32>
    %327 = arith.mulf %316, %291 : vector<2x64xf32>
    %328 = arith.mulf %308, %318 : vector<2x64xf32>
    %329 = arith.addf %327, %328 : vector<2x64xf32>
    %330 = math.tanh %329 : vector<2x64xf32>
    %331 = arith.mulf %326, %330 : vector<2x64xf32>
    %c14_163 = arith.constant 14 : index
    %c0_164 = arith.constant 0 : index
    %332 = vector.load %arg20[%c14_163, %c0_164] : memref<16x64xf32, #tpu.memory_space<vmem>>, vector<2x64xf32>
    tpu.vector_store %arg20[%c14_163, %c0_164], %331 {strides = array<i32>} : memref<16x64xf32, #tpu.memory_space<vmem>>, vector<2x64xf32>,
    %c0_165 = arith.constant 0 : index
    %c0_166 = arith.constant 0 : index
    %333 = vector.load %arg21[%c0_165, %c0_166] : memref<16x64xf32, #tpu.memory_space<vmem>>, vector<2x64xf32>
    tpu.vector_store %arg21[%c0_165, %c0_166], %331 {strides = array<i32>} : memref<16x64xf32, #tpu.memory_space<vmem>>, vector<2x64xf32>,
    %c0_167 = arith.constant 0 : index
    %c0_168 = arith.constant 0 : index
    %334 = vector.load %arg20[%c0_167, %c0_168] : memref<16x64xf32, #tpu.memory_space<vmem>>, vector<16x64xf32>
    %335 = vector.extract_strided_slice %334 {offsets = [0, 0], sizes = [16, 32], strides = [1, 1]} : vector<16x64xf32> to vector<16x32xf32>
    %c0_169 = arith.constant 0 : index
    %c0_170 = arith.constant 0 : index
    %336 = vector.load %arg21[%c0_169, %c0_170] : memref<16x64xf32, #tpu.memory_space<vmem>>, vector<16x64xf32>
    %337 = vector.extract_strided_slice %336 {offsets = [0, 32], sizes = [16, 32], strides = [1, 1]} : vector<16x64xf32> to vector<16x32xf32>
    %c0_171 = arith.constant 0 : index
    %c0_172 = arith.constant 0 : index
    %338 = vector.load %arg10[%c0_171, %c0_172] : memref<64x256xf32, #tpu.memory_space<vmem>>, vector<64x256xf32>
    %c0_173 = arith.constant 0 : index
    %c0_174 = arith.constant 0 : index
    %339 = vector.load %arg11[%c0_173, %c0_174] : memref<64x256xf32, #tpu.memory_space<vmem>>, vector<64x256xf32>
    %340 = vector.extract_strided_slice %338 {offsets = [0, 0], sizes = [32, 256], strides = [1, 1]} : vector<64x256xf32> to vector<32x256xf32>
    %cst_175 = arith.constant dense<0.000000e+00> : vector<16x256xf32>
    %341 = tpu.matmul %335, %340, %cst_175 {dimension_numbers = #tpu.dot_dimension_numbers<[1], [0], [0], [1], [0, 0, 1, 1], [], []>} : vector<16x32xf32>, vector<32x256xf32>, vector<16x256xf32> -> vector<16x256xf32>
    %342 = vector.extract_strided_slice %338 {offsets = [32, 0], sizes = [32, 256], strides = [1, 1]} : vector<64x256xf32> to vector<32x256xf32>
    %cst_176 = arith.constant dense<0.000000e+00> : vector<16x256xf32>
    %343 = tpu.matmul %337, %342, %cst_176 {dimension_numbers = #tpu.dot_dimension_numbers<[1], [0], [0], [1], [0, 0, 1, 1], [], []>} : vector<16x32xf32>, vector<32x256xf32>, vector<16x256xf32> -> vector<16x256xf32>
    %344 = arith.addf %341, %343 : vector<16x256xf32>
    %c0_177 = arith.constant 0 : index
    %c0_178 = arith.constant 0 : index
    %345 = vector.load %arg13[%c0_177, %c0_178] : memref<1x256xf32, #tpu.memory_space<vmem>>, vector<1x256xf32>
    %346 = vector.broadcast %345 : vector<1x256xf32> to vector<16x256xf32>
    %347 = arith.addf %344, %346 : vector<16x256xf32>
    %c0_179 = arith.constant 0 : index
    %c0_180 = arith.constant 0 : index
    %348 = vector.load %arg22[%c0_179, %c0_180] : memref<16x256xf32, #tpu.memory_space<vmem>>, vector<16x256xf32>
    tpu.vector_store %arg22[%c0_179, %c0_180], %347 {strides = array<i32>} : memref<16x256xf32, #tpu.memory_space<vmem>>, vector<16x256xf32>,
    %349 = vector.extract_strided_slice %339 {offsets = [0, 0], sizes = [32, 256], strides = [1, 1]} : vector<64x256xf32> to vector<32x256xf32>
    %cst_181 = arith.constant dense<0.000000e+00> : vector<16x256xf32>
    %350 = tpu.matmul %335, %349, %cst_181 {dimension_numbers = #tpu.dot_dimension_numbers<[1], [0], [0], [1], [0, 0, 1, 1], [], []>} : vector<16x32xf32>, vector<32x256xf32>, vector<16x256xf32> -> vector<16x256xf32>
    %351 = vector.extract_strided_slice %339 {offsets = [32, 0], sizes = [32, 256], strides = [1, 1]} : vector<64x256xf32> to vector<32x256xf32>
    %cst_182 = arith.constant dense<0.000000e+00> : vector<16x256xf32>
    %352 = tpu.matmul %337, %351, %cst_182 {dimension_numbers = #tpu.dot_dimension_numbers<[1], [0], [0], [1], [0, 0, 1, 1], [], []>} : vector<16x32xf32>, vector<32x256xf32>, vector<16x256xf32> -> vector<16x256xf32>
    %353 = arith.addf %350, %352 : vector<16x256xf32>
    %c0_183 = arith.constant 0 : index
    %c0_184 = arith.constant 0 : index
    %354 = vector.load %arg14[%c0_183, %c0_184] : memref<1x256xf32, #tpu.memory_space<vmem>>, vector<1x256xf32>
    %355 = vector.broadcast %354 : vector<1x256xf32> to vector<16x256xf32>
    %356 = arith.addf %353, %355 : vector<16x256xf32>
    %c0_185 = arith.constant 0 : index
    %c0_186 = arith.constant 0 : index
    %357 = vector.load %arg23[%c0_185, %c0_186] : memref<16x256xf32, #tpu.memory_space<vmem>>, vector<16x256xf32>
    tpu.vector_store %arg23[%c0_185, %c0_186], %356 {strides = array<i32>} : memref<16x256xf32, #tpu.memory_space<vmem>>, vector<16x256xf32>,
    %c0_187 = arith.constant 0 : index
    %c0_188 = arith.constant 0 : index
    %358 = vector.load %arg12[%c0_187, %c0_188] : memref<64x256xf32, #tpu.memory_space<vmem>>, vector<64x256xf32>
    %cst_189 = arith.constant 0.000000e+00 : f32
    %359 = vector.broadcast %cst_189 : f32 to vector<2x64xf32>
    %cst_190 = arith.constant 0.000000e+00 : f32
    %360 = vector.broadcast %cst_190 : f32 to vector<2x64xf32>
    %c0_191 = arith.constant 0 : index
    %c0_192 = arith.constant 0 : index
    %361 = vector.load %arg22[%c0_191, %c0_192] : memref<16x256xf32, #tpu.memory_space<vmem>>, vector<2x256xf32>
    %c14_193 = arith.constant 14 : index
    %c0_194 = arith.constant 0 : index
    %362 = vector.load %arg23[%c14_193, %c0_194] : memref<16x256xf32, #tpu.memory_space<vmem>>, vector<2x256xf32>
    %363 = arith.addf %361, %362 : vector<2x256xf32>
    %cst_195 = arith.constant dense<0.000000e+00> : vector<2x256xf32>
    %364 = tpu.matmul %359, %358, %cst_195 {dimension_numbers = #tpu.dot_dimension_numbers<[1], [0], [0], [1], [0, 0, 1, 1], [], []>} : vector<2x64xf32>, vector<64x256xf32>, vector<2x256xf32> -> vector<2x256xf32>
    %365 = arith.addf %363, %364 : vector<2x256xf32>
    %366 = vector.extract_strided_slice %365 {offsets = [0, 0], sizes = [2, 64], strides = [1, 1]} : vector<2x256xf32> to vector<2x64xf32>
    %cst_196 = arith.constant 0.000000e+00 : f32
    %367 = vector.broadcast %cst_196 : f32 to vector<2x64xf32>
    %368 = arith.subf %367, %366 : vector<2x64xf32>
    %369 = math.exp %368 : vector<2x64xf32>
    %cst_197 = arith.constant 1.000000e+00 : f32
    %370 = vector.broadcast %cst_197 : f32 to vector<2x64xf32>
    %371 = arith.addf %370, %369 : vector<2x64xf32>
    %cst_198 = arith.constant 1.000000e+00 : f32
    %372 = vector.broadcast %cst_198 : f32 to vector<2x64xf32>
    %373 = arith.divf %372, %371 : vector<2x64xf32>
    %374 = vector.extract_strided_slice %365 {offsets = [0, 64], sizes = [2, 64], strides = [1, 1]} : vector<2x256xf32> to vector<2x64xf32>
    %cst_199 = arith.constant 0.000000e+00 : f32
    %375 = vector.broadcast %cst_199 : f32 to vector<2x64xf32>
    %376 = arith.subf %375, %374 : vector<2x64xf32>
    %377 = math.exp %376 : vector<2x64xf32>
    %cst_200 = arith.constant 1.000000e+00 : f32
    %378 = vector.broadcast %cst_200 : f32 to vector<2x64xf32>
    %379 = arith.addf %378, %377 : vector<2x64xf32>
    %cst_201 = arith.constant 1.000000e+00 : f32
    %380 = vector.broadcast %cst_201 : f32 to vector<2x64xf32>
    %381 = arith.divf %380, %379 : vector<2x64xf32>
    %382 = vector.extract_strided_slice %365 {offsets = [0, 128], sizes = [2, 64], strides = [1, 1]} : vector<2x256xf32> to vector<2x64xf32>
    %383 = math.tanh %382 : vector<2x64xf32>
    %384 = vector.extract_strided_slice %365 {offsets = [0, 192], sizes = [2, 64], strides = [1, 1]} : vector<2x256xf32> to vector<2x64xf32>
    %cst_202 = arith.constant 0.000000e+00 : f32
    %385 = vector.broadcast %cst_202 : f32 to vector<2x64xf32>
    %386 = arith.subf %385, %384 : vector<2x64xf32>
    %387 = math.exp %386 : vector<2x64xf32>
    %cst_203 = arith.constant 1.000000e+00 : f32
    %388 = vector.broadcast %cst_203 : f32 to vector<2x64xf32>
    %389 = arith.addf %388, %387 : vector<2x64xf32>
    %cst_204 = arith.constant 1.000000e+00 : f32
    %390 = vector.broadcast %cst_204 : f32 to vector<2x64xf32>
    %391 = arith.divf %390, %389 : vector<2x64xf32>
    %392 = arith.mulf %381, %360 : vector<2x64xf32>
    %393 = arith.mulf %373, %383 : vector<2x64xf32>
    %394 = arith.addf %392, %393 : vector<2x64xf32>
    %395 = math.tanh %394 : vector<2x64xf32>
    %396 = arith.mulf %391, %395 : vector<2x64xf32>
    %c0_205 = arith.constant 0 : index
    %c0_206 = arith.constant 0 : index
    %397 = vector.load %arg20[%c0_205, %c0_206] : memref<16x64xf32, #tpu.memory_space<vmem>>, vector<2x64xf32>
    tpu.vector_store %arg20[%c0_205, %c0_206], %396 {strides = array<i32>} : memref<16x64xf32, #tpu.memory_space<vmem>>, vector<2x64xf32>,
    %c14_207 = arith.constant 14 : index
    %c0_208 = arith.constant 0 : index
    %398 = vector.load %arg21[%c14_207, %c0_208] : memref<16x64xf32, #tpu.memory_space<vmem>>, vector<2x64xf32>
    tpu.vector_store %arg21[%c14_207, %c0_208], %396 {strides = array<i32>} : memref<16x64xf32, #tpu.memory_space<vmem>>, vector<2x64xf32>,
    %c2_209 = arith.constant 2 : index
    %c0_210 = arith.constant 0 : index
    %399 = vector.load %arg22[%c2_209, %c0_210] : memref<16x256xf32, #tpu.memory_space<vmem>>, vector<2x256xf32>
    %c12_211 = arith.constant 12 : index
    %c0_212 = arith.constant 0 : index
    %400 = vector.load %arg23[%c12_211, %c0_212] : memref<16x256xf32, #tpu.memory_space<vmem>>, vector<2x256xf32>
    %401 = arith.addf %399, %400 : vector<2x256xf32>
    %cst_213 = arith.constant dense<0.000000e+00> : vector<2x256xf32>
    %402 = tpu.matmul %396, %358, %cst_213 {dimension_numbers = #tpu.dot_dimension_numbers<[1], [0], [0], [1], [0, 0, 1, 1], [], []>} : vector<2x64xf32>, vector<64x256xf32>, vector<2x256xf32> -> vector<2x256xf32>
    %403 = arith.addf %401, %402 : vector<2x256xf32>
    %404 = vector.extract_strided_slice %403 {offsets = [0, 0], sizes = [2, 64], strides = [1, 1]} : vector<2x256xf32> to vector<2x64xf32>
    %cst_214 = arith.constant 0.000000e+00 : f32
    %405 = vector.broadcast %cst_214 : f32 to vector<2x64xf32>
    %406 = arith.subf %405, %404 : vector<2x64xf32>
    %407 = math.exp %406 : vector<2x64xf32>
    %cst_215 = arith.constant 1.000000e+00 : f32
    %408 = vector.broadcast %cst_215 : f32 to vector<2x64xf32>
    %409 = arith.addf %408, %407 : vector<2x64xf32>
    %cst_216 = arith.constant 1.000000e+00 : f32
    %410 = vector.broadcast %cst_216 : f32 to vector<2x64xf32>
    %411 = arith.divf %410, %409 : vector<2x64xf32>
    %412 = vector.extract_strided_slice %403 {offsets = [0, 64], sizes = [2, 64], strides = [1, 1]} : vector<2x256xf32> to vector<2x64xf32>
    %cst_217 = arith.constant 0.000000e+00 : f32
    %413 = vector.broadcast %cst_217 : f32 to vector<2x64xf32>
    %414 = arith.subf %413, %412 : vector<2x64xf32>
    %415 = math.exp %414 : vector<2x64xf32>
    %cst_218 = arith.constant 1.000000e+00 : f32
    %416 = vector.broadcast %cst_218 : f32 to vector<2x64xf32>
    %417 = arith.addf %416, %415 : vector<2x64xf32>
    %cst_219 = arith.constant 1.000000e+00 : f32
    %418 = vector.broadcast %cst_219 : f32 to vector<2x64xf32>
    %419 = arith.divf %418, %417 : vector<2x64xf32>
    %420 = vector.extract_strided_slice %403 {offsets = [0, 128], sizes = [2, 64], strides = [1, 1]} : vector<2x256xf32> to vector<2x64xf32>
    %421 = math.tanh %420 : vector<2x64xf32>
    %422 = vector.extract_strided_slice %403 {offsets = [0, 192], sizes = [2, 64], strides = [1, 1]} : vector<2x256xf32> to vector<2x64xf32>
    %cst_220 = arith.constant 0.000000e+00 : f32
    %423 = vector.broadcast %cst_220 : f32 to vector<2x64xf32>
    %424 = arith.subf %423, %422 : vector<2x64xf32>
    %425 = math.exp %424 : vector<2x64xf32>
    %cst_221 = arith.constant 1.000000e+00 : f32
    %426 = vector.broadcast %cst_221 : f32 to vector<2x64xf32>
    %427 = arith.addf %426, %425 : vector<2x64xf32>
    %cst_222 = arith.constant 1.000000e+00 : f32
    %428 = vector.broadcast %cst_222 : f32 to vector<2x64xf32>
    %429 = arith.divf %428, %427 : vector<2x64xf32>
    %430 = arith.mulf %419, %394 : vector<2x64xf32>
    %431 = arith.mulf %411, %421 : vector<2x64xf32>
    %432 = arith.addf %430, %431 : vector<2x64xf32>
    %433 = math.tanh %432 : vector<2x64xf32>
    %434 = arith.mulf %429, %433 : vector<2x64xf32>
    %c2_223 = arith.constant 2 : index
    %c0_224 = arith.constant 0 : index
    %435 = vector.load %arg20[%c2_223, %c0_224] : memref<16x64xf32, #tpu.memory_space<vmem>>, vector<2x64xf32>
    tpu.vector_store %arg20[%c2_223, %c0_224], %434 {strides = array<i32>} : memref<16x64xf32, #tpu.memory_space<vmem>>, vector<2x64xf32>,
    %c12_225 = arith.constant 12 : index
    %c0_226 = arith.constant 0 : index
    %436 = vector.load %arg21[%c12_225, %c0_226] : memref<16x64xf32, #tpu.memory_space<vmem>>, vector<2x64xf32>
    tpu.vector_store %arg21[%c12_225, %c0_226], %434 {strides = array<i32>} : memref<16x64xf32, #tpu.memory_space<vmem>>, vector<2x64xf32>,
    %c4_227 = arith.constant 4 : index
    %c0_228 = arith.constant 0 : index
    %437 = vector.load %arg22[%c4_227, %c0_228] : memref<16x256xf32, #tpu.memory_space<vmem>>, vector<2x256xf32>
    %c10_229 = arith.constant 10 : index
    %c0_230 = arith.constant 0 : index
    %438 = vector.load %arg23[%c10_229, %c0_230] : memref<16x256xf32, #tpu.memory_space<vmem>>, vector<2x256xf32>
    %439 = arith.addf %437, %438 : vector<2x256xf32>
    %cst_231 = arith.constant dense<0.000000e+00> : vector<2x256xf32>
    %440 = tpu.matmul %434, %358, %cst_231 {dimension_numbers = #tpu.dot_dimension_numbers<[1], [0], [0], [1], [0, 0, 1, 1], [], []>} : vector<2x64xf32>, vector<64x256xf32>, vector<2x256xf32> -> vector<2x256xf32>
    %441 = arith.addf %439, %440 : vector<2x256xf32>
    %442 = vector.extract_strided_slice %441 {offsets = [0, 0], sizes = [2, 64], strides = [1, 1]} : vector<2x256xf32> to vector<2x64xf32>
    %cst_232 = arith.constant 0.000000e+00 : f32
    %443 = vector.broadcast %cst_232 : f32 to vector<2x64xf32>
    %444 = arith.subf %443, %442 : vector<2x64xf32>
    %445 = math.exp %444 : vector<2x64xf32>
    %cst_233 = arith.constant 1.000000e+00 : f32
    %446 = vector.broadcast %cst_233 : f32 to vector<2x64xf32>
    %447 = arith.addf %446, %445 : vector<2x64xf32>
    %cst_234 = arith.constant 1.000000e+00 : f32
    %448 = vector.broadcast %cst_234 : f32 to vector<2x64xf32>
    %449 = arith.divf %448, %447 : vector<2x64xf32>
    %450 = vector.extract_strided_slice %441 {offsets = [0, 64], sizes = [2, 64], strides = [1, 1]} : vector<2x256xf32> to vector<2x64xf32>
    %cst_235 = arith.constant 0.000000e+00 : f32
    %451 = vector.broadcast %cst_235 : f32 to vector<2x64xf32>
    %452 = arith.subf %451, %450 : vector<2x64xf32>
    %453 = math.exp %452 : vector<2x64xf32>
    %cst_236 = arith.constant 1.000000e+00 : f32
    %454 = vector.broadcast %cst_236 : f32 to vector<2x64xf32>
    %455 = arith.addf %454, %453 : vector<2x64xf32>
    %cst_237 = arith.constant 1.000000e+00 : f32
    %456 = vector.broadcast %cst_237 : f32 to vector<2x64xf32>
    %457 = arith.divf %456, %455 : vector<2x64xf32>
    %458 = vector.extract_strided_slice %441 {offsets = [0, 128], sizes = [2, 64], strides = [1, 1]} : vector<2x256xf32> to vector<2x64xf32>
    %459 = math.tanh %458 : vector<2x64xf32>
    %460 = vector.extract_strided_slice %441 {offsets = [0, 192], sizes = [2, 64], strides = [1, 1]} : vector<2x256xf32> to vector<2x64xf32>
    %cst_238 = arith.constant 0.000000e+00 : f32
    %461 = vector.broadcast %cst_238 : f32 to vector<2x64xf32>
    %462 = arith.subf %461, %460 : vector<2x64xf32>
    %463 = math.exp %462 : vector<2x64xf32>
    %cst_239 = arith.constant 1.000000e+00 : f32
    %464 = vector.broadcast %cst_239 : f32 to vector<2x64xf32>
    %465 = arith.addf %464, %463 : vector<2x64xf32>
    %cst_240 = arith.constant 1.000000e+00 : f32
    %466 = vector.broadcast %cst_240 : f32 to vector<2x64xf32>
    %467 = arith.divf %466, %465 : vector<2x64xf32>
    %468 = arith.mulf %457, %432 : vector<2x64xf32>
    %469 = arith.mulf %449, %459 : vector<2x64xf32>
    %470 = arith.addf %468, %469 : vector<2x64xf32>
    %471 = math.tanh %470 : vector<2x64xf32>
    %472 = arith.mulf %467, %471 : vector<2x64xf32>
    %c4_241 = arith.constant 4 : index
    %c0_242 = arith.constant 0 : index
    %473 = vector.load %arg20[%c4_241, %c0_242] : memref<16x64xf32, #tpu.memory_space<vmem>>, vector<2x64xf32>
    tpu.vector_store %arg20[%c4_241, %c0_242], %472 {strides = array<i32>} : memref<16x64xf32, #tpu.memory_space<vmem>>, vector<2x64xf32>,
    %c10_243 = arith.constant 10 : index
    %c0_244 = arith.constant 0 : index
    %474 = vector.load %arg21[%c10_243, %c0_244] : memref<16x64xf32, #tpu.memory_space<vmem>>, vector<2x64xf32>
    tpu.vector_store %arg21[%c10_243, %c0_244], %472 {strides = array<i32>} : memref<16x64xf32, #tpu.memory_space<vmem>>, vector<2x64xf32>,
    %c6_245 = arith.constant 6 : index
    %c0_246 = arith.constant 0 : index
    %475 = vector.load %arg22[%c6_245, %c0_246] : memref<16x256xf32, #tpu.memory_space<vmem>>, vector<2x256xf32>
    %c8_247 = arith.constant 8 : index
    %c0_248 = arith.constant 0 : index
    %476 = vector.load %arg23[%c8_247, %c0_248] : memref<16x256xf32, #tpu.memory_space<vmem>>, vector<2x256xf32>
    %477 = arith.addf %475, %476 : vector<2x256xf32>
    %cst_249 = arith.constant dense<0.000000e+00> : vector<2x256xf32>
    %478 = tpu.matmul %472, %358, %cst_249 {dimension_numbers = #tpu.dot_dimension_numbers<[1], [0], [0], [1], [0, 0, 1, 1], [], []>} : vector<2x64xf32>, vector<64x256xf32>, vector<2x256xf32> -> vector<2x256xf32>
    %479 = arith.addf %477, %478 : vector<2x256xf32>
    %480 = vector.extract_strided_slice %479 {offsets = [0, 0], sizes = [2, 64], strides = [1, 1]} : vector<2x256xf32> to vector<2x64xf32>
    %cst_250 = arith.constant 0.000000e+00 : f32
    %481 = vector.broadcast %cst_250 : f32 to vector<2x64xf32>
    %482 = arith.subf %481, %480 : vector<2x64xf32>
    %483 = math.exp %482 : vector<2x64xf32>
    %cst_251 = arith.constant 1.000000e+00 : f32
    %484 = vector.broadcast %cst_251 : f32 to vector<2x64xf32>
    %485 = arith.addf %484, %483 : vector<2x64xf32>
    %cst_252 = arith.constant 1.000000e+00 : f32
    %486 = vector.broadcast %cst_252 : f32 to vector<2x64xf32>
    %487 = arith.divf %486, %485 : vector<2x64xf32>
    %488 = vector.extract_strided_slice %479 {offsets = [0, 64], sizes = [2, 64], strides = [1, 1]} : vector<2x256xf32> to vector<2x64xf32>
    %cst_253 = arith.constant 0.000000e+00 : f32
    %489 = vector.broadcast %cst_253 : f32 to vector<2x64xf32>
    %490 = arith.subf %489, %488 : vector<2x64xf32>
    %491 = math.exp %490 : vector<2x64xf32>
    %cst_254 = arith.constant 1.000000e+00 : f32
    %492 = vector.broadcast %cst_254 : f32 to vector<2x64xf32>
    %493 = arith.addf %492, %491 : vector<2x64xf32>
    %cst_255 = arith.constant 1.000000e+00 : f32
    %494 = vector.broadcast %cst_255 : f32 to vector<2x64xf32>
    %495 = arith.divf %494, %493 : vector<2x64xf32>
    %496 = vector.extract_strided_slice %479 {offsets = [0, 128], sizes = [2, 64], strides = [1, 1]} : vector<2x256xf32> to vector<2x64xf32>
    %497 = math.tanh %496 : vector<2x64xf32>
    %498 = vector.extract_strided_slice %479 {offsets = [0, 192], sizes = [2, 64], strides = [1, 1]} : vector<2x256xf32> to vector<2x64xf32>
    %cst_256 = arith.constant 0.000000e+00 : f32
    %499 = vector.broadcast %cst_256 : f32 to vector<2x64xf32>
    %500 = arith.subf %499, %498 : vector<2x64xf32>
    %501 = math.exp %500 : vector<2x64xf32>
    %cst_257 = arith.constant 1.000000e+00 : f32
    %502 = vector.broadcast %cst_257 : f32 to vector<2x64xf32>
    %503 = arith.addf %502, %501 : vector<2x64xf32>
    %cst_258 = arith.constant 1.000000e+00 : f32
    %504 = vector.broadcast %cst_258 : f32 to vector<2x64xf32>
    %505 = arith.divf %504, %503 : vector<2x64xf32>
    %506 = arith.mulf %495, %470 : vector<2x64xf32>
    %507 = arith.mulf %487, %497 : vector<2x64xf32>
    %508 = arith.addf %506, %507 : vector<2x64xf32>
    %509 = math.tanh %508 : vector<2x64xf32>
    %510 = arith.mulf %505, %509 : vector<2x64xf32>
    %c6_259 = arith.constant 6 : index
    %c0_260 = arith.constant 0 : index
    %511 = vector.load %arg20[%c6_259, %c0_260] : memref<16x64xf32, #tpu.memory_space<vmem>>, vector<2x64xf32>
    tpu.vector_store %arg20[%c6_259, %c0_260], %510 {strides = array<i32>} : memref<16x64xf32, #tpu.memory_space<vmem>>, vector<2x64xf32>,
    %c8_261 = arith.constant 8 : index
    %c0_262 = arith.constant 0 : index
    %512 = vector.load %arg21[%c8_261, %c0_262] : memref<16x64xf32, #tpu.memory_space<vmem>>, vector<2x64xf32>
    tpu.vector_store %arg21[%c8_261, %c0_262], %510 {strides = array<i32>} : memref<16x64xf32, #tpu.memory_space<vmem>>, vector<2x64xf32>,
    %c8_263 = arith.constant 8 : index
    %c0_264 = arith.constant 0 : index
    %513 = vector.load %arg22[%c8_263, %c0_264] : memref<16x256xf32, #tpu.memory_space<vmem>>, vector<2x256xf32>
    %c6_265 = arith.constant 6 : index
    %c0_266 = arith.constant 0 : index
    %514 = vector.load %arg23[%c6_265, %c0_266] : memref<16x256xf32, #tpu.memory_space<vmem>>, vector<2x256xf32>
    %515 = arith.addf %513, %514 : vector<2x256xf32>
    %cst_267 = arith.constant dense<0.000000e+00> : vector<2x256xf32>
    %516 = tpu.matmul %510, %358, %cst_267 {dimension_numbers = #tpu.dot_dimension_numbers<[1], [0], [0], [1], [0, 0, 1, 1], [], []>} : vector<2x64xf32>, vector<64x256xf32>, vector<2x256xf32> -> vector<2x256xf32>
    %517 = arith.addf %515, %516 : vector<2x256xf32>
    %518 = vector.extract_strided_slice %517 {offsets = [0, 0], sizes = [2, 64], strides = [1, 1]} : vector<2x256xf32> to vector<2x64xf32>
    %cst_268 = arith.constant 0.000000e+00 : f32
    %519 = vector.broadcast %cst_268 : f32 to vector<2x64xf32>
    %520 = arith.subf %519, %518 : vector<2x64xf32>
    %521 = math.exp %520 : vector<2x64xf32>
    %cst_269 = arith.constant 1.000000e+00 : f32
    %522 = vector.broadcast %cst_269 : f32 to vector<2x64xf32>
    %523 = arith.addf %522, %521 : vector<2x64xf32>
    %cst_270 = arith.constant 1.000000e+00 : f32
    %524 = vector.broadcast %cst_270 : f32 to vector<2x64xf32>
    %525 = arith.divf %524, %523 : vector<2x64xf32>
    %526 = vector.extract_strided_slice %517 {offsets = [0, 64], sizes = [2, 64], strides = [1, 1]} : vector<2x256xf32> to vector<2x64xf32>
    %cst_271 = arith.constant 0.000000e+00 : f32
    %527 = vector.broadcast %cst_271 : f32 to vector<2x64xf32>
    %528 = arith.subf %527, %526 : vector<2x64xf32>
    %529 = math.exp %528 : vector<2x64xf32>
    %cst_272 = arith.constant 1.000000e+00 : f32
    %530 = vector.broadcast %cst_272 : f32 to vector<2x64xf32>
    %531 = arith.addf %530, %529 : vector<2x64xf32>
    %cst_273 = arith.constant 1.000000e+00 : f32
    %532 = vector.broadcast %cst_273 : f32 to vector<2x64xf32>
    %533 = arith.divf %532, %531 : vector<2x64xf32>
    %534 = vector.extract_strided_slice %517 {offsets = [0, 128], sizes = [2, 64], strides = [1, 1]} : vector<2x256xf32> to vector<2x64xf32>
    %535 = math.tanh %534 : vector<2x64xf32>
    %536 = vector.extract_strided_slice %517 {offsets = [0, 192], sizes = [2, 64], strides = [1, 1]} : vector<2x256xf32> to vector<2x64xf32>
    %cst_274 = arith.constant 0.000000e+00 : f32
    %537 = vector.broadcast %cst_274 : f32 to vector<2x64xf32>
    %538 = arith.subf %537, %536 : vector<2x64xf32>
    %539 = math.exp %538 : vector<2x64xf32>
    %cst_275 = arith.constant 1.000000e+00 : f32
    %540 = vector.broadcast %cst_275 : f32 to vector<2x64xf32>
    %541 = arith.addf %540, %539 : vector<2x64xf32>
    %cst_276 = arith.constant 1.000000e+00 : f32
    %542 = vector.broadcast %cst_276 : f32 to vector<2x64xf32>
    %543 = arith.divf %542, %541 : vector<2x64xf32>
    %544 = arith.mulf %533, %508 : vector<2x64xf32>
    %545 = arith.mulf %525, %535 : vector<2x64xf32>
    %546 = arith.addf %544, %545 : vector<2x64xf32>
    %547 = math.tanh %546 : vector<2x64xf32>
    %548 = arith.mulf %543, %547 : vector<2x64xf32>
    %c8_277 = arith.constant 8 : index
    %c0_278 = arith.constant 0 : index
    %549 = vector.load %arg20[%c8_277, %c0_278] : memref<16x64xf32, #tpu.memory_space<vmem>>, vector<2x64xf32>
    tpu.vector_store %arg20[%c8_277, %c0_278], %548 {strides = array<i32>} : memref<16x64xf32, #tpu.memory_space<vmem>>, vector<2x64xf32>,
    %c6_279 = arith.constant 6 : index
    %c0_280 = arith.constant 0 : index
    %550 = vector.load %arg21[%c6_279, %c0_280] : memref<16x64xf32, #tpu.memory_space<vmem>>, vector<2x64xf32>
    tpu.vector_store %arg21[%c6_279, %c0_280], %548 {strides = array<i32>} : memref<16x64xf32, #tpu.memory_space<vmem>>, vector<2x64xf32>,
    %c10_281 = arith.constant 10 : index
    %c0_282 = arith.constant 0 : index
    %551 = vector.load %arg22[%c10_281, %c0_282] : memref<16x256xf32, #tpu.memory_space<vmem>>, vector<2x256xf32>
    %c4_283 = arith.constant 4 : index
    %c0_284 = arith.constant 0 : index
    %552 = vector.load %arg23[%c4_283, %c0_284] : memref<16x256xf32, #tpu.memory_space<vmem>>, vector<2x256xf32>
    %553 = arith.addf %551, %552 : vector<2x256xf32>
    %cst_285 = arith.constant dense<0.000000e+00> : vector<2x256xf32>
    %554 = tpu.matmul %548, %358, %cst_285 {dimension_numbers = #tpu.dot_dimension_numbers<[1], [0], [0], [1], [0, 0, 1, 1], [], []>} : vector<2x64xf32>, vector<64x256xf32>, vector<2x256xf32> -> vector<2x256xf32>
    %555 = arith.addf %553, %554 : vector<2x256xf32>
    %556 = vector.extract_strided_slice %555 {offsets = [0, 0], sizes = [2, 64], strides = [1, 1]} : vector<2x256xf32> to vector<2x64xf32>
    %cst_286 = arith.constant 0.000000e+00 : f32
    %557 = vector.broadcast %cst_286 : f32 to vector<2x64xf32>
    %558 = arith.subf %557, %556 : vector<2x64xf32>
    %559 = math.exp %558 : vector<2x64xf32>
    %cst_287 = arith.constant 1.000000e+00 : f32
    %560 = vector.broadcast %cst_287 : f32 to vector<2x64xf32>
    %561 = arith.addf %560, %559 : vector<2x64xf32>
    %cst_288 = arith.constant 1.000000e+00 : f32
    %562 = vector.broadcast %cst_288 : f32 to vector<2x64xf32>
    %563 = arith.divf %562, %561 : vector<2x64xf32>
    %564 = vector.extract_strided_slice %555 {offsets = [0, 64], sizes = [2, 64], strides = [1, 1]} : vector<2x256xf32> to vector<2x64xf32>
    %cst_289 = arith.constant 0.000000e+00 : f32
    %565 = vector.broadcast %cst_289 : f32 to vector<2x64xf32>
    %566 = arith.subf %565, %564 : vector<2x64xf32>
    %567 = math.exp %566 : vector<2x64xf32>
    %cst_290 = arith.constant 1.000000e+00 : f32
    %568 = vector.broadcast %cst_290 : f32 to vector<2x64xf32>
    %569 = arith.addf %568, %567 : vector<2x64xf32>
    %cst_291 = arith.constant 1.000000e+00 : f32
    %570 = vector.broadcast %cst_291 : f32 to vector<2x64xf32>
    %571 = arith.divf %570, %569 : vector<2x64xf32>
    %572 = vector.extract_strided_slice %555 {offsets = [0, 128], sizes = [2, 64], strides = [1, 1]} : vector<2x256xf32> to vector<2x64xf32>
    %573 = math.tanh %572 : vector<2x64xf32>
    %574 = vector.extract_strided_slice %555 {offsets = [0, 192], sizes = [2, 64], strides = [1, 1]} : vector<2x256xf32> to vector<2x64xf32>
    %cst_292 = arith.constant 0.000000e+00 : f32
    %575 = vector.broadcast %cst_292 : f32 to vector<2x64xf32>
    %576 = arith.subf %575, %574 : vector<2x64xf32>
    %577 = math.exp %576 : vector<2x64xf32>
    %cst_293 = arith.constant 1.000000e+00 : f32
    %578 = vector.broadcast %cst_293 : f32 to vector<2x64xf32>
    %579 = arith.addf %578, %577 : vector<2x64xf32>
    %cst_294 = arith.constant 1.000000e+00 : f32
    %580 = vector.broadcast %cst_294 : f32 to vector<2x64xf32>
    %581 = arith.divf %580, %579 : vector<2x64xf32>
    %582 = arith.mulf %571, %546 : vector<2x64xf32>
    %583 = arith.mulf %563, %573 : vector<2x64xf32>
    %584 = arith.addf %582, %583 : vector<2x64xf32>
    %585 = math.tanh %584 : vector<2x64xf32>
    %586 = arith.mulf %581, %585 : vector<2x64xf32>
    %c10_295 = arith.constant 10 : index
    %c0_296 = arith.constant 0 : index
    %587 = vector.load %arg20[%c10_295, %c0_296] : memref<16x64xf32, #tpu.memory_space<vmem>>, vector<2x64xf32>
    tpu.vector_store %arg20[%c10_295, %c0_296], %586 {strides = array<i32>} : memref<16x64xf32, #tpu.memory_space<vmem>>, vector<2x64xf32>,
    %c4_297 = arith.constant 4 : index
    %c0_298 = arith.constant 0 : index
    %588 = vector.load %arg21[%c4_297, %c0_298] : memref<16x64xf32, #tpu.memory_space<vmem>>, vector<2x64xf32>
    tpu.vector_store %arg21[%c4_297, %c0_298], %586 {strides = array<i32>} : memref<16x64xf32, #tpu.memory_space<vmem>>, vector<2x64xf32>,
    %c12_299 = arith.constant 12 : index
    %c0_300 = arith.constant 0 : index
    %589 = vector.load %arg22[%c12_299, %c0_300] : memref<16x256xf32, #tpu.memory_space<vmem>>, vector<2x256xf32>
    %c2_301 = arith.constant 2 : index
    %c0_302 = arith.constant 0 : index
    %590 = vector.load %arg23[%c2_301, %c0_302] : memref<16x256xf32, #tpu.memory_space<vmem>>, vector<2x256xf32>
    %591 = arith.addf %589, %590 : vector<2x256xf32>
    %cst_303 = arith.constant dense<0.000000e+00> : vector<2x256xf32>
    %592 = tpu.matmul %586, %358, %cst_303 {dimension_numbers = #tpu.dot_dimension_numbers<[1], [0], [0], [1], [0, 0, 1, 1], [], []>} : vector<2x64xf32>, vector<64x256xf32>, vector<2x256xf32> -> vector<2x256xf32>
    %593 = arith.addf %591, %592 : vector<2x256xf32>
    %594 = vector.extract_strided_slice %593 {offsets = [0, 0], sizes = [2, 64], strides = [1, 1]} : vector<2x256xf32> to vector<2x64xf32>
    %cst_304 = arith.constant 0.000000e+00 : f32
    %595 = vector.broadcast %cst_304 : f32 to vector<2x64xf32>
    %596 = arith.subf %595, %594 : vector<2x64xf32>
    %597 = math.exp %596 : vector<2x64xf32>
    %cst_305 = arith.constant 1.000000e+00 : f32
    %598 = vector.broadcast %cst_305 : f32 to vector<2x64xf32>
    %599 = arith.addf %598, %597 : vector<2x64xf32>
    %cst_306 = arith.constant 1.000000e+00 : f32
    %600 = vector.broadcast %cst_306 : f32 to vector<2x64xf32>
    %601 = arith.divf %600, %599 : vector<2x64xf32>
    %602 = vector.extract_strided_slice %593 {offsets = [0, 64], sizes = [2, 64], strides = [1, 1]} : vector<2x256xf32> to vector<2x64xf32>
    %cst_307 = arith.constant 0.000000e+00 : f32
    %603 = vector.broadcast %cst_307 : f32 to vector<2x64xf32>
    %604 = arith.subf %603, %602 : vector<2x64xf32>
    %605 = math.exp %604 : vector<2x64xf32>
    %cst_308 = arith.constant 1.000000e+00 : f32
    %606 = vector.broadcast %cst_308 : f32 to vector<2x64xf32>
    %607 = arith.addf %606, %605 : vector<2x64xf32>
    %cst_309 = arith.constant 1.000000e+00 : f32
    %608 = vector.broadcast %cst_309 : f32 to vector<2x64xf32>
    %609 = arith.divf %608, %607 : vector<2x64xf32>
    %610 = vector.extract_strided_slice %593 {offsets = [0, 128], sizes = [2, 64], strides = [1, 1]} : vector<2x256xf32> to vector<2x64xf32>
    %611 = math.tanh %610 : vector<2x64xf32>
    %612 = vector.extract_strided_slice %593 {offsets = [0, 192], sizes = [2, 64], strides = [1, 1]} : vector<2x256xf32> to vector<2x64xf32>
    %cst_310 = arith.constant 0.000000e+00 : f32
    %613 = vector.broadcast %cst_310 : f32 to vector<2x64xf32>
    %614 = arith.subf %613, %612 : vector<2x64xf32>
    %615 = math.exp %614 : vector<2x64xf32>
    %cst_311 = arith.constant 1.000000e+00 : f32
    %616 = vector.broadcast %cst_311 : f32 to vector<2x64xf32>
    %617 = arith.addf %616, %615 : vector<2x64xf32>
    %cst_312 = arith.constant 1.000000e+00 : f32
    %618 = vector.broadcast %cst_312 : f32 to vector<2x64xf32>
    %619 = arith.divf %618, %617 : vector<2x64xf32>
    %620 = arith.mulf %609, %584 : vector<2x64xf32>
    %621 = arith.mulf %601, %611 : vector<2x64xf32>
    %622 = arith.addf %620, %621 : vector<2x64xf32>
    %623 = math.tanh %622 : vector<2x64xf32>
    %624 = arith.mulf %619, %623 : vector<2x64xf32>
    %c12_313 = arith.constant 12 : index
    %c0_314 = arith.constant 0 : index
    %625 = vector.load %arg20[%c12_313, %c0_314] : memref<16x64xf32, #tpu.memory_space<vmem>>, vector<2x64xf32>
    tpu.vector_store %arg20[%c12_313, %c0_314], %624 {strides = array<i32>} : memref<16x64xf32, #tpu.memory_space<vmem>>, vector<2x64xf32>,
    %c2_315 = arith.constant 2 : index
    %c0_316 = arith.constant 0 : index
    %626 = vector.load %arg21[%c2_315, %c0_316] : memref<16x64xf32, #tpu.memory_space<vmem>>, vector<2x64xf32>
    tpu.vector_store %arg21[%c2_315, %c0_316], %624 {strides = array<i32>} : memref<16x64xf32, #tpu.memory_space<vmem>>, vector<2x64xf32>,
    %c14_317 = arith.constant 14 : index
    %c0_318 = arith.constant 0 : index
    %627 = vector.load %arg22[%c14_317, %c0_318] : memref<16x256xf32, #tpu.memory_space<vmem>>, vector<2x256xf32>
    %c0_319 = arith.constant 0 : index
    %c0_320 = arith.constant 0 : index
    %628 = vector.load %arg23[%c0_319, %c0_320] : memref<16x256xf32, #tpu.memory_space<vmem>>, vector<2x256xf32>
    %629 = arith.addf %627, %628 : vector<2x256xf32>
    %cst_321 = arith.constant dense<0.000000e+00> : vector<2x256xf32>
    %630 = tpu.matmul %624, %358, %cst_321 {dimension_numbers = #tpu.dot_dimension_numbers<[1], [0], [0], [1], [0, 0, 1, 1], [], []>} : vector<2x64xf32>, vector<64x256xf32>, vector<2x256xf32> -> vector<2x256xf32>
    %631 = arith.addf %629, %630 : vector<2x256xf32>
    %632 = vector.extract_strided_slice %631 {offsets = [0, 0], sizes = [2, 64], strides = [1, 1]} : vector<2x256xf32> to vector<2x64xf32>
    %cst_322 = arith.constant 0.000000e+00 : f32
    %633 = vector.broadcast %cst_322 : f32 to vector<2x64xf32>
    %634 = arith.subf %633, %632 : vector<2x64xf32>
    %635 = math.exp %634 : vector<2x64xf32>
    %cst_323 = arith.constant 1.000000e+00 : f32
    %636 = vector.broadcast %cst_323 : f32 to vector<2x64xf32>
    %637 = arith.addf %636, %635 : vector<2x64xf32>
    %cst_324 = arith.constant 1.000000e+00 : f32
    %638 = vector.broadcast %cst_324 : f32 to vector<2x64xf32>
    %639 = arith.divf %638, %637 : vector<2x64xf32>
    %640 = vector.extract_strided_slice %631 {offsets = [0, 64], sizes = [2, 64], strides = [1, 1]} : vector<2x256xf32> to vector<2x64xf32>
    %cst_325 = arith.constant 0.000000e+00 : f32
    %641 = vector.broadcast %cst_325 : f32 to vector<2x64xf32>
    %642 = arith.subf %641, %640 : vector<2x64xf32>
    %643 = math.exp %642 : vector<2x64xf32>
    %cst_326 = arith.constant 1.000000e+00 : f32
    %644 = vector.broadcast %cst_326 : f32 to vector<2x64xf32>
    %645 = arith.addf %644, %643 : vector<2x64xf32>
    %cst_327 = arith.constant 1.000000e+00 : f32
    %646 = vector.broadcast %cst_327 : f32 to vector<2x64xf32>
    %647 = arith.divf %646, %645 : vector<2x64xf32>
    %648 = vector.extract_strided_slice %631 {offsets = [0, 128], sizes = [2, 64], strides = [1, 1]} : vector<2x256xf32> to vector<2x64xf32>
    %649 = math.tanh %648 : vector<2x64xf32>
    %650 = vector.extract_strided_slice %631 {offsets = [0, 192], sizes = [2, 64], strides = [1, 1]} : vector<2x256xf32> to vector<2x64xf32>
    %cst_328 = arith.constant 0.000000e+00 : f32
    %651 = vector.broadcast %cst_328 : f32 to vector<2x64xf32>
    %652 = arith.subf %651, %650 : vector<2x64xf32>
    %653 = math.exp %652 : vector<2x64xf32>
    %cst_329 = arith.constant 1.000000e+00 : f32
    %654 = vector.broadcast %cst_329 : f32 to vector<2x64xf32>
    %655 = arith.addf %654, %653 : vector<2x64xf32>
    %cst_330 = arith.constant 1.000000e+00 : f32
    %656 = vector.broadcast %cst_330 : f32 to vector<2x64xf32>
    %657 = arith.divf %656, %655 : vector<2x64xf32>
    %658 = arith.mulf %647, %622 : vector<2x64xf32>
    %659 = arith.mulf %639, %649 : vector<2x64xf32>
    %660 = arith.addf %658, %659 : vector<2x64xf32>
    %661 = math.tanh %660 : vector<2x64xf32>
    %662 = arith.mulf %657, %661 : vector<2x64xf32>
    %c14_331 = arith.constant 14 : index
    %c0_332 = arith.constant 0 : index
    %663 = vector.load %arg20[%c14_331, %c0_332] : memref<16x64xf32, #tpu.memory_space<vmem>>, vector<2x64xf32>
    tpu.vector_store %arg20[%c14_331, %c0_332], %662 {strides = array<i32>} : memref<16x64xf32, #tpu.memory_space<vmem>>, vector<2x64xf32>,
    %c0_333 = arith.constant 0 : index
    %c0_334 = arith.constant 0 : index
    %664 = vector.load %arg21[%c0_333, %c0_334] : memref<16x64xf32, #tpu.memory_space<vmem>>, vector<2x64xf32>
    tpu.vector_store %arg21[%c0_333, %c0_334], %662 {strides = array<i32>} : memref<16x64xf32, #tpu.memory_space<vmem>>, vector<2x64xf32>,
    %c0_335 = arith.constant 0 : index
    %c0_336 = arith.constant 0 : index
    %665 = vector.load %arg20[%c0_335, %c0_336] : memref<16x64xf32, #tpu.memory_space<vmem>>, vector<16x64xf32>
    %666 = vector.extract_strided_slice %665 {offsets = [0, 0], sizes = [16, 32], strides = [1, 1]} : vector<16x64xf32> to vector<16x32xf32>
    %c0_337 = arith.constant 0 : index
    %c0_338 = arith.constant 0 : index
    %667 = vector.load %arg21[%c0_337, %c0_338] : memref<16x64xf32, #tpu.memory_space<vmem>>, vector<16x64xf32>
    %668 = vector.extract_strided_slice %667 {offsets = [0, 32], sizes = [16, 32], strides = [1, 1]} : vector<16x64xf32> to vector<16x32xf32>
    %c0_339 = arith.constant 0 : index
    %c0_340 = arith.constant 0 : index
    %669 = vector.load %arg15[%c0_339, %c0_340] : memref<64x32xf32, #tpu.memory_space<vmem>>, vector<64x32xf32>
    %670 = vector.extract_strided_slice %669 {offsets = [0, 0], sizes = [32, 32], strides = [1, 1]} : vector<64x32xf32> to vector<32x32xf32>
    %cst_341 = arith.constant dense<0.000000e+00> : vector<16x32xf32>
    %671 = tpu.matmul %666, %670, %cst_341 {dimension_numbers = #tpu.dot_dimension_numbers<[1], [0], [0], [1], [0, 0, 1, 1], [], []>} : vector<16x32xf32>, vector<32x32xf32>, vector<16x32xf32> -> vector<16x32xf32>
    %672 = vector.extract_strided_slice %669 {offsets = [32, 0], sizes = [32, 32], strides = [1, 1]} : vector<64x32xf32> to vector<32x32xf32>
    %cst_342 = arith.constant dense<0.000000e+00> : vector<16x32xf32>
    %673 = tpu.matmul %668, %672, %cst_342 {dimension_numbers = #tpu.dot_dimension_numbers<[1], [0], [0], [1], [0, 0, 1, 1], [], []>} : vector<16x32xf32>, vector<32x32xf32>, vector<16x32xf32> -> vector<16x32xf32>
    %674 = arith.addf %671, %673 : vector<16x32xf32>
    %c0_343 = arith.constant 0 : index
    %c0_344 = arith.constant 0 : index
    %675 = vector.load %arg16[%c0_343, %c0_344] : memref<1x32xf32, #tpu.memory_space<vmem>>, vector<1x32xf32>
    %676 = vector.broadcast %675 : vector<1x32xf32> to vector<16x32xf32>
    %677 = arith.addf %674, %676 : vector<16x32xf32>
    %cst_345 = arith.constant 0.000000e+00 : f32
    %678 = vector.broadcast %cst_345 : f32 to vector<16x32xf32>
    %679 = arith.maximumf %677, %678 : vector<16x32xf32>
    %c0_346 = arith.constant 0 : index
    %c0_347 = arith.constant 0 : index
    %680 = vector.load %arg17[%c0_346, %c0_347] : memref<32x128xf32, #tpu.memory_space<vmem>>, vector<32x128xf32>
    %cst_348 = arith.constant dense<0.000000e+00> : vector<16x128xf32>
    %681 = tpu.matmul %679, %680, %cst_348 {dimension_numbers = #tpu.dot_dimension_numbers<[1], [0], [0], [1], [0, 0, 1, 1], [], []>} : vector<16x32xf32>, vector<32x128xf32>, vector<16x128xf32> -> vector<16x128xf32>
    %c0_349 = arith.constant 0 : index
    %c0_350 = arith.constant 0 : index
    %682 = vector.load %arg18[%c0_349, %c0_350] : memref<1x128xf32, #tpu.memory_space<vmem>>, vector<1x128xf32>
    %683 = vector.broadcast %682 : vector<1x128xf32> to vector<16x128xf32>
    %684 = arith.addf %681, %683 : vector<16x128xf32>
    %c0_351 = arith.constant 0 : index
    %c0_352 = arith.constant 0 : index
    %685 = vector.load %arg19[%c0_351, %c0_352] : memref<16x128xf32, #tpu.memory_space<vmem>>, vector<16x128xf32>
    tpu.vector_store %arg19[%c0_351, %c0_352], %684 {strides = array<i32>} : memref<16x128xf32, #tpu.memory_space<vmem>>, vector<16x128xf32>,
    return
  }
}

</mosaic_0001>

<bundles_post_ra>
// kernel: net_forward.1
= control target key start
LH: loop header
LB: loop body
LE: loop exit
PB: predicated region body
PF: predicated region fallthrough
CT: control target
= control target key end

     0   :  { %s5564_s0 = inlined_call_operand.vmem [shape: f32[16,129], index: 0, kind: input, shape index: {}]   ;;  %s5565_s1 = inlined_call_operand.vmem [shape: f32[129,258], index: 1, kind: input, shape index: {}]   ;;  %s5566_s2 = inlined_call_operand.vmem [shape: f32[1,258], index: 2, kind: input, shape index: {}]   ;;  %s5567_s3 = inlined_call_operand.hbm [shape: f32[258,516], index: 3, kind: input, shape index: {}]   ;;  %s5568_s4 = inlined_call_operand.vmem [shape: f32[1,516], index: 4, kind: input, shape index: {}]   ;;  %s5569_s5 = inlined_call_operand.hbm [shape: f32[516,256], index: 5, kind: input, shape index: {}]   ;;  %s5570_s6 = inlined_call_operand.hbm [shape: f32[516,256], index: 6, kind: input, shape index: {}]   ;;  %s5571_s7 = inlined_call_operand.vmem [shape: f32[64,256], index: 7, kind: input, shape index: {}]   ;;  %s5572_s8 = inlined_call_operand.vmem [shape: f32[1,256], index: 8, kind: input, shape index: {}]   ;;  %s5573_s9 = inlined_call_operand.vmem [shape: f32[1,256], index: 9, kind: input, shape index: {}]   ;;  %s5574_s10 = inlined_call_operand.vmem [shape: f32[64,256], index: 10, kind: input, shape index: {}]   ;;  %s5575_s11 = inlined_call_operand.hbm [shape: f32[64,256], index: 11, kind: input, shape index: {}]   ;;  %s5576_s12 = inlined_call_operand.hbm [shape: f32[64,256], index: 12, kind: input, shape index: {}]   ;;  %s5577_s13 = inlined_call_operand.vmem [shape: f32[1,256], index: 13, kind: input, shape index: {}]   ;;  %s5578_s14 = inlined_call_operand.vmem [shape: f32[1,256], index: 14, kind: input, shape index: {}]   ;;  %s5579_s15 = inlined_call_operand.vmem [shape: f32[64,32], index: 15, kind: input, shape index: {}]   ;;  %s5580_s16 = inlined_call_operand.vmem [shape: f32[1,32], index: 16, kind: input, shape index: {}]   ;;  %s5581_s17 = inlined_call_operand.vmem [shape: f32[32,128], index: 17, kind: input, shape index: {}]   ;;  %s5582_s18 = inlined_call_operand.vmem [shape: f32[1,128], index: 18, kind: input, shape index: {}]   ;;  %s5583_s19 = inlined_call_operand.vmem [shape: f32[16,128], index: 19, kind: output, shape index: {}]  }
   0x1   :  { %5586 = sst [smem:[#allocation17_spill]] %s5564_s0 }
   0x2   :  { %5587 = sst [smem:[#allocation18_spill]] %s5565_s1 }
   0x3   :  { %5588 = sst [smem:[#allocation19_spill]] %s5566_s2 }
   0x4   :  { %5589 = sst [smem:[#allocation20_spill]] %s5567_s3 }
   0x5   :  { %24 = vsyncpa [#allocation7], 0 }
   0x6   :  { %25 = vsyncpa [#allocation9], 0  ;;  %s52_s20 = sshll.u32 %s5569_s5, 4  ;;  %s53_s20 = int_to_ptr.hbm [resolvable:$true] %s52_s20 }
   0x7   :  { %26 = vsyncpa [#allocation12], 0  ;;  %s4434_s21 = smov [#allocation8]   ;;  %s86_s23 = sshll.u32 %s5575_s11, 4  ;;  %s87_s23 = int_to_ptr.hbm [resolvable:$true] %s86_s23 }
   0x8   :  { %s54_s1 = sshll.u32 %s4434_s21, 4  ;;  %s4435_s24 = smov 256   ;;  %s55_s1 = int_to_ptr.vmem [resolvable:$true] %s54_s1 }
   0x9   :  { %s4436_s25 = smov 16   ;;  %s4437_s3 = smov [#allocation11]  }
   0xa   :  { %60 = dma.hbm_to_vmem [thread:$0]  %s53_s20, 16640, %s55_s1, [#allocation9], %s4435_s24, %s4435_s24, %s4436_s25  }
   0xb   :  { %s88_s26 = sshll.u32 %s4437_s3, 4  ;;  %s5590_s28 = sld [smem:[#allocation20_spill]]  ;;  %s89_s26 = int_to_ptr.vmem [resolvable:$true] %s88_s26 }
   0xc   :  { %94 = dma.hbm_to_vmem [thread:$0]  %s87_s23, 2048, %s89_s26, [#allocation12], %s4435_s24, %s4435_s24, %s4436_s25  }
   0xd   :  { %s4438_s11 = smov [#allocation6]   ;;  %s65_s20 = sshll.u32 %s5570_s6, 4  ;;  %s66_s20 = int_to_ptr.hbm [resolvable:$true] %s65_s20 }
   0xe   :  { %s39_s0 = sshll.u32 %s4438_s11, 4  ;;  %s4439_s1 = smov 640   ;;  %s40_s0 = int_to_ptr.vmem [resolvable:$true] %s39_s0 }
   0xf   :  { %s4440_s22 = smov 40   ;;  %s4441_s2 = smov [#allocation10]  }
  0x10   :  { %s67_s3 = sshll.u32 %s4441_s2, 4  ;;  %s4442_s23 = smov [#allocation13]   ;;  %s68_s3 = int_to_ptr.vmem [resolvable:$true] %s67_s3 }
  0x11   :  { %s37_s29 = sshll.u32 %s5590_s28, 4  ;;  %s99_s28 = sshll.u32 %s5576_s12, 4  ;;  %s38_s29 = int_to_ptr.hbm [resolvable:$true] %s37_s29  ;;  %s100_s28 = int_to_ptr.hbm [resolvable:$true] %s99_s28 }
  0x12   :  { %45 = dma.hbm_to_vmem [thread:$0]  %s38_s29, 21120, %s40_s0, [#allocation7], %s4439_s1, %s4439_s1, %s4440_s22  }
  0x13   :  { %73 = dma.hbm_to_vmem [thread:$0]  %s66_s20, 16640, %s68_s3, [#allocation9], %s4435_s24, %s4435_s24, %s4436_s25  }
  0x14   :  { %s101_s26 = sshll.u32 %s4442_s23, 4  ;;  %s102_s26 = int_to_ptr.vmem [resolvable:$true] %s101_s26 }
  0x15   :  { %107 = dma.hbm_to_vmem [thread:$0]  %s100_s28, 2048, %s102_s26, [#allocation12], %s4435_s24, %s4435_s24, %s4436_s25  }
  0x16   :  { %4428 = dma.done.wait [#allocation7], 21120  }
  0x17   :  { %4429 = vsyncadd [#allocation7], 4294946176 }
  0x18   :  { %4430 = dma.done.wait [#allocation9], 33280  }
  0x19   :  { %4431 = vsyncadd [#allocation9], 4294934016 }
  0x1a   :  { %4432 = dma.done.wait [#allocation12], 4096  }
  0x1b   :  { %4433 = vsyncadd [#allocation12], 4294963200  ;;  %vm210_vm0 = vcmask 1040384   ;;  %s5591_s29 = sld [smem:[#allocation18_spill]]  ;;  %vm203_vm1 = vcmask 7168   ;;  %v440_v54 = vld [vmem:[#allocation6 + $0x260] sm:$0xff] }
  0x1c   :  { %s5592_s6 = sld [smem:[#allocation17_spill]]  ;;  %v519_v55 = vld [vmem:[#allocation6 + $0x4d8] sm:$0xff]  ;;  %v524_v57 = vld [vmem:[#allocation6 + $0x500] sm:$0x3]  ;;  %vm548_vm2 = vcmask 1041408   ;;  %v514_v59 = vld [vmem:[#allocation6 + $0x4b0] sm:$0xff] }
  0x1d   :  { %v439_v56 = vld [vmem:[#allocation6 + $0x258] sm:$0xff]  ;;  %v434_v60 = vld [vmem:[#allocation6 + $0x230] sm:$0xff]  ;;  %v520_v61 = vld [vmem:[#allocation6 + $0x4e0] sm:$0xff]  ;;  %s5593_s25 = sld [smem:[#allocation19_spill]]  ;;  %vm541_vm3 = vcmask 15360   ;;  %vm1062_vm4 = vcmask 1043456  }
  0x1e   :  { %v435_v58 = vld [vmem:[#allocation6 + $0x238] sm:$0xff]  ;;  %v430_v62 = vld [vmem:[#allocation6 + $0x210] sm:$0xff]  ;;  %v509_v63 = vld [vmem:[#allocation6 + $0x488] sm:$0xff]  ;;  %vm1055_vm5 = vcmask 31744   ;;  %vm1805_vm14 = vcmask 517120   ;;  %vm1707_vm15 = vcmask 523264  }
  0x21   :  { %v189_v0 = vld [vmem:[%s5591_s29 + $0x168] sm:$0xff]  ;;  %v192_v1 = vld [vmem:[%s5591_s29 + $0x180] sm:$0x1]  ;;  %v190_v2 = vld [vmem:[%s5591_s29 + $0x170] sm:$0xff] }
  0x22   :  { %220 = vmatpush.msra.mxu0 %v189_v0  ;;  %4012 = vmatpush.msk.msra.mxu1 %vm210_vm0, %v192_v1  ;;  %v191_v3 = vld [vmem:[%s5591_s29 + $0x178] sm:$0xff]  ;;  %v186_v4 = vld [vmem:[%s5591_s29 + $0x150] sm:$0xff]  ;;  %v188_v6 = vld [vmem:[%s5591_s29 + $0x160] sm:$0xff] }
  0x23   :  { %v187_v5 = vld [vmem:[%s5591_s29 + $0x158] sm:$0xff]  ;;  %266 = vmatpush.msra.mxu2 %v190_v2  ;;  %v184_v8 = vld [vmem:[%s5591_s29 + $0x140] sm:$0xff]  ;;  %v185_v9 = vld [vmem:[%s5591_s29 + $0x148] sm:$0xff] }
  0x24   :  { %312 = vmatpush.msrb.mxu1 %v191_v3  ;;  %v183_v7 = vld [vmem:[%s5591_s29 + $0x138] sm:$0xff]  ;;  %221 = vmatpush.msra.mxu0 %v186_v4  ;;  %v180_v10 = vld [vmem:[%s5591_s29 + $0x120] sm:$0xff]  ;;  %v181_v11 = vld [vmem:[%s5591_s29 + $0x128] sm:$0xff] }
  0x25   :  { %267 = vmatpush.msra.mxu2 %v187_v5  ;;  %v182_v12 = vld [vmem:[%s5591_s29 + $0x130] sm:$0xff]  ;;  %v177_v13 = vld [vmem:[%s5591_s29 + $0x108] sm:$0xff]  ;;  %v179_v16 = vld [vmem:[%s5591_s29 + $0x118] sm:$0xff] }
  0x26   :  { %313 = vmatpush.msrb.mxu1 %v188_v6  ;;  %222 = vmatpush.msra.mxu0 %v183_v7  ;;  %v193_v14 = vld [vmem:[%s5591_s29 + $0x188] sm:$0x1]  ;;  %v178_v15 = vld [vmem:[%s5591_s29 + $0x110] sm:$0xff]  ;;  %v175_v19 = vld [vmem:[%s5591_s29 + $0xf8] sm:$0xff] }
  0x27   :  { %268 = vmatpush.msra.mxu2 %v184_v8  ;;  %4015 = vmatpush.msk.msra.mxu3 %vm210_vm0, %v193_v14  ;;  %v141_v17 = vld [vmem:[%s5592_s6 + $0x8] sm:$0xff]  ;;  %v174_v18 = vld [vmem:[%s5591_s29 + $0xf0] sm:$0xff]  ;;  %v176_v20 = vld [vmem:[%s5591_s29 + $0x100] sm:$0xff] }
  0x28   :  { %314 = vmatpush.msrb.mxu1 %v185_v9  ;;  %223 = vmatpush.msra.mxu0 %v180_v10  ;;  %v171_v21 = vld [vmem:[%s5591_s29 + $0xd8] sm:$0xff]  ;;  %v172_v22 = vld [vmem:[%s5591_s29 + $0xe0] sm:$0xff]  ;;  %v173_v23 = vld [vmem:[%s5591_s29 + $0xe8] sm:$0xff] }
  0x29   :  { %269 = vmatpush.msra.mxu2 %v181_v11  ;;  %4016 = vmatmul.msk.f32.vlgmr.msra.gmra.mxu3 %vm203_vm1, %v141_v17  ;;  %v168_v24 = vld [vmem:[%s5591_s29 + $0xc0] sm:$0xff]  ;;  %v169_v25 = vld [vmem:[%s5591_s29 + $0xc8] sm:$0xff]  ;;  %v170_v26 = vld [vmem:[%s5591_s29 + $0xd0] sm:$0xff] }
  0x2a   :  { %315 = vmatpush.msrb.mxu1 %v182_v12  ;;  %224 = vmatpush.msra.mxu0 %v177_v13  ;;  %v165_v27 = vld [vmem:[%s5591_s29 + $0xa8] sm:$0xff]  ;;  %v4664_v28 = vld [vmem:[%s5592_s6 + $0x18] sm:$0xff]  ;;  %v166_v29 = vld [vmem:[%s5591_s29 + $0xb0] sm:$0xff] }
  0x2b   :  { %270 = vmatpush.msra.mxu2 %v178_v15  ;;  %4013 = vmatmul.msk.f32.vlgmr.msra.gmra.mxu1 %vm203_vm1, %v141_v17  ;;  %v167_v30 = vld [vmem:[%s5591_s29 + $0xb8] sm:$0xff]  ;;  %v162_v31 = vld [vmem:[%s5591_s29 + $0x90] sm:$0xff]  ;;  %v164_v33 = vld [vmem:[%s5591_s29 + $0xa0] sm:$0xff] }
  0x2c   :  { %316 = vmatpush.msrb.mxu1 %v179_v16  ;;  %225 = vmatpush.msra.mxu0 %v174_v18  ;;  %v163_v32 = vld [vmem:[%s5591_s29 + $0x98] sm:$0xff]  ;;  %v194_v35 = vld [vmem:[%s5591_s29 + $0x190] sm:$0x1]  ;;  %v160_v36 = vld [vmem:[%s5591_s29 + $0x80] sm:$0xff] }
  0x2d   :  { %271 = vmatpush.msra.mxu2 %v175_v19  ;;  %v159_v34 = vld [vmem:[%s5591_s29 + $0x78] sm:$0xff]  ;;  %v161_v37 = vld [vmem:[%s5591_s29 + $0x88] sm:$0xff]  ;;  %v156_v38 = vld [vmem:[%s5591_s29 + $0x60] sm:$0xff]  ;;  %4018 = vmatpush.msk.msrb.mxu3 %vm210_vm0, %v194_v35 }
  0x2e   :  { %317 = vmatpush.msrb.mxu1 %v176_v20  ;;  %226 = vmatpush.msra.mxu0 %v171_v21  ;;  %v157_v39 = vld [vmem:[%s5591_s29 + $0x68] sm:$0xff]  ;;  %v158_v40 = vld [vmem:[%s5591_s29 + $0x70] sm:$0xff]  ;;  %v155_v43 = vld [vmem:[%s5591_s29 + $0x58] sm:$0xff] }
  0x2f   :  { %272 = vmatpush.msra.mxu2 %v172_v22  ;;  %v153_v41 = vld [vmem:[%s5591_s29 + $0x48] sm:$0xff]  ;;  %v154_v42 = vld [vmem:[%s5591_s29 + $0x50] sm:$0xff]  ;;  %v151_v45 = vld [vmem:[%s5591_s29 + $0x38] sm:$0xff]  ;;  %564 = vmatpush.msra.mxu3 %v439_v56 }
  0x30   :  { %318 = vmatpush.msrb.mxu1 %v173_v23  ;;  %227 = vmatpush.msra.mxu0 %v168_v24  ;;  %v150_v44 = vld [vmem:[%s5591_s29 + $0x30] sm:$0xff]  ;;  %v152_v46 = vld [vmem:[%s5591_s29 + $0x40] sm:$0xff]  ;;  %v147_v47 = vld [vmem:[%s5591_s29 + $0x18] sm:$0xff] }
  0x31   :  { %273 = vmatpush.msra.mxu2 %v169_v25  ;;  %4017 = vmatmul.msk.f32.gmra.mxu3 %vm203_vm1, %v4664_v28  ;;  %v148_v48 = vld [vmem:[%s5591_s29 + $0x20] sm:$0xff]  ;;  %v149_v49 = vld [vmem:[%s5591_s29 + $0x28] sm:$0xff]  ;;  %v146_v53 = vld [vmem:[%s5591_s29 + $0x10] sm:$0xff] }
  0x32   :  { %319 = vmatpush.msrb.mxu1 %v170_v26  ;;  %228 = vmatpush.msra.mxu0 %v165_v27  ;;  %v144_v50 = vld [vmem:[%s5591_s29] sm:$0xff]  ;;  %v145_v51 = vld [vmem:[%s5591_s29 + $0x8] sm:$0xff]  ;;  %v142_v0 = vld [vmem:[%s5592_s6 + $0x10] sm:$0xff] }
  0x33   :  { %274 = vmatpush.msra.mxu2 %v166_v29  ;;  %4014 = vmatmul.msk.f32.gmra.mxu1 %vm203_vm1, %v4664_v28  ;;  %v140_v52 = vld [vmem:[%s5592_s6] sm:$0xff]  ;;  %v429_v1 = vld [vmem:[#allocation6 + $0x208] sm:$0xff]  ;;  %v515_v5 = vld [vmem:[#allocation6 + $0x4b8] sm:$0xff] }
  0x34   :  { %320 = vmatpush.msrb.mxu1 %v167_v30  ;;  %229 = vmatpush.msra.mxu0 %v162_v31  ;;  %v425_v2 = vld [vmem:[#allocation6 + $0x1e8] sm:$0xff]  ;;  %v504_v3 = vld [vmem:[#allocation6 + $0x460] sm:$0xff]  ;;  %v499_v6 = vld [vmem:[#allocation6 + $0x438] sm:$0xff] }
  0x35   :  { %275 = vmatpush.msra.mxu2 %v163_v32  ;;  %565 = vmatpush.msra.mxu3 %v434_v60  ;;  %v420_v4 = vld [vmem:[#allocation6 + $0x1c0] sm:$0xff]  ;;  %v415_v8 = vld [vmem:[#allocation6 + $0x198] sm:$0xff]  ;;  %v510_v9 = vld [vmem:[#allocation6 + $0x490] sm:$0xff] }
  0x36   :  { %321 = vmatpush.msrb.mxu1 %v164_v33  ;;  %230 = vmatpush.msra.mxu0 %v159_v34  ;;  %v424_v7 = vld [vmem:[#allocation6 + $0x1e0] sm:$0xff]  ;;  %v494_v10 = vld [vmem:[#allocation6 + $0x410] sm:$0xff]  ;;  %v419_v11 = vld [vmem:[#allocation6 + $0x1b8] sm:$0xff] }
  0x37   :  { %276 = vmatpush.msra.mxu2 %v160_v36  ;;  %566 = vmatpush.msra.mxu3 %v429_v1  ;;  %v410_v12 = vld [vmem:[#allocation6 + $0x170] sm:$0xff]  ;;  %v505_v13 = vld [vmem:[#allocation6 + $0x468] sm:$0xff]  ;;  %v484_v16 = vld [vmem:[#allocation6 + $0x3c0] sm:$0xff] }
  0x38   :  { %322 = vmatpush.msrb.mxu1 %v161_v37  ;;  %231 = vmatpush.msra.mxu0 %v156_v38  ;;  %v489_v14 = vld [vmem:[#allocation6 + $0x3e8] sm:$0xff]  ;;  %v479_v18 = vld [vmem:[#allocation6 + $0x398] sm:$0xff]  ;;  %v390_v20 = vld [vmem:[#allocation6 + $0xd0] sm:$0xff] }
  0x39   :  { %277 = vmatpush.msra.mxu2 %v157_v39  ;;  %4019 = vmatmul.msk.f32.vlgmr.msrb.gmra.mxu3 %vm203_vm1, %v141_v17  ;;  %v405_v15 = vld [vmem:[#allocation6 + $0x148] sm:$0xff]  ;;  %v400_v17 = vld [vmem:[#allocation6 + $0x120] sm:$0xff]  ;;  %v395_v19 = vld [vmem:[#allocation6 + $0xf8] sm:$0xff] }
  0x3a   :  { %323 = vmatpush.msrb.mxu1 %v158_v40  ;;  %232 = vmatpush.msra.mxu0 %v153_v41  ;;  %v385_v21 = vld [vmem:[#allocation6 + $0xa8] sm:$0xff]  ;;  %v380_v22 = vld [vmem:[#allocation6 + $0x80] sm:$0xff]  ;;  %v375_v23 = vld [vmem:[#allocation6 + $0x58] sm:$0xff] }
  0x3b   :  { %278 = vmatpush.msra.mxu2 %v154_v42  ;;  %567 = vmatpush.msra.mxu3 %v424_v7  ;;  %v370_v24 = vld [vmem:[#allocation6 + $0x30] sm:$0xff]  ;;  %v365_v25 = vld [vmem:[#allocation6 + $0x8] sm:$0xff]  ;;  %v516_v27 = vld [vmem:[#allocation6 + $0x4c0] sm:$0xff] }
  0x3c   :  { %324 = vmatpush.msrb.mxu1 %v155_v43  ;;  %233 = vmatpush.msra.mxu0 %v150_v44  ;;  %v521_v26 = vld [vmem:[#allocation6 + $0x4e8] sm:$0xff]  ;;  %v506_v29 = vld [vmem:[#allocation6 + $0x470] sm:$0xff]  ;;  %v500_v33 = vld [vmem:[#allocation6 + $0x440] sm:$0xff] }
  0x3d   :  { %279 = vmatpush.msra.mxu2 %v151_v45  ;;  %568 = vmatpush.msra.mxu3 %v419_v11  ;;  %v474_v30 = vld [vmem:[#allocation6 + $0x370] sm:$0xff]  ;;  %v501_v31 = vld [vmem:[#allocation6 + $0x448] sm:$0xff]  ;;  %v496_v35 = vld [vmem:[#allocation6 + $0x420] sm:$0xff] }
  0x3e   :  { %325 = vmatpush.msrb.mxu1 %v152_v46  ;;  %234 = vmatpush.msra.mxu0 %v147_v47  ;;  %v414_v32 = vld [vmem:[#allocation6 + $0x190] sm:$0xff]  ;;  %v469_v34 = vld [vmem:[#allocation6 + $0x348] sm:$0xff]  ;;  %v495_v37 = vld [vmem:[#allocation6 + $0x418] sm:$0xff] }
  0x3f   :  { %280 = vmatpush.msra.mxu2 %v148_v48  ;;  %569 = vmatpush.msra.mxu3 %v414_v32  ;;  %v409_v36 = vld [vmem:[#allocation6 + $0x168] sm:$0xff]  ;;  %v464_v38 = vld [vmem:[#allocation6 + $0x320] sm:$0xff]  ;;  %v491_v39 = vld [vmem:[#allocation6 + $0x3f8] sm:$0xff] }
  0x40   :  { %326 = vmatpush.msrb.mxu1 %v149_v49  ;;  %235 = vmatpush.msra.mxu0 %v144_v50  ;;  %v404_v40 = vld [vmem:[#allocation6 + $0x140] sm:$0xff]  ;;  %v490_v41 = vld [vmem:[#allocation6 + $0x3f0] sm:$0xff]  ;;  %v459_v42 = vld [vmem:[#allocation6 + $0x2f8] sm:$0xff] }
  0x41   :  { %281 = vmatpush.msra.mxu2 %v145_v51  ;;  %236 = vmatmul.f32.vlgmr.msra.gmra.mxu0 %v140_v52  ;;  %v486_v43 = vld [vmem:[#allocation6 + $0x3d0] sm:$0xff]  ;;  %v399_v44 = vld [vmem:[#allocation6 + $0x118] sm:$0xff]  ;;  %v485_v45 = vld [vmem:[#allocation6 + $0x3c8] sm:$0xff] }
  0x42   :  { %282 = vmatmul.f32.vlgmr.msra.gmra.mxu2 %v140_v52  ;;  %327 = vmatpush.msrb.mxu1 %v146_v53  ;;  %v454_v46 = vld [vmem:[#allocation6 + $0x2d0] sm:$0xff]  ;;  %v481_v47 = vld [vmem:[#allocation6 + $0x3a8] sm:$0xff]  ;;  %v480_v49 = vld [vmem:[#allocation6 + $0x3a0] sm:$0xff] }
  0x43   :  { %328 = vmatmul.f32.vlgmr.msrb.gmra.mxu1 %v140_v52  ;;  %4020 = vmatmul.msk.f32.gmra.mxu3 %vm203_vm1, %v4664_v28  ;;  %v511_v28 = vld [vmem:[#allocation6 + $0x498] sm:$0xff]  ;;  %v394_v48 = vld [vmem:[#allocation6 + $0xf0] sm:$0xff]  ;;  %v449_v50 = vld [vmem:[#allocation6 + $0x2a8] sm:$0xff] }
  0x44   :  { %633 = vmatpush.msra.mxu1 %v440_v54  ;;  %587 = vmatpush.msrb.mxu0 %v519_v55  ;;  %v476_v51 = vld [vmem:[#allocation6 + $0x380] sm:$0xff]  ;;  %v389_v52 = vld [vmem:[#allocation6 + $0xc8] sm:$0xff]  ;;  %v475_v53 = vld [vmem:[#allocation6 + $0x378] sm:$0xff] }
  0x45   :  { %4021 = vmatpush.msk.msrb.mxu2 %vm548_vm2, %v524_v57  ;;  %570 = vmatpush.msra.mxu3 %v409_v36  ;;  %v444_v54 = vld [vmem:[#allocation6 + $0x280] sm:$0xff]  ;;  %v471_v55 = vld [vmem:[#allocation6 + $0x358] sm:$0xff]  ;;  %v470_v57 = vld [vmem:[#allocation6 + $0x350] sm:$0xff] }
  0x46   :  { %634 = vmatpush.msra.mxu1 %v435_v58  ;;  %588 = vmatpush.msrb.mxu0 %v514_v59  ;;  %v384_v56 = vld [vmem:[#allocation6 + $0xa0] sm:$0xff]  ;;  %v441_v58 = vld [vmem:[#allocation6 + $0x268] sm:$0xff]  ;;  %v466_v59 = vld [vmem:[#allocation6 + $0x330] sm:$0xff] }
  0x47   :  { %656 = vmatpush.msra.mxu2 %v520_v61  ;;  %571 = vmatpush.msra.mxu3 %v404_v40  ;;  %v379_v60 = vld [vmem:[#allocation6 + $0x78] sm:$0xff]  ;;  %v465_v61 = vld [vmem:[#allocation6 + $0x328] sm:$0xff]  ;;  %v460_v1 = vld [vmem:[#allocation6 + $0x300] sm:$0xff] }
  0x48   :  { %635 = vmatpush.msra.mxu1 %v430_v62  ;;  %589 = vmatpush.msrb.mxu0 %v509_v63  ;;  %v436_v62 = vld [vmem:[#allocation6 + $0x240] sm:$0xff]  ;;  %v461_v63 = vld [vmem:[#allocation6 + $0x308] sm:$0xff]  ;;  %v451_v7 = vld [vmem:[#allocation6 + $0x2b8] sm:$0xff] }
  0x49   :  { %239 = vmatmul.f32.gmra.mxu0 %v142_v0  ;;  %657 = vmatpush.msra.mxu2 %v515_v5  ;;  %v455_v5 = vld [vmem:[#allocation6 + $0x2d8] sm:$0xff]  ;;  %v446_v11 = vld [vmem:[#allocation6 + $0x290] sm:$0xff] }
  0x4a   :  { %285 = vmatmul.f32.gmra.mxu2 %v142_v0  ;;  %636 = vmatpush.msra.mxu1 %v425_v2  ;;  %v431_v2 = vld [vmem:[#allocation6 + $0x218] sm:$0xff] }
  0x4b   :  { %331 = vmatmul.f32.gmra.mxu1 %v142_v0  ;;  %590 = vmatpush.msrb.mxu0 %v504_v3  ;;  %v374_v0 = vld [vmem:[#allocation6 + $0x50] sm:$0xff]  ;;  %v456_v3 = vld [vmem:[#allocation6 + $0x2e0] sm:$0xff] }
  0x4c   :  { %637 = vmatpush.msra.mxu1 %v420_v4  ;;  %658 = vmatpush.msra.mxu2 %v510_v9  ;;  %v369_v4 = vld [vmem:[#allocation6 + $0x28] sm:$0xff]  ;;  %v450_v9 = vld [vmem:[#allocation6 + $0x2b0] sm:$0xff] }
  0x4d   :  { %591 = vmatpush.msrb.mxu0 %v499_v6  ;;  %572 = vmatpush.msra.mxu3 %v399_v44  ;;  %v426_v6 = vld [vmem:[#allocation6 + $0x1f0] sm:$0xff] }
  0x4e   :  { %638 = vmatpush.msra.mxu1 %v415_v8  ;;  %659 = vmatpush.msra.mxu2 %v505_v13  ;;  %v364_v8 = vld [vmem:[#allocation6] sm:$0xff] }
  0x4f   :  { %592 = vmatpush.msrb.mxu0 %v494_v10  ;;  %573 = vmatpush.msra.mxu3 %v394_v48  ;;  %v421_v10 = vld [vmem:[#allocation6 + $0x1c8] sm:$0xff]  ;;  %v416_v13 = vld [vmem:[#allocation6 + $0x1a0] sm:$0xff] }
  0x50   :  { %639 = vmatpush.msra.mxu1 %v410_v12  ;;  %660 = vmatpush.msra.mxu2 %v500_v33  ;;  %v445_v12 = vld [vmem:[#allocation6 + $0x288] sm:$0xff] }
  0x51   :  { %593 = vmatpush.msrb.mxu0 %v489_v14  ;;  %574 = vmatpush.msra.mxu3 %v389_v52  ;;  %v411_v14 = vld [vmem:[#allocation6 + $0x178] sm:$0xff] }
  0x52   :  { %640 = vmatpush.msra.mxu1 %v405_v15  ;;  %661 = vmatpush.msra.mxu2 %v495_v37  ;;  %v406_v15 = vld [vmem:[#allocation6 + $0x150] sm:$0xff] }
  0x53   :  { %594 = vmatpush.msrb.mxu0 %v484_v16  ;;  %575 = vmatpush.msra.mxu3 %v384_v56 }
  0x54   :  { %641 = vmatpush.msra.mxu1 %v400_v17  ;;  %662 = vmatpush.msra.mxu2 %v490_v41  ;;  %v401_v17 = vld [vmem:[#allocation6 + $0x128] sm:$0xff]  ;;  %v443_v41 = vld [vmem:[#allocation6 + $0x278] sm:$0xff] }
  0x55   :  { %595 = vmatpush.msrb.mxu0 %v479_v18  ;;  %576 = vmatpush.msra.mxu3 %v379_v60 }
  0x56   :  { %642 = vmatpush.msra.mxu1 %v395_v19  ;;  %663 = vmatpush.msra.mxu2 %v485_v45  ;;  %v396_v19 = vld [vmem:[#allocation6 + $0x100] sm:$0xff]  ;;  %v442_v45 = vld [vmem:[#allocation6 + $0x270] sm:$0xff] }
  0x57   :  { %596 = vmatpush.msrb.mxu0 %v474_v30  ;;  %577 = vmatpush.msra.mxu3 %v374_v0 }
  0x58   :  { %643 = vmatpush.msra.mxu1 %v390_v20  ;;  %664 = vmatpush.msra.mxu2 %v480_v49  ;;  %v391_v20 = vld [vmem:[#allocation6 + $0xd8] sm:$0xff] }
  0x59   :  { %597 = vmatpush.msrb.mxu0 %v469_v34  ;;  %578 = vmatpush.msra.mxu3 %v369_v4 }
  0x5a   :  { %644 = vmatpush.msra.mxu1 %v385_v21  ;;  %665 = vmatpush.msra.mxu2 %v475_v53  ;;  %v386_v21 = vld [vmem:[#allocation6 + $0xb0] sm:$0xff] }
  0x5b   :  { %598 = vmatpush.msrb.mxu0 %v464_v38  ;;  %579 = vmatpush.msra.mxu3 %v364_v8  ;;  %v413_v8 = vld [vmem:[#allocation6 + $0x188] sm:$0xff] }
  0x5c   :  { %645 = vmatpush.msra.mxu1 %v380_v22  ;;  %666 = vmatpush.msra.mxu2 %v470_v57  ;;  %v525_v22 = vld [vmem:[#allocation6 + $0x508] sm:$0x3]  ;;  %v432_v57 = vld [vmem:[#allocation6 + $0x220] sm:$0xff] }
  0x5d   :  { %599 = vmatpush.msrb.mxu0 %v459_v42  ;;  %4024 = vmatpush.msk.msrb.mxu3 %vm548_vm2, %v525_v22  ;;  %v526_v42 = vld [vmem:[#allocation6 + $0x510] sm:$0x3]  ;;  %v507_v22 = vld [vmem:[#allocation6 + $0x478] sm:$0xff] }
  0x5e   :  { %646 = vmatpush.msra.mxu1 %v375_v23  ;;  %667 = vmatpush.msra.mxu2 %v465_v61  ;;  %v381_v23 = vld [vmem:[#allocation6 + $0x88] sm:$0xff] }
  0x5f   :  { %600 = vmatpush.msrb.mxu0 %v454_v46  ;;  %v438_v46 = vld [vmem:[#allocation6 + $0x250] sm:$0xff] }
  0x60   :  { %647 = vmatpush.msra.mxu1 %v370_v24  ;;  %668 = vmatpush.msra.mxu2 %v460_v1 }
  0x61   :  { %601 = vmatpush.msrb.mxu0 %v449_v50  ;;  %v437_v50 = vld [vmem:[#allocation6 + $0x248] sm:$0xff] }
  0x62   :  { %648 = vmatpush.msra.mxu1 %v365_v25  ;;  %669 = vmatpush.msra.mxu2 %v455_v5  ;;  %v418_v5 = vld [vmem:[#allocation6 + $0x1b0] sm:$0xff] }
  0x63   :  { %602 = vmatpush.msrb.mxu0 %v444_v54 }
  0x64   :  { %725 = vmatpush.msrb.mxu1 %v521_v26  ;;  %670 = vmatpush.msra.mxu2 %v450_v9  ;;  %v376_v26 = vld [vmem:[#allocation6 + $0x60] sm:$0xff] }
  0x65   :  { %702 = vmatpush.msra.mxu0 %v441_v58  ;;  %v412_v9 = vld [vmem:[#allocation6 + $0x180] sm:$0xff] }
  0x66   :  { %726 = vmatpush.msrb.mxu1 %v516_v27  ;;  %671 = vmatpush.msra.mxu2 %v445_v12  ;;  %v195_v27 = vld [vmem:[%s5593_s25] sm:$0x7]  ;;  %v407_v12 = vld [vmem:[#allocation6 + $0x158] sm:$0xff] }
  0x67   :  { %703 = vmatpush.msra.mxu0 %v436_v62  ;;  %v197_v30 = vperm.slane %v195_v27, 0  ;;  %v198_v38 = vperm.slane %v195_v27, 1  ;;  %v427_v62 = vld [vmem:[#allocation6 + $0x1f8] sm:$0xff] }
  0x68   :  { %727 = vmatpush.msrb.mxu1 %v511_v28  ;;  %v371_v28 = vld [vmem:[#allocation6 + $0x38] sm:$0xff] }
  0x69   :  { %704 = vmatpush.msra.mxu0 %v431_v2  ;;  %v422_v2 = vld [vmem:[#allocation6 + $0x1d0] sm:$0xff] }
  0x6a   :  { %728 = vmatpush.msrb.mxu1 %v506_v29  ;;  %v366_v29 = vld [vmem:[#allocation6 + $0x10] sm:$0xff] }
  0x6b   :  { %705 = vmatpush.msra.mxu0 %v426_v6  ;;  %v417_v6 = vld [vmem:[#allocation6 + $0x1a8] sm:$0xff] }
  0x6c   :  { %729 = vmatpush.msrb.mxu1 %v501_v31  ;;  %v199_v31 = vperm.slane %v195_v27, 2  ;;  %v383_v27 = vld [vmem:[#allocation6 + $0x98] sm:$0xff] }
  0x6d   :  { %706 = vmatpush.msra.mxu0 %v421_v10 }
  0x6e   :  { %730 = vmatpush.msrb.mxu1 %v496_v35 }
  0x6f   :  { %707 = vmatpush.msra.mxu0 %v416_v13  ;;  %v522_v13 = vld [vmem:[#allocation6 + $0x4f0] sm:$0xff] }
  0x70   :  { %731 = vmatpush.msrb.mxu1 %v491_v39 }
  0x71   :  { %708 = vmatpush.msra.mxu0 %v411_v14  ;;  %v403_v14 = vld [vmem:[#allocation6 + $0x138] sm:$0xff] }
  0x72   :  { %732 = vmatpush.msrb.mxu1 %v486_v43 }
  0x73   :  { %709 = vmatpush.msra.mxu0 %v406_v15  ;;  %v402_v15 = vld [vmem:[#allocation6 + $0x130] sm:$0xff] }
  0x74   :  { %733 = vmatpush.msrb.mxu1 %v481_v47 }
  0x75   :  { %710 = vmatpush.msra.mxu0 %v401_v17  ;;  %v398_v17 = vld [vmem:[#allocation6 + $0x110] sm:$0xff] }
  0x76   :  { %734 = vmatpush.msrb.mxu1 %v476_v51  ;;  %v433_v51 = vld [vmem:[#allocation6 + $0x228] sm:$0xff] }
  0x77   :  { %711 = vmatpush.msra.mxu0 %v396_v19  ;;  %v512_v19 = vld [vmem:[#allocation6 + $0x4a0] sm:$0xff] }
  0x78   :  { %735 = vmatpush.msrb.mxu1 %v471_v55 }
  0x79   :  { %712 = vmatpush.msra.mxu0 %v391_v20  ;;  %v393_v20 = vld [vmem:[#allocation6 + $0xe8] sm:$0xff] }
  0x7a   :  { %736 = vmatpush.msrb.mxu1 %v466_v59  ;;  %v428_v59 = vld [vmem:[#allocation6 + $0x200] sm:$0xff] }
  0x7b   :  { %713 = vmatpush.msra.mxu0 %v386_v21  ;;  %v392_v21 = vld [vmem:[#allocation6 + $0xe0] sm:$0xff] }
  0x7c   :  { %737 = vmatpush.msrb.mxu1 %v461_v63  ;;  %v423_v63 = vld [vmem:[#allocation6 + $0x1d8] sm:$0xff] }
  0x7d   :  { %714 = vmatpush.msra.mxu0 %v381_v23  ;;  %v388_v23 = vld [vmem:[#allocation6 + $0xc0] sm:$0xff] }
  0x7e   :  { %738 = vmatpush.msrb.mxu1 %v456_v3  ;;  %v527_v3 = vld [vmem:[#allocation6 + $0x518] sm:$0x3] }
  0x7f   :  { %715 = vmatpush.msra.mxu0 %v376_v26  ;;  %v502_v26 = vld [vmem:[#allocation6 + $0x450] sm:$0xff] }
  0x80   :  { %739 = vmatpush.msrb.mxu1 %v451_v7 }
  0x81   :  { %716 = vmatpush.msra.mxu0 %v371_v28  ;;  %v518_v28 = vld [vmem:[#allocation6 + $0x4d0] sm:$0xff] }
  0x82   :  { %740 = vmatpush.msrb.mxu1 %v446_v11  ;;  %v408_v11 = vld [vmem:[#allocation6 + $0x160] sm:$0xff] }
  0x83   :  { %717 = vmatpush.msra.mxu0 %v366_v29  ;;  %v382_v29 = vld [vmem:[#allocation6 + $0x90] sm:$0xff] }
  0xa8   :  { %v260_v16 = vpop.f32.mrf.mxu1 }
  0xac   :  { %v306_v18 = vpop.f32.mrf.mxu3 }
  0xb0   :  { %v263_v25 = vpop.f32.mrf.mxu1 }
  0xb4   :  { %v4753_v24 = vpop.f32.mrf.mxu3 }
  0xbc   :  { %v352_v33 = vpop.f32.mrf.mxu3 }
  0xbe   :  { %v237_v32 = vpop.f32.mrf.mxu0 }
  0xbf   :  { %v238_v34 = vadd.f32 %v237_v32, %v197_v30  ;;  %v513_v32 = vld [vmem:[#allocation6 + $0x4a8] sm:$0xff] }
  0xc0   :  { %v329_v35 = vpop.f32.mrf.mxu1 }
  0xc1   :  { %v261_v36 = vadd.f32 %v260_v16, %v238_v34  ;;  %v330_v37 = vadd.f32 %v329_v35, %v199_v31  ;;  %v517_v16 = vld [vmem:[#allocation6 + $0x4c8] sm:$0xff]  ;;  %v492_v34 = vld [vmem:[#allocation6 + $0x400] sm:$0xff] }
  0xc2   :  { %v373_v35 = vld [vmem:[#allocation6 + $0x48] sm:$0xff] }
  0xc3   :  { %v4759_v39 = vmax.f32 %v261_v36, 0.0  ;;  %v353_v40 = vadd.f32 %v352_v33, %v330_v37  ;;  %v377_v33 = vld [vmem:[#allocation6 + $0x68] sm:$0xff]  ;;  %v508_v36 = vld [vmem:[#allocation6 + $0x480] sm:$0xff] }
  0xc4   :  { %v372_v37 = vld [vmem:[#allocation6 + $0x40] sm:$0xff] }
  0xc5   :  { %v4761_v43 = vmax.f32 %v353_v40, 0.0  ;;  %v283_v44 = vpop.f32.mrf.mxu2  ;;  %580 = vmatmul.f32.vlgmr.msra.gmra.mxu3 %v4759_v39  ;;  %649 = vmatmul.f32.vlgmr.msra.gmra.mxu1 %v4759_v39  ;;  %v368_v40 = vld [vmem:[#allocation6 + $0x20] sm:$0xff] }
  0xc6   :  { %v284_v47 = vadd.f32 %v283_v44, %v198_v38  ;;  %v240_v48 = vpop.f32.mrf.mxu0  ;;  %840 = vmatpush.msra.mxu1 %v443_v41  ;;  %4027 = vmatpush.msk.msra.mxu3 %vm548_vm2, %v526_v42  ;;  %v355_v54 = vpop.f32.mrf.mxu3  ;;  %v503_v41 = vld [vmem:[#allocation6 + $0x458] sm:$0xff]  ;;  %v482_v44 = vld [vmem:[#allocation6 + $0x3b0] sm:$0xff] }
  0xc7   :  { %v241_v49 = vadd.f32 %v240_v48, %v197_v30  ;;  %4022 = vmatmul.msk.f32.vlgmr.msrb.gmra.mxu2 %vm541_vm3, %v4761_v43  ;;  %v497_v30 = vld [vmem:[#allocation6 + $0x428] sm:$0xff]  ;;  %v367_v42 = vld [vmem:[#allocation6 + $0x18] sm:$0xff] }
  0xc8   :  { %v307_v52 = vadd.f32 %v306_v18, %v284_v47  ;;  %v332_v53 = vpop.f32.mrf.mxu1  ;;  %771 = vmatpush.msrb.mxu2 %v442_v45  ;;  %841 = vmatpush.msra.mxu1 %v438_v46  ;;  %v397_v18 = vld [vmem:[#allocation6 + $0x108] sm:$0xff]  ;;  %v498_v45 = vld [vmem:[#allocation6 + $0x430] sm:$0xff]  ;;  %v528_v46 = vld [vmem:[#allocation6 + $0x520] sm:$0x3] }
  0xc9   :  { %v264_v55 = vadd.f32 %v263_v25, %v241_v49  ;;  %v333_v56 = vadd.f32 %v332_v53, %v199_v31  ;;  %v387_v25 = vld [vmem:[#allocation6 + $0xb8] sm:$0xff]  ;;  %v378_v31 = vld [vmem:[#allocation6 + $0x70] sm:$0xff]  ;;  %v477_v48 = vld [vmem:[#allocation6 + $0x388] sm:$0xff] }
  0xca   :  { %v4768_v58 = vmax.f32 %v307_v52, 0.0  ;;  %772 = vmatpush.msrb.mxu2 %v437_v50  ;;  %842 = vmatpush.msra.mxu1 %v433_v51  ;;  %v1013_v47 = vld [vmem:[#allocation8 + $0x2f0] sm:$0xff]  ;;  %v493_v49 = vld [vmem:[#allocation6 + $0x408] sm:$0xff]  ;;  %v472_v52 = vld [vmem:[#allocation6 + $0x360] sm:$0xff] }
  0xcb   :  { %v4770_v60 = vmax.f32 %v264_v55, 0.0  ;;  %v356_v61 = vadd.f32 %v355_v54, %v333_v56  ;;  %v981_v50 = vld [vmem:[#allocation8 + $0x1f0] sm:$0xff]  ;;  %v1011_v51 = vld [vmem:[#allocation8 + $0x2e0] sm:$0xff]  ;;  %v488_v53 = vld [vmem:[#allocation6 + $0x3e0] sm:$0xff] }
  0xcc   :  { %603 = vmatmul.f32.vlgmr.msrb.gmra.mxu0 %v4768_v58  ;;  %773 = vmatpush.msrb.mxu2 %v432_v57  ;;  %v979_v54 = vld [vmem:[#allocation8 + $0x1e0] sm:$0xff]  ;;  %v467_v55 = vld [vmem:[#allocation6 + $0x338] sm:$0xff]  ;;  %v478_v57 = vld [vmem:[#allocation6 + $0x390] sm:$0xff] }
  0xcd   :  { %v4773_v0 = vmax.f32 %v356_v61, 0.0  ;;  %v286_v1 = vpop.f32.mrf.mxu2  ;;  %843 = vmatpush.msra.mxu1 %v428_v59  ;;  %583 = vmatmul.f32.gmra.mxu3 %v4770_v60  ;;  %v483_v56 = vld [vmem:[#allocation6 + $0x3b8] sm:$0xff]  ;;  %v457_v61 = vld [vmem:[#allocation6 + $0x2e8] sm:$0xff] }
  0xce   :  { %v287_v4 = vadd.f32 %v286_v1, %v198_v38  ;;  %652 = vmatmul.f32.gmra.mxu1 %v4770_v60  ;;  %774 = vmatpush.msrb.mxu2 %v427_v62  ;;  %v487_v38 = vld [vmem:[#allocation6 + $0x3d8] sm:$0xff]  ;;  %v1007_v1 = vld [vmem:[#allocation8 + $0x2c0] sm:$0xff] }
  0xcf   :  { %4023 = vmatmul.msk.f32.gmra.mxu2 %vm541_vm3, %v4773_v0  ;;  %844 = vmatpush.msra.mxu1 %v423_v63  ;;  %v1009_v59 = vld [vmem:[#allocation8 + $0x2d0] sm:$0xff]  ;;  %v473_v63 = vld [vmem:[#allocation6 + $0x368] sm:$0xff] }
  0xd0   :  { %v310_v7 = vadd.f32 %v4753_v24, %v287_v4  ;;  %775 = vmatpush.msrb.mxu2 %v422_v2  ;;  %4030 = vmatpush.msk.msrb.mxu0 %vm548_vm2, %v527_v3  ;;  %v523_v24 = vld [vmem:[#allocation6 + $0x4f8] sm:$0xff]  ;;  %v452_v2 = vld [vmem:[#allocation6 + $0x2c0] sm:$0xff]  ;;  %v975_v3 = vld [vmem:[#allocation8 + $0x1c0] sm:$0xff] }
  0xd1   :  { %845 = vmatpush.msra.mxu1 %v418_v5  ;;  %v977_v62 = vld [vmem:[#allocation8 + $0x1d0] sm:$0xff]  ;;  %v468_v4 = vld [vmem:[#allocation6 + $0x340] sm:$0xff] }
  0xd2   :  { %v4781_v10 = vmax.f32 %v310_v7, 0.0  ;;  %776 = vmatpush.msrb.mxu2 %v417_v6  ;;  %v1005_v5 = vld [vmem:[#allocation8 + $0x2b0] sm:$0xff] }
  0xd3   :  { %846 = vmatpush.msra.mxu1 %v413_v8  ;;  %v447_v6 = vld [vmem:[#allocation6 + $0x298] sm:$0xff] }
  0xd4   :  { %606 = vmatmul.f32.gmra.mxu0 %v4781_v10  ;;  %777 = vmatpush.msrb.mxu2 %v412_v9  ;;  %v463_v7 = vld [vmem:[#allocation6 + $0x318] sm:$0xff] }
  0xd5   :  { %847 = vmatpush.msra.mxu1 %v408_v11  ;;  %4025 = vmatmul.msk.f32.vlgmr.msrb.gmra.mxu3 %vm541_vm3, %v4761_v43  ;;  %v949_v8 = vld [vmem:[#allocation8 + $0xf0] sm:$0xff]  ;;  %v947_v11 = vld [vmem:[#allocation8 + $0xe0] sm:$0xff] }
  0xd6   :  { %741 = vmatmul.f32.vlgmr.msrb.gmra.mxu1 %v4768_v58  ;;  %778 = vmatpush.msrb.mxu2 %v407_v12  ;;  %v973_v9 = vld [vmem:[#allocation8 + $0x1b0] sm:$0xff]  ;;  %v1003_v12 = vld [vmem:[#allocation8 + $0x2a0] sm:$0xff] }
  0xd7   :  { %672 = vmatmul.f32.vlgmr.msra.gmra.mxu2 %v4768_v58  ;;  %794 = vmatpush.msrb.mxu3 %v522_v13  ;;  %v453_v13 = vld [vmem:[#allocation6 + $0x2c8] sm:$0xff] }
  0xd8   :  { %848 = vmatpush.msra.mxu1 %v403_v14  ;;  %779 = vmatpush.msrb.mxu2 %v402_v15  ;;  %v971_v14 = vld [vmem:[#allocation8 + $0x1a0] sm:$0xff]  ;;  %v945_v15 = vld [vmem:[#allocation8 + $0xd0] sm:$0xff] }
  0xd9   :  { %795 = vmatpush.msrb.mxu3 %v517_v16  ;;  %v1001_v16 = vld [vmem:[#allocation8 + $0x290] sm:$0xff] }
  0xda   :  { %849 = vmatpush.msra.mxu1 %v398_v17  ;;  %780 = vmatpush.msrb.mxu2 %v397_v18  ;;  %v448_v17 = vld [vmem:[#allocation6 + $0x2a0] sm:$0xff]  ;;  %v969_v18 = vld [vmem:[#allocation8 + $0x190] sm:$0xff] }
  0xdb   :  { %796 = vmatpush.msrb.mxu3 %v512_v19  ;;  %v943_v19 = vld [vmem:[#allocation8 + $0xc0] sm:$0xff] }
  0xdc   :  { %850 = vmatpush.msra.mxu1 %v393_v20  ;;  %718 = vmatmul.f32.vlgmr.msra.gmra.mxu0 %v4759_v39  ;;  %v999_v20 = vld [vmem:[#allocation8 + $0x280] sm:$0xff] }
  0xdd   :  { %781 = vmatpush.msrb.mxu2 %v392_v21  ;;  %797 = vmatpush.msrb.mxu3 %v507_v22  ;;  %v941_v21 = vld [vmem:[#allocation8 + $0xb0] sm:$0xff] }
  0xde   :  { %851 = vmatpush.msra.mxu1 %v388_v23  ;;  %863 = vmatpush.msra.mxu0 %v523_v24  ;;  %v997_v22 = vld [vmem:[#allocation8 + $0x270] sm:$0xff]  ;;  %v939_v23 = vld [vmem:[#allocation8 + $0xa0] sm:$0xff] }
  0xdf   :  { %4026 = vmatmul.msk.f32.gmra.mxu3 %vm541_vm3, %v4773_v0  ;;  %744 = vmatmul.f32.gmra.mxu1 %v4781_v10  ;;  %v1045_v24 = vld [vmem:[#allocation8 + $0x3f0] sm:$0xff] }
  0xe0   :  { %782 = vmatpush.msrb.mxu2 %v387_v25  ;;  %798 = vmatpush.msrb.mxu3 %v502_v26  ;;  %v965_v25 = vld [vmem:[#allocation8 + $0x170] sm:$0xff] }
  0xe1   :  { %675 = vmatmul.f32.gmra.mxu2 %v4781_v10  ;;  %852 = vmatpush.msra.mxu1 %v383_v27  ;;  %v937_v26 = vld [vmem:[#allocation8 + $0x90] sm:$0xff]  ;;  %v935_v27 = vld [vmem:[#allocation8 + $0x80] sm:$0xff] }
  0xe2   :  { %864 = vmatpush.msra.mxu0 %v518_v28  ;;  %783 = vmatpush.msrb.mxu2 %v382_v29  ;;  %v995_v28 = vld [vmem:[#allocation8 + $0x260] sm:$0xff] }
  0xe3   :  { %799 = vmatpush.msrb.mxu3 %v497_v30  ;;  %853 = vmatpush.msra.mxu1 %v378_v31  ;;  %v963_v29 = vld [vmem:[#allocation8 + $0x160] sm:$0xff]  ;;  %v993_v31 = vld [vmem:[#allocation8 + $0x250] sm:$0xff] }
  0xe4   :  { %865 = vmatpush.msra.mxu0 %v513_v32  ;;  %784 = vmatpush.msrb.mxu2 %v377_v33  ;;  %v1043_v30 = vld [vmem:[#allocation8 + $0x3e0] sm:$0xff]  ;;  %v961_v32 = vld [vmem:[#allocation8 + $0x150] sm:$0xff] }
  0xe5   :  { %800 = vmatpush.msrb.mxu3 %v492_v34  ;;  %854 = vmatpush.msra.mxu1 %v373_v35  ;;  %v1041_v33 = vld [vmem:[#allocation8 + $0x3d0] sm:$0xff]  ;;  %v991_v35 = vld [vmem:[#allocation8 + $0x240] sm:$0xff] }
  0xe6   :  { %866 = vmatpush.msra.mxu0 %v508_v36  ;;  %785 = vmatpush.msrb.mxu2 %v372_v37  ;;  %v929_v34 = vld [vmem:[#allocation8 + $0x50] sm:$0xff]  ;;  %v959_v36 = vld [vmem:[#allocation8 + $0x140] sm:$0xff] }
  0xe7   :  { %721 = vmatmul.f32.gmra.mxu0 %v4770_v60  ;;  %801 = vmatpush.msrb.mxu3 %v487_v38  ;;  %v1039_v37 = vld [vmem:[#allocation8 + $0x3c0] sm:$0xff]  ;;  %v989_v38 = vld [vmem:[#allocation8 + $0x230] sm:$0xff] }
  0xe8   :  { %855 = vmatpush.msra.mxu1 %v368_v40  ;;  %867 = vmatpush.msra.mxu0 %v503_v41  ;;  %v957_v40 = vld [vmem:[#allocation8 + $0x130] sm:$0xff] }
  0xe9   :  { %4028 = vmatmul.msk.f32.vlgmr.msra.gmra.mxu3 %vm541_vm3, %v4761_v43  ;;  %786 = vmatpush.msrb.mxu2 %v367_v42  ;;  %v1037_v41 = vld [vmem:[#allocation8 + $0x3b0] sm:$0xff] }
  0xea   :  { %856 = vmatmul.f32.vlgmr.msra.gmra.mxu1 %v4759_v39  ;;  %787 = vmatmul.f32.vlgmr.msrb.gmra.mxu2 %v4759_v39  ;;  %v462_v39 = vld [vmem:[#allocation6 + $0x310] sm:$0xff]  ;;  %v925_v42 = vld [vmem:[#allocation8 + $0x30] sm:$0xff] }
  0xeb   :  { %802 = vmatpush.msrb.mxu3 %v482_v44  ;;  %868 = vmatpush.msra.mxu0 %v498_v45  ;;  %v987_v44 = vld [vmem:[#allocation8 + $0x220] sm:$0xff] }
  0xec   :  { %4033 = vmatpush.msk.msra.mxu2 %vm548_vm2, %v528_v46  ;;  %1115 = vmatpush.msrb.mxu1 %v1013_v47  ;;  %v955_v45 = vld [vmem:[#allocation8 + $0x120] sm:$0xff] }
  0xed   :  { %803 = vmatpush.msrb.mxu3 %v477_v48  ;;  %869 = vmatpush.msra.mxu0 %v493_v49  ;;  %v1035_v46 = vld [vmem:[#allocation8 + $0x3a0] sm:$0xff]  ;;  %v985_v48 = vld [vmem:[#allocation8 + $0x210] sm:$0xff] }
  0xee   :  { %1092 = vmatpush.msrb.mxu2 %v981_v50  ;;  %1116 = vmatpush.msrb.mxu1 %v1011_v51  ;;  %v923_v47 = vld [vmem:[#allocation8 + $0x20] sm:$0xff]  ;;  %v953_v49 = vld [vmem:[#allocation8 + $0x110] sm:$0xff] }
  0xef   :  { %804 = vmatpush.msrb.mxu3 %v472_v52  ;;  %870 = vmatpush.msra.mxu0 %v488_v53  ;;  %v1033_v50 = vld [vmem:[#allocation8 + $0x390] sm:$0xff]  ;;  %v983_v52 = vld [vmem:[#allocation8 + $0x200] sm:$0xff] }
  0xf0   :  { %4031 = vmatmul.msk.f32.vlgmr.msrb.gmra.mxu0 %vm541_vm3, %v4761_v43  ;;  %1093 = vmatpush.msrb.mxu2 %v979_v54  ;;  %v921_v51 = vld [vmem:[#allocation8 + $0x10] sm:$0xff]  ;;  %v951_v53 = vld [vmem:[#allocation8 + $0x100] sm:$0xff] }
  0xf1   :  { %805 = vmatpush.msrb.mxu3 %v467_v55  ;;  %871 = vmatpush.msra.mxu0 %v483_v56  ;;  %v1031_v54 = vld [vmem:[#allocation8 + $0x380] sm:$0xff]  ;;  %v982_v55 = vld [vmem:[#allocation8 + $0x1f8] sm:$0xff] }
  0xf2   :  { %4029 = vmatmul.msk.f32.gmra.mxu3 %vm541_vm3, %v4773_v0  ;;  %859 = vmatmul.f32.gmra.mxu1 %v4770_v60  ;;  %v919_v56 = vld [vmem:[#allocation8] sm:$0xff] }
  0xf3   :  { %790 = vmatmul.f32.gmra.mxu2 %v4770_v60  ;;  %806 = vmatpush.msrb.mxu3 %v462_v39  ;;  %v458_v60 = vld [vmem:[#allocation6 + $0x2f0] sm:$0xff]  ;;  %v950_v39 = vld [vmem:[#allocation8 + $0xf8] sm:$0xff] }
  0xf4   :  { %872 = vmatpush.msra.mxu0 %v478_v57  ;;  %1117 = vmatpush.msrb.mxu1 %v1009_v59  ;;  %v1029_v57 = vld [vmem:[#allocation8 + $0x370] sm:$0xff]  ;;  %v980_v59 = vld [vmem:[#allocation8 + $0x1e8] sm:$0xff] }
  0xf5   :  { %807 = vmatpush.msrb.mxu3 %v457_v61  ;;  %1094 = vmatpush.msrb.mxu2 %v977_v62  ;;  %v948_v61 = vld [vmem:[#allocation8 + $0xe8] sm:$0xff]  ;;  %v1027_v62 = vld [vmem:[#allocation8 + $0x360] sm:$0xff] }
  0xf6   :  { %873 = vmatpush.msra.mxu0 %v473_v63  ;;  %1118 = vmatpush.msrb.mxu1 %v1007_v1  ;;  %v978_v63 = vld [vmem:[#allocation8 + $0x1d8] sm:$0xff] }
  0xf7   :  { %808 = vmatpush.msrb.mxu3 %v452_v2  ;;  %1095 = vmatpush.msrb.mxu2 %v975_v3  ;;  %v946_v1 = vld [vmem:[#allocation8 + $0xd8] sm:$0xff]  ;;  %v1025_v2 = vld [vmem:[#allocation8 + $0x350] sm:$0xff]  ;;  %v976_v3 = vld [vmem:[#allocation8 + $0x1c8] sm:$0xff] }
  0xf8   :  { %874 = vmatpush.msra.mxu0 %v468_v4  ;;  %1119 = vmatpush.msrb.mxu1 %v1005_v5  ;;  %v944_v4 = vld [vmem:[#allocation8 + $0xc8] sm:$0xff]  ;;  %v1023_v5 = vld [vmem:[#allocation8 + $0x340] sm:$0xff] }
  0xf9   :  { %4032 = vmatmul.msk.f32.gmra.mxu0 %vm541_vm3, %v4773_v0  ;;  %809 = vmatpush.msrb.mxu3 %v447_v6  ;;  %v974_v6 = vld [vmem:[#allocation8 + $0x1b8] sm:$0xff] }
  0xfa   :  { %875 = vmatpush.msra.mxu0 %v463_v7  ;;  %810 = vmatmul.f32.vlgmr.msrb.gmra.mxu3 %v4768_v58  ;;  %v942_v7 = vld [vmem:[#allocation8 + $0xb8] sm:$0xff] }
  0xfb   :  { %4034 = vmatmul.msk.f32.vlgmr.msra.gmra.mxu2 %vm541_vm3, %v4761_v43  ;;  %1069 = vmatpush.msra.mxu3 %v949_v8  ;;  %v967_v43 = vld [vmem:[#allocation8 + $0x180] sm:$0xff]  ;;  %v1021_v8 = vld [vmem:[#allocation8 + $0x330] sm:$0xff] }
  0xfc   :  { %876 = vmatpush.msra.mxu0 %v458_v60  ;;  %1096 = vmatpush.msrb.mxu2 %v973_v9  ;;  %v972_v60 = vld [vmem:[#allocation8 + $0x1a8] sm:$0xff] }
  0xfd   :  { %1070 = vmatpush.msra.mxu3 %v947_v11  ;;  %1120 = vmatpush.msrb.mxu1 %v1003_v12  ;;  %v940_v9 = vld [vmem:[#allocation8 + $0xa8] sm:$0xff]  ;;  %v1019_v11 = vld [vmem:[#allocation8 + $0x320] sm:$0xff]  ;;  %v970_v12 = vld [vmem:[#allocation8 + $0x198] sm:$0xff] }
  0xfe   :  { %877 = vmatpush.msra.mxu0 %v453_v13  ;;  %1097 = vmatpush.msrb.mxu2 %v971_v14  ;;  %v938_v13 = vld [vmem:[#allocation8 + $0x98] sm:$0xff]  ;;  %v1017_v14 = vld [vmem:[#allocation8 + $0x310] sm:$0xff] }
  0xff   :  { %1071 = vmatpush.msra.mxu3 %v945_v15  ;;  %1121 = vmatpush.msrb.mxu1 %v1001_v16  ;;  %v968_v15 = vld [vmem:[#allocation8 + $0x188] sm:$0xff]  ;;  %v1047_v16 = vld [vmem:[#allocation8 + $0x400] sm:$0xf] }
 0x100   :  { %878 = vmatpush.msra.mxu0 %v448_v17  ;;  %1098 = vmatpush.msrb.mxu2 %v969_v18  ;;  %v936_v17 = vld [vmem:[#allocation8 + $0x88] sm:$0xff]  ;;  %v1015_v18 = vld [vmem:[#allocation8 + $0x300] sm:$0xff] }
 0x101   :  { %879 = vmatmul.f32.vlgmr.msra.gmra.mxu0 %v4768_v58  ;;  %1072 = vmatpush.msra.mxu3 %v943_v19  ;;  %v933_v58 = vld [vmem:[#allocation8 + $0x70] sm:$0xff]  ;;  %v966_v19 = vld [vmem:[#allocation8 + $0x178] sm:$0xff] }
 0x102   :  { %813 = vmatmul.f32.gmra.mxu3 %v4781_v10  ;;  %1122 = vmatpush.msrb.mxu1 %v999_v20  ;;  %v4819_v20 = vld [vmem:[%s5568_s4] sm:$0x1f] }
 0x103   :  { %4035 = vmatmul.msk.f32.gmra.mxu2 %vm541_vm3, %v4773_v0  ;;  %1073 = vmatpush.msra.mxu3 %v941_v21  ;;  %v931_v0 = vld [vmem:[#allocation8 + $0x60] sm:$0xff]  ;;  %v531_v21 = vperm.slane %v4819_v20, 0 }
 0x104   :  { %1099 = vmatpush.msrb.mxu2 %v967_v43  ;;  %1123 = vmatpush.msrb.mxu1 %v997_v22  ;;  %v934_v43 = vld [vmem:[#allocation8 + $0x78] sm:$0xff] }
 0x105   :  { %1074 = vmatpush.msra.mxu3 %v939_v23  ;;  %1138 = vmatpush.msrb.mxu0 %v1045_v24  ;;  %v1046_v22 = vld [vmem:[#allocation8 + $0x3f8] sm:$0xff]  ;;  %v964_v23 = vld [vmem:[#allocation8 + $0x168] sm:$0xff] }
 0x106   :  { %1100 = vmatpush.msrb.mxu2 %v965_v25  ;;  %1124 = vmatpush.msrb.mxu1 %v995_v28  ;;  %v932_v24 = vld [vmem:[#allocation8 + $0x68] sm:$0xff] }
 0x107   :  { %1075 = vmatpush.msra.mxu3 %v937_v26  ;;  %1139 = vmatpush.msrb.mxu0 %v1043_v30  ;;  %v1044_v25 = vld [vmem:[#allocation8 + $0x3e8] sm:$0xff]  ;;  %v1042_v30 = vld [vmem:[#allocation8 + $0x3d8] sm:$0xff] }
 0x108   :  { %1101 = vmatpush.msrb.mxu2 %v963_v29  ;;  %1125 = vmatpush.msrb.mxu1 %v993_v31  ;;  %v930_v29 = vld [vmem:[#allocation8 + $0x58] sm:$0xff]  ;;  %v960_v31 = vld [vmem:[#allocation8 + $0x148] sm:$0xff] }
 0x109   :  { %882 = vmatmul.f32.gmra.mxu0 %v4781_v10  ;;  %1076 = vmatpush.msra.mxu3 %v935_v27  ;;  %v927_v10 = vld [vmem:[#allocation8 + $0x40] sm:$0xff]  ;;  %v962_v27 = vld [vmem:[#allocation8 + $0x158] sm:$0xff] }
 0x10a   :  { %1102 = vmatpush.msrb.mxu2 %v961_v32  ;;  %1140 = vmatpush.msrb.mxu0 %v1041_v33  ;;  %v928_v32 = vld [vmem:[#allocation8 + $0x48] sm:$0xff] }
 0x10b   :  { %1077 = vmatpush.msra.mxu3 %v933_v58  ;;  %1126 = vmatpush.msrb.mxu1 %v991_v35  ;;  %v958_v35 = vld [vmem:[#allocation8 + $0x138] sm:$0xff] }
 0x10c   :  { %1103 = vmatpush.msrb.mxu2 %v959_v36  ;;  %1141 = vmatpush.msrb.mxu0 %v1039_v37  ;;  %v926_v37 = vld [vmem:[#allocation8 + $0x38] sm:$0xff] }
 0x10d   :  { %1078 = vmatpush.msra.mxu3 %v931_v0  ;;  %1127 = vmatpush.msrb.mxu1 %v989_v38  ;;  %v956_v38 = vld [vmem:[#allocation8 + $0x128] sm:$0xff] }
 0x10e   :  { %1104 = vmatpush.msrb.mxu2 %v957_v40  ;;  %1142 = vmatpush.msrb.mxu0 %v1037_v41 }
 0x10f   :  { %1079 = vmatpush.msra.mxu3 %v929_v34  ;;  %1128 = vmatpush.msrb.mxu1 %v987_v44  ;;  %v1040_v34 = vld [vmem:[#allocation8 + $0x3c8] sm:$0xff] }
 0x110   :  { %1105 = vmatpush.msrb.mxu2 %v955_v45  ;;  %1143 = vmatpush.msrb.mxu0 %v1035_v46  ;;  %v924_v44 = vld [vmem:[#allocation8 + $0x28] sm:$0xff] }
 0x111   :  { %1080 = vmatpush.msra.mxu3 %v927_v10  ;;  %1129 = vmatpush.msrb.mxu1 %v985_v48  ;;  %v1038_v10 = vld [vmem:[#allocation8 + $0x3b8] sm:$0xff]  ;;  %v1036_v45 = vld [vmem:[#allocation8 + $0x3a8] sm:$0xff] }
 0x112   :  { %1106 = vmatpush.msrb.mxu2 %v953_v49  ;;  %1144 = vmatpush.msrb.mxu0 %v1033_v50  ;;  %v922_v48 = vld [vmem:[#allocation8 + $0x18] sm:$0xff] }
 0x113   :  { %1081 = vmatpush.msra.mxu3 %v925_v42  ;;  %1130 = vmatpush.msrb.mxu1 %v983_v52  ;;  %v1014_v42 = vld [vmem:[#allocation8 + $0x2f8] sm:$0xff] }
 0x114   :  { %1107 = vmatpush.msrb.mxu2 %v951_v53  ;;  %1145 = vmatpush.msrb.mxu0 %v1031_v54  ;;  %v1034_v52 = vld [vmem:[#allocation8 + $0x398] sm:$0xff]  ;;  %v952_v53 = vld [vmem:[#allocation8 + $0x108] sm:$0xff] }
 0x115   :  { %1082 = vmatpush.msra.mxu3 %v923_v47  ;;  %1207 = vmatpush.msra.mxu1 %v982_v55  ;;  %v954_v47 = vld [vmem:[#allocation8 + $0x118] sm:$0xff]  ;;  %v920_v55 = vld [vmem:[#allocation8 + $0x8] sm:$0xff] }
 0x116   :  { %1184 = vmatpush.msra.mxu2 %v950_v39  ;;  %1146 = vmatpush.msrb.mxu0 %v1029_v57  ;;  %v1010_v57 = vld [vmem:[#allocation8 + $0x2d8] sm:$0xff] }
 0x117   :  { %1083 = vmatpush.msra.mxu3 %v921_v51  ;;  %1208 = vmatpush.msra.mxu1 %v980_v59  ;;  %v1012_v51 = vld [vmem:[#allocation8 + $0x2e8] sm:$0xff]  ;;  %v532_v59 = vperm.slane %v4819_v20, 1 }
 0x118   :  { %1185 = vmatpush.msra.mxu2 %v948_v61  ;;  %1147 = vmatpush.msrb.mxu0 %v1027_v62  ;;  %v1008_v62 = vld [vmem:[#allocation8 + $0x2c8] sm:$0xff] }
 0x119   :  { %1084 = vmatpush.msra.mxu3 %v919_v56  ;;  %1209 = vmatpush.msra.mxu1 %v978_v63  ;;  %v1032_v56 = vld [vmem:[#allocation8 + $0x388] sm:$0xff]  ;;  %v1030_v63 = vld [vmem:[#allocation8 + $0x378] sm:$0xff] }
 0x11a   :  { %1186 = vmatpush.msra.mxu2 %v946_v1  ;;  %1148 = vmatpush.msrb.mxu0 %v1025_v2  ;;  %v1006_v2 = vld [vmem:[#allocation8 + $0x2b8] sm:$0xff] }
 0x11b   :  { %1210 = vmatpush.msra.mxu1 %v976_v3  ;;  %4036 = vmatpush.msk.msrb.mxu3 %vm1062_vm4, %v1047_v16  ;;  %v1028_v3 = vld [vmem:[#allocation8 + $0x368] sm:$0xff]  ;;  %v1022_v16 = vld [vmem:[#allocation8 + $0x338] sm:$0xff] }
 0x11c   :  { %1187 = vmatpush.msra.mxu2 %v944_v4  ;;  %1149 = vmatpush.msrb.mxu0 %v1023_v5  ;;  %v1026_v5 = vld [vmem:[#allocation8 + $0x358] sm:$0xff] }
 0x11d   :  { %1211 = vmatpush.msra.mxu1 %v974_v6 }
 0x11e   :  { %1188 = vmatpush.msra.mxu2 %v942_v7  ;;  %1150 = vmatpush.msrb.mxu0 %v1021_v8  ;;  %v1004_v8 = vld [vmem:[#allocation8 + $0x2a8] sm:$0xff] }
 0x11f   :  { %1212 = vmatpush.msra.mxu1 %v972_v60 }
 0x120   :  { %1189 = vmatpush.msra.mxu2 %v940_v9  ;;  %1151 = vmatpush.msrb.mxu0 %v1019_v11  ;;  %v1024_v11 = vld [vmem:[#allocation8 + $0x348] sm:$0xff] }
 0x121   :  { %1213 = vmatpush.msra.mxu1 %v970_v12 }
 0x122   :  { %1190 = vmatpush.msra.mxu2 %v938_v13  ;;  %1152 = vmatpush.msrb.mxu0 %v1017_v14  ;;  %v1002_v13 = vld [vmem:[#allocation8 + $0x298] sm:$0xff] }
 0x123   :  { %1214 = vmatpush.msra.mxu1 %v968_v15  ;;  %v1000_v15 = vld [vmem:[#allocation8 + $0x288] sm:$0xff] }
 0x124   :  { %1191 = vmatpush.msra.mxu2 %v936_v17  ;;  %1153 = vmatpush.msrb.mxu0 %v1015_v18  ;;  %v1048_v18 = vld [vmem:[#allocation8 + $0x408] sm:$0xf] }
 0x125   :  { %1215 = vmatpush.msra.mxu1 %v966_v19  ;;  %v998_v19 = vld [vmem:[#allocation8 + $0x278] sm:$0xff] }
 0x126   :  { %1253 = vmatpush.msra.mxu0 %v1046_v22  ;;  %1192 = vmatpush.msra.mxu2 %v934_v43  ;;  %v996_v43 = vld [vmem:[#allocation8 + $0x268] sm:$0xff]  ;;  %v1018_v22 = vld [vmem:[#allocation8 + $0x318] sm:$0xff] }
 0x127   :  { %1216 = vmatpush.msra.mxu1 %v964_v23 }
 0x128   :  { %1254 = vmatpush.msra.mxu0 %v1044_v25  ;;  %1193 = vmatpush.msra.mxu2 %v932_v24 }
 0x129   :  { %1217 = vmatpush.msra.mxu1 %v962_v27  ;;  %v994_v27 = vld [vmem:[#allocation8 + $0x258] sm:$0xff] }
 0x12a   :  { %1255 = vmatpush.msra.mxu0 %v1042_v30  ;;  %1194 = vmatpush.msra.mxu2 %v930_v29 }
 0x12b   :  { %1218 = vmatpush.msra.mxu1 %v960_v31 }
 0x12c   :  { %1256 = vmatpush.msra.mxu0 %v1040_v34  ;;  %1195 = vmatpush.msra.mxu2 %v928_v32 }
 0x12d   :  { %1219 = vmatpush.msra.mxu1 %v958_v35  ;;  %v988_v35 = vld [vmem:[#allocation8 + $0x228] sm:$0xff] }
 0x12e   :  { %1257 = vmatpush.msra.mxu0 %v1038_v10  ;;  %1196 = vmatpush.msra.mxu2 %v926_v37  ;;  %v986_v37 = vld [vmem:[#allocation8 + $0x218] sm:$0xff] }
 0x12f   :  { %1220 = vmatpush.msra.mxu1 %v956_v38 }
 0x130   :  { %1258 = vmatpush.msra.mxu0 %v1036_v45  ;;  %1197 = vmatpush.msra.mxu2 %v924_v44  ;;  %v984_v44 = vld [vmem:[#allocation8 + $0x208] sm:$0xff] }
 0x131   :  { %1221 = vmatpush.msra.mxu1 %v954_v47  ;;  %v1333_v47 = vld [vmem:[#allocation10 + $0xf0] sm:$0xff] }
 0x132   :  { %1198 = vmatpush.msra.mxu2 %v922_v48  ;;  %1259 = vmatpush.msra.mxu0 %v1034_v52  ;;  %v1427_v52 = vld [vmem:[#allocation10 + $0x3e0] sm:$0xff] }
 0x133   :  { %1222 = vmatpush.msra.mxu1 %v952_v53 }
 0x134   :  { %1199 = vmatpush.msra.mxu2 %v920_v55  ;;  %1260 = vmatpush.msra.mxu0 %v1032_v56  ;;  %v1327_v55 = vld [vmem:[#allocation10 + $0xc0] sm:$0xff]  ;;  %v1425_v56 = vld [vmem:[#allocation10 + $0x3d0] sm:$0xff] }
 0x136   :  { %1261 = vmatpush.msra.mxu0 %v1030_v63  ;;  %v534_v63 = vperm.slane %v4819_v20, 3 }
 0x138   :  { %1262 = vmatpush.msra.mxu0 %v1028_v3  ;;  %v1325_v3 = vld [vmem:[#allocation10 + $0xb0] sm:$0xff] }
 0x13a   :  { %1263 = vmatpush.msra.mxu0 %v1026_v5  ;;  %v1421_v5 = vld [vmem:[#allocation10 + $0x3b0] sm:$0xff] }
 0x13c   :  { %1264 = vmatpush.msra.mxu0 %v1024_v11 }
 0x13e   :  { %1265 = vmatpush.msra.mxu0 %v1022_v16 }
 0x142   :  { %v650_v40 = vpop.f32.mrf.mxu1 }
 0x143   :  { %v651_v6 = vadd.f32 %v650_v40, %v532_v59 }
 0x148   :  { %v581_v26 = vpop.f32.mrf.mxu3 }
 0x149   :  { %v582_v58 = vadd.f32 %v581_v26, %v531_v21  ;;  %v604_v28 = vpop.f32.mrf.mxu0  ;;  %v533_v26 = vperm.slane %v4819_v20, 2 }
 0x14a   :  { %v627_v0 = vpop.f32.mrf.mxu2 }
 0x14b   :  { %v605_v33 = vadd.f32 %v604_v28, %v582_v58  ;;  %v653_v7 = vpop.f32.mrf.mxu1  ;;  %v1016_v58 = vld [vmem:[#allocation8 + $0x308] sm:$0xff] }
 0x14c   :  { %v654_v24 = vadd.f32 %v653_v7, %v532_v59  ;;  %v1419_v7 = vld [vmem:[#allocation10 + $0x3a0] sm:$0xff] }
 0x14d   :  { %v628_v36 = vadd.f32 %v627_v0, %v605_v33  ;;  %v992_v0 = vld [vmem:[#allocation8 + $0x248] sm:$0xff]  ;;  %v990_v33 = vld [vmem:[#allocation8 + $0x238] sm:$0xff] }
 0x14f   :  { %v4822_v41 = vmax.f32 %v628_v36, 0.0 }
 0x150   :  { %v584_v46 = vpop.f32.mrf.mxu3 }
 0x151   :  { %v585_v49 = vadd.f32 %v584_v46, %v531_v21  ;;  %v607_v50 = vpop.f32.mrf.mxu0  ;;  %1085 = vmatmul.f32.vlgmr.msra.gmra.mxu3 %v4822_v41  ;;  %v1020_v21 = vld [vmem:[#allocation8 + $0x328] sm:$0xff] }
 0x152   :  { %v630_v54 = vpop.f32.mrf.mxu2  ;;  %1230 = vmatpush.msra.mxu3 %v1014_v42  ;;  %1266 = vmatpush.msra.mxu0 %v1020_v21  ;;  %v1317_v21 = vld [vmem:[#allocation10 + $0x70] sm:$0xff] }
 0x153   :  { %v608_v39 = vadd.f32 %v607_v50, %v585_v49  ;;  %v742_v25 = vpop.f32.mrf.mxu1  ;;  %v1331_v49 = vld [vmem:[#allocation10 + $0xe0] sm:$0xff]  ;;  %v1429_v50 = vld [vmem:[#allocation10 + $0x3f0] sm:$0xff] }
 0x154   :  { %1231 = vmatpush.msra.mxu3 %v1012_v51  ;;  %1267 = vmatpush.msra.mxu0 %v1018_v22  ;;  %v1329_v51 = vld [vmem:[#allocation10 + $0xd0] sm:$0xff] }
 0x155   :  { %v631_v61 = vadd.f32 %v630_v54, %v608_v39  ;;  %v1413_v22 = vld [vmem:[#allocation10 + $0x370] sm:$0xff] }
 0x156   :  { %1232 = vmatpush.msra.mxu3 %v1010_v57  ;;  %1268 = vmatpush.msra.mxu0 %v1016_v58 }
 0x157   :  { %v4826_v1 = vmax.f32 %v631_v61, 0.0  ;;  %v1423_v61 = vld [vmem:[#allocation10 + $0x3c0] sm:$0xff] }
 0x158   :  { %v696_v4 = vpop.f32.mrf.mxu3  ;;  %1233 = vmatpush.msra.mxu3 %v1008_v62 }
 0x159   :  { %1088 = vmatmul.f32.gmra.mxu3 %v4826_v1  ;;  %v719_v60 = vpop.f32.mrf.mxu0 }
 0x15a   :  { %v673_v9 = vpop.f32.mrf.mxu2  ;;  %1234 = vmatpush.msra.mxu3 %v1006_v2  ;;  %v720_v31 = vadd.f32 %v719_v60, %v533_v26  ;;  %v1321_v60 = vld [vmem:[#allocation10 + $0x90] sm:$0xff] }
 0x15b   :  { %v674_v12 = vadd.f32 %v673_v9, %v651_v6  ;;  %v1323_v6 = vld [vmem:[#allocation10 + $0xa0] sm:$0xff] }
 0x15c   :  { %1235 = vmatpush.msra.mxu3 %v1004_v8  ;;  %v743_v36 = vadd.f32 %v742_v25, %v720_v31  ;;  %v745_v45 = vpop.f32.mrf.mxu1  ;;  %v1397_v25 = vld [vmem:[#allocation10 + $0x2f0] sm:$0xff]  ;;  %v1363_v31 = vld [vmem:[#allocation10 + $0x1e0] sm:$0xff] }
 0x15d   :  { %v697_v14 = vadd.f32 %v696_v4, %v674_v12  ;;  %v535_v4 = vperm.slane %v4819_v20, 4  ;;  %v1417_v12 = vld [vmem:[#allocation10 + $0x390] sm:$0xff]  ;;  %v1319_v20 = vld [vmem:[#allocation10 + $0x80] sm:$0xff] }
 0x15e   :  { %1236 = vmatpush.msra.mxu3 %v1002_v13 }
 0x15f   :  { %v4829_v17 = vmax.f32 %v697_v14, 0.0 }
 0x160   :  { %1237 = vmatpush.msra.mxu3 %v1000_v15 }
 0x161   :  { %1108 = vmatmul.f32.vlgmr.msrb.gmra.mxu2 %v4829_v17 }
 0x162   :  { %v699_v23 = vpop.f32.mrf.mxu3  ;;  %4039 = vmatpush.msk.msrb.mxu2 %vm1062_vm4, %v1048_v18  ;;  %1238 = vmatpush.msra.mxu3 %v998_v19  ;;  %v1415_v18 = vld [vmem:[#allocation10 + $0x380] sm:$0xff] }
 0x164   :  { %v722_v28 = vpop.f32.mrf.mxu0  ;;  %v676_v29 = vpop.f32.mrf.mxu2  ;;  %1239 = vmatpush.msra.mxu3 %v996_v43 }
 0x165   :  { %v677_v30 = vadd.f32 %v676_v29, %v654_v24  ;;  %v723_v48 = vadd.f32 %v722_v28, %v533_v26  ;;  %v1315_v28 = vld [vmem:[#allocation10 + $0x60] sm:$0xff] }
 0x166   :  { %1240 = vmatpush.msra.mxu3 %v994_v27  ;;  %v1365_v27 = vld [vmem:[#allocation10 + $0x1f0] sm:$0xff]  ;;  %v1395_v29 = vld [vmem:[#allocation10 + $0x2e0] sm:$0xff] }
 0x167   :  { %v700_v32 = vadd.f32 %v699_v23, %v677_v30  ;;  %v746_v53 = vadd.f32 %v745_v45, %v723_v48  ;;  %v857_v62 = vpop.f32.mrf.mxu1  ;;  %v1311_v45 = vld [vmem:[#allocation10 + $0x40] sm:$0xff] }
 0x168   :  { %1241 = vmatpush.msra.mxu3 %v992_v0  ;;  %v858_v9 = vadd.f32 %v857_v62, %v535_v4  ;;  %v1403_v62 = vld [vmem:[#allocation10 + $0x320] sm:$0xff] }
 0x169   :  { %v4834_v34 = vmax.f32 %v700_v32, 0.0  ;;  %v1411_v32 = vld [vmem:[#allocation10 + $0x360] sm:$0xff] }
 0x16a   :  { %1242 = vmatpush.msra.mxu3 %v990_v33 }
 0x16b   :  { %1111 = vmatmul.f32.gmra.mxu2 %v4834_v34 }
 0x16c   :  { %v765_v10 = vpop.f32.mrf.mxu3  ;;  %1243 = vmatpush.msra.mxu3 %v988_v35 }
 0x16d   :  { %v766_v38 = vadd.f32 %v765_v10, %v743_v36  ;;  %v834_v40 = vpop.f32.mrf.mxu0  ;;  %v788_v42 = vpop.f32.mrf.mxu2  ;;  %v1393_v10 = vld [vmem:[#allocation10 + $0x2d0] sm:$0xff] }
 0x16e   :  { %1244 = vmatpush.msra.mxu3 %v986_v37  ;;  %v789_v8 = vadd.f32 %v788_v42, %v534_v63  ;;  %v1313_v37 = vld [vmem:[#allocation10 + $0x50] sm:$0xff] }
 0x16f   :  { %v4837_v46 = vmax.f32 %v766_v38, 0.0  ;;  %v860_v23 = vpop.f32.mrf.mxu1  ;;  %v1409_v42 = vld [vmem:[#allocation10 + $0x350] sm:$0xff] }
 0x170   :  { %1245 = vmatpush.msra.mxu3 %v984_v44  ;;  %v861_v30 = vadd.f32 %v860_v23, %v535_v4  ;;  %v1303_v4 = vld [vmem:[#allocation10] sm:$0xff] }
 0x171   :  { %1131 = vmatmul.f32.vlgmr.msrb.gmra.mxu1 %v4837_v46  ;;  %v1343_v23 = vld [vmem:[#allocation10 + $0x140] sm:$0xff] }
 0x172   :  { %1445 = vmatpush.msrb.mxu1 %v1333_v47  ;;  %v1391_v47 = vld [vmem:[#allocation10 + $0x2c0] sm:$0xff] }
 0x173   :  { %1200 = vmatmul.f32.vlgmr.msra.gmra.mxu2 %v4822_v41 }
 0x174   :  { %1446 = vmatpush.msrb.mxu1 %v1331_v49  ;;  %1514 = vmatpush.msra.mxu2 %v1429_v50  ;;  %v1359_v49 = vld [vmem:[#allocation10 + $0x1c0] sm:$0xff] }
 0x175   :  { %v768_v54 = vpop.f32.mrf.mxu3 }
 0x176   :  { %v769_v39 = vadd.f32 %v768_v54, %v746_v53  ;;  %v4841_v57 = vpop.f32.mrf.mxu0  ;;  %v791_v59 = vpop.f32.mrf.mxu2  ;;  %1447 = vmatpush.msrb.mxu1 %v1329_v51  ;;  %1515 = vmatpush.msra.mxu2 %v1427_v52  ;;  %v1309_v51 = vld [vmem:[#allocation10 + $0x30] sm:$0xff]  ;;  %v1407_v52 = vld [vmem:[#allocation10 + $0x340] sm:$0xff] }
 0x177   :  { %v792_v58 = vadd.f32 %v791_v59, %v534_v63  ;;  %v1357_v54 = vld [vmem:[#allocation10 + $0x1b0] sm:$0xff]  ;;  %v1387_v59 = vld [vmem:[#allocation10 + $0x2a0] sm:$0xff] }
 0x178   :  { %v4844_v2 = vmax.f32 %v769_v39, 0.0  ;;  %1448 = vmatpush.msrb.mxu1 %v1327_v55  ;;  %1516 = vmatpush.msra.mxu2 %v1425_v56  ;;  %v1389_v55 = vld [vmem:[#allocation10 + $0x2b0] sm:$0xff]  ;;  %v1307_v56 = vld [vmem:[#allocation10 + $0x20] sm:$0xff] }
 0x179   :  { %v1405_v39 = vld [vmem:[#allocation10 + $0x330] sm:$0xff] }
 0x17a   :  { %1134 = vmatmul.f32.gmra.mxu1 %v4844_v2  ;;  %1517 = vmatpush.msra.mxu2 %v1423_v61  ;;  %v1305_v61 = vld [vmem:[#allocation10 + $0x10] sm:$0xff] }
 0x17b   :  { %1449 = vmatpush.msrb.mxu1 %v1325_v3  ;;  %1203 = vmatmul.f32.gmra.mxu2 %v4826_v1  ;;  %v1353_v63 = vld [vmem:[#allocation10 + $0x190] sm:$0xff] }
 0x17c   :  { %1518 = vmatpush.msra.mxu2 %v1421_v5  ;;  %v1385_v3 = vld [vmem:[#allocation10 + $0x290] sm:$0xff] }
 0x17d   :  { %v811_v11 = vpop.f32.mrf.mxu3  ;;  %1450 = vmatpush.msrb.mxu1 %v1323_v6  ;;  %v1401_v5 = vld [vmem:[#allocation10 + $0x310] sm:$0xff]  ;;  %v1351_v6 = vld [vmem:[#allocation10 + $0x180] sm:$0xff] }
 0x17e   :  { %v812_v13 = vadd.f32 %v811_v11, %v789_v8  ;;  %v880_v14 = vpop.f32.mrf.mxu0  ;;  %v903_v15 = vpop.f32.mrf.mxu2  ;;  %1519 = vmatpush.msra.mxu2 %v1419_v7  ;;  %v1383_v7 = vld [vmem:[#allocation10 + $0x280] sm:$0xff]  ;;  %v1349_v11 = vld [vmem:[#allocation10 + $0x170] sm:$0xff] }
 0x17f   :  { %v881_v16 = vadd.f32 %v880_v14, %v858_v9  ;;  %1451 = vmatpush.msrb.mxu1 %v1321_v60  ;;  %v1431_v8 = vld [vmem:[#allocation10 + $0x400] sm:$0xf]  ;;  %v1430_v9 = vld [vmem:[#allocation10 + $0x3f8] sm:$0xff]  ;;  %v1428_v14 = vld [vmem:[#allocation10 + $0x3e8] sm:$0xff] }
 0x180   :  { %v835_v19 = vadd.f32 %v834_v40, %v812_v13  ;;  %1520 = vmatpush.msra.mxu2 %v1417_v12  ;;  %v1361_v40 = vld [vmem:[#allocation10 + $0x1d0] sm:$0xff]  ;;  %v1399_v60 = vld [vmem:[#allocation10 + $0x300] sm:$0xff]  ;;  %v1398_v13 = vld [vmem:[#allocation10 + $0x2f8] sm:$0xff] }
 0x181   :  { %v904_v43 = vadd.f32 %v903_v15, %v881_v16  ;;  %1452 = vmatpush.msrb.mxu1 %v1319_v20  ;;  %v1381_v12 = vld [vmem:[#allocation10 + $0x270] sm:$0xff]  ;;  %v1347_v15 = vld [vmem:[#allocation10 + $0x160] sm:$0xff]  ;;  %v1396_v16 = vld [vmem:[#allocation10 + $0x2e8] sm:$0xff] }
 0x182   :  { %v4849_v24 = vmax.f32 %v835_v19, 0.0  ;;  %1223 = vmatmul.f32.vlgmr.msra.gmra.mxu1 %v4829_v17  ;;  %1521 = vmatpush.msra.mxu2 %v1415_v18  ;;  %v1379_v20 = vld [vmem:[#allocation10 + $0x260] sm:$0xff]  ;;  %v1426_v18 = vld [vmem:[#allocation10 + $0x3d8] sm:$0xff]  ;;  %v1345_v19 = vld [vmem:[#allocation10 + $0x150] sm:$0xff] }
 0x183   :  { %v4852_v26 = vmax.f32 %v904_v43, 0.0  ;;  %1453 = vmatpush.msrb.mxu1 %v1317_v21  ;;  %v1377_v21 = vld [vmem:[#allocation10 + $0x250] sm:$0xff]  ;;  %v1394_v43 = vld [vmem:[#allocation10 + $0x2d8] sm:$0xff] }
 0x184   :  { %1154 = vmatmul.f32.vlgmr.msrb.gmra.mxu0 %v4849_v24  ;;  %1522 = vmatpush.msra.mxu2 %v1413_v22  ;;  %v1424_v22 = vld [vmem:[#allocation10 + $0x3c8] sm:$0xff] }
 0x185   :  { %4037 = vmatmul.msk.f32.vlgmr.msrb.gmra.mxu3 %vm1055_vm5, %v4852_v26  ;;  %1491 = vmatpush.msrb.mxu0 %v1397_v25  ;;  %v814_v0 = vpop.f32.mrf.mxu3  ;;  %v1375_v25 = vld [vmem:[#allocation10 + $0x240] sm:$0xff] }
 0x186   :  { %1468 = vmatpush.msrb.mxu3 %v1365_v27  ;;  %v815_v33 = vadd.f32 %v814_v0, %v792_v58  ;;  %v883_v35 = vpop.f32.mrf.mxu0  ;;  %4040 = vmatmul.msk.f32.vlgmr.msrb.gmra.mxu2 %vm1055_vm5, %v4852_v26  ;;  %v906_v36 = vpop.f32.mrf.mxu2  ;;  %v1392_v27 = vld [vmem:[#allocation10 + $0x2c8] sm:$0xff]  ;;  %v1422_v58 = vld [vmem:[#allocation10 + $0x3b8] sm:$0xff] }
 0x187   :  { %v884_v38 = vadd.f32 %v883_v35, %v861_v30  ;;  %1454 = vmatpush.msrb.mxu1 %v1315_v28  ;;  %1492 = vmatpush.msrb.mxu0 %v1395_v29  ;;  %v1341_v28 = vld [vmem:[#allocation10 + $0x130] sm:$0xff]  ;;  %v1390_v30 = vld [vmem:[#allocation10 + $0x2b8] sm:$0xff]  ;;  %v1420_v0 = vld [vmem:[#allocation10 + $0x3a8] sm:$0xff] }
 0x188   :  { %v838_v44 = vadd.f32 %v4841_v57, %v815_v33  ;;  %1469 = vmatpush.msrb.mxu3 %v1363_v31  ;;  %1523 = vmatpush.msra.mxu2 %v1411_v32  ;;  %v1355_v57 = vld [vmem:[#allocation10 + $0x1a0] sm:$0xff]  ;;  %v1373_v29 = vld [vmem:[#allocation10 + $0x230] sm:$0xff]  ;;  %v1388_v33 = vld [vmem:[#allocation10 + $0x2a8] sm:$0xff] }
 0x189   :  { %v907_v48 = vadd.f32 %v906_v36, %v884_v38  ;;  %1455 = vmatpush.msrb.mxu1 %v1313_v37  ;;  %1493 = vmatpush.msrb.mxu0 %v1393_v10  ;;  %v1339_v31 = vld [vmem:[#allocation10 + $0x120] sm:$0xff]  ;;  %v1418_v35 = vld [vmem:[#allocation10 + $0x398] sm:$0xff]  ;;  %v1337_v36 = vld [vmem:[#allocation10 + $0x110] sm:$0xff] }
 0x18a   :  { %v4860_v50 = vmax.f32 %v838_v44, 0.0  ;;  %1470 = vmatpush.msrb.mxu3 %v1361_v40  ;;  %1524 = vmatpush.msra.mxu2 %v1409_v42  ;;  %v1371_v32 = vld [vmem:[#allocation10 + $0x220] sm:$0xff]  ;;  %v1369_v37 = vld [vmem:[#allocation10 + $0x210] sm:$0xff]  ;;  %v1386_v10 = vld [vmem:[#allocation10 + $0x298] sm:$0xff] }
 0x18b   :  { %v4862_v53 = vmax.f32 %v907_v48, 0.0  ;;  %1456 = vmatpush.msrb.mxu1 %v1311_v45  ;;  %1494 = vmatpush.msrb.mxu0 %v1391_v47  ;;  %v1416_v38 = vld [vmem:[#allocation10 + $0x388] sm:$0xff]  ;;  %v1335_v40 = vld [vmem:[#allocation10 + $0x100] sm:$0xff]  ;;  %v1334_v45 = vld [vmem:[#allocation10 + $0xf8] sm:$0xff] }
 0x18c   :  { %1226 = vmatmul.f32.gmra.mxu1 %v4834_v34  ;;  %1471 = vmatpush.msrb.mxu3 %v1359_v49  ;;  %v1367_v42 = vld [vmem:[#allocation10 + $0x200] sm:$0xff]  ;;  %v1384_v44 = vld [vmem:[#allocation10 + $0x288] sm:$0xff]  ;;  %v1366_v47 = vld [vmem:[#allocation10 + $0x1f8] sm:$0xff] }
 0x18d   :  { %1457 = vmatpush.msrb.mxu1 %v1309_v51  ;;  %1525 = vmatpush.msra.mxu2 %v1407_v52  ;;  %v1414_v48 = vld [vmem:[#allocation10 + $0x378] sm:$0xff]  ;;  %v1332_v51 = vld [vmem:[#allocation10 + $0xe8] sm:$0xff] }
 0x18e   :  { %1157 = vmatmul.f32.gmra.mxu0 %v4860_v50  ;;  %4038 = vmatmul.msk.f32.gmra.mxu3 %vm1055_vm5, %v4862_v53  ;;  %v1382_v49 = vld [vmem:[#allocation10 + $0x278] sm:$0xff]  ;;  %v1364_v52 = vld [vmem:[#allocation10 + $0x1e8] sm:$0xff] }
 0x18f   :  { %1472 = vmatpush.msrb.mxu3 %v1357_v54  ;;  %1495 = vmatpush.msrb.mxu0 %v1389_v55  ;;  %v1412_v54 = vld [vmem:[#allocation10 + $0x368] sm:$0xff] }
 0x190   :  { %4041 = vmatmul.msk.f32.gmra.mxu2 %vm1055_vm5, %v4862_v53  ;;  %1458 = vmatpush.msrb.mxu1 %v1307_v56  ;;  %v1380_v55 = vld [vmem:[#allocation10 + $0x268] sm:$0xff]  ;;  %v1330_v56 = vld [vmem:[#allocation10 + $0xd8] sm:$0xff] }
 0x191   :  { %1526 = vmatpush.msra.mxu2 %v1405_v39  ;;  %1473 = vmatpush.msrb.mxu3 %v1355_v57  ;;  %v1362_v39 = vld [vmem:[#allocation10 + $0x1d8] sm:$0xff] }
 0x192   :  { %1496 = vmatpush.msrb.mxu0 %v1387_v59  ;;  %1459 = vmatpush.msrb.mxu1 %v1305_v61  ;;  %v1410_v57 = vld [vmem:[#allocation10 + $0x358] sm:$0xff]  ;;  %v1328_v61 = vld [vmem:[#allocation10 + $0xc8] sm:$0xff] }
 0x193   :  { %1527 = vmatpush.msra.mxu2 %v1403_v62  ;;  %1474 = vmatpush.msrb.mxu3 %v1353_v63  ;;  %v1378_v59 = vld [vmem:[#allocation10 + $0x258] sm:$0xff]  ;;  %v1360_v62 = vld [vmem:[#allocation10 + $0x1c8] sm:$0xff] }
 0x194   :  { %1497 = vmatpush.msrb.mxu0 %v1385_v3  ;;  %1460 = vmatpush.msrb.mxu1 %v1303_v4  ;;  %v1408_v63 = vld [vmem:[#allocation10 + $0x348] sm:$0xff]  ;;  %v1326_v4 = vld [vmem:[#allocation10 + $0xb8] sm:$0xff] }
 0x195   :  { %1528 = vmatpush.msra.mxu2 %v1401_v5  ;;  %1461 = vmatmul.f32.vlgmr.msrb.gmra.mxu1 %v4822_v41  ;;  %v1376_v3 = vld [vmem:[#allocation10 + $0x248] sm:$0xff]  ;;  %v1358_v5 = vld [vmem:[#allocation10 + $0x1b8] sm:$0xff] }
 0x196   :  { %1475 = vmatpush.msrb.mxu3 %v1351_v6  ;;  %1498 = vmatpush.msrb.mxu0 %v1383_v7  ;;  %v1406_v6 = vld [vmem:[#allocation10 + $0x338] sm:$0xff] }
 0x197   :  { %4042 = vmatpush.msk.msra.mxu1 %vm1062_vm4, %v1431_v8  ;;  %1529 = vmatpush.msra.mxu2 %v1399_v60  ;;  %v1374_v7 = vld [vmem:[#allocation10 + $0x238] sm:$0xff]  ;;  %v1324_v8 = vld [vmem:[#allocation10 + $0xa8] sm:$0xff] }
 0x198   :  { %1246 = vmatmul.f32.vlgmr.msra.gmra.mxu3 %v4837_v46  ;;  %1269 = vmatmul.f32.vlgmr.msra.gmra.mxu0 %v4849_v24  ;;  %v1356_v60 = vld [vmem:[#allocation10 + $0x1a8] sm:$0xff] }
 0x199   :  { %1629 = vmatpush.msrb.mxu1 %v1430_v9  ;;  %1476 = vmatpush.msrb.mxu3 %v1349_v11  ;;  %v1404_v9 = vld [vmem:[#allocation10 + $0x328] sm:$0xff] }
 0x19a   :  { %1499 = vmatpush.msrb.mxu0 %v1381_v12  ;;  %1606 = vmatpush.msrb.mxu2 %v1398_v13  ;;  %v1372_v11 = vld [vmem:[#allocation10 + $0x228] sm:$0xff]  ;;  %v1322_v12 = vld [vmem:[#allocation10 + $0x98] sm:$0xff] }
 0x19b   :  { %1530 = vmatmul.f32.vlgmr.msra.gmra.mxu2 %v4849_v24  ;;  %1630 = vmatpush.msrb.mxu1 %v1428_v14  ;;  %v1354_v13 = vld [vmem:[#allocation10 + $0x198] sm:$0xff] }
 0x19c   :  { %1477 = vmatpush.msrb.mxu3 %v1347_v15  ;;  %1500 = vmatpush.msrb.mxu0 %v1379_v20  ;;  %v1402_v14 = vld [vmem:[#allocation10 + $0x318] sm:$0xff]  ;;  %v1320_v20 = vld [vmem:[#allocation10 + $0x88] sm:$0xff] }
 0x19d   :  { %1607 = vmatpush.msrb.mxu2 %v1396_v16  ;;  %1631 = vmatpush.msrb.mxu1 %v1426_v18  ;;  %v1370_v15 = vld [vmem:[#allocation10 + $0x218] sm:$0xff]  ;;  %v1352_v16 = vld [vmem:[#allocation10 + $0x188] sm:$0xff] }
 0x19e   :  { %1478 = vmatpush.msrb.mxu3 %v1345_v19  ;;  %1501 = vmatpush.msrb.mxu0 %v1377_v21  ;;  %v1400_v18 = vld [vmem:[#allocation10 + $0x308] sm:$0xff]  ;;  %v1318_v21 = vld [vmem:[#allocation10 + $0x78] sm:$0xff] }
 0x19f   :  { %1608 = vmatpush.msrb.mxu2 %v1394_v43  ;;  %1632 = vmatpush.msrb.mxu1 %v1424_v22  ;;  %v1368_v19 = vld [vmem:[#allocation10 + $0x208] sm:$0xff]  ;;  %v1350_v43 = vld [vmem:[#allocation10 + $0x178] sm:$0xff] }
 0x1a0   :  { %1464 = vmatmul.f32.gmra.mxu1 %v4826_v1  ;;  %1479 = vmatpush.msrb.mxu3 %v1343_v23  ;;  %v1316_v22 = vld [vmem:[#allocation10 + $0x68] sm:$0xff] }
 0x1a1   :  { %1502 = vmatpush.msrb.mxu0 %v1375_v25  ;;  %1609 = vmatpush.msrb.mxu2 %v1392_v27  ;;  %v1348_v23 = vld [vmem:[#allocation10 + $0x168] sm:$0xff]  ;;  %v4891_v25 = vld [vmem:[%s5571_s7 + $0x70] sm:$0xff]  ;;  %v4896_v27 = vld [vmem:[%s5571_s7 + $0x78] sm:$0xff] }
 0x1a2   :  { %1633 = vmatpush.msrb.mxu1 %v1422_v58  ;;  %1249 = vmatmul.f32.gmra.mxu3 %v4844_v2  ;;  %v1314_v58 = vld [vmem:[#allocation10 + $0x58] sm:$0xff] }
 0x1a3   :  { %1272 = vmatmul.f32.gmra.mxu0 %v4860_v50  ;;  %1480 = vmatpush.msrb.mxu3 %v1341_v28  ;;  %v1346_v28 = vld [vmem:[#allocation10 + $0x158] sm:$0xff] }
 0x1a4   :  { %1503 = vmatpush.msrb.mxu0 %v1373_v29  ;;  %1610 = vmatpush.msrb.mxu2 %v1390_v30  ;;  %v1312_v29 = vld [vmem:[#allocation10 + $0x48] sm:$0xff] }
 0x1a5   :  { %1533 = vmatmul.f32.gmra.mxu2 %v4860_v50  ;;  %1634 = vmatpush.msrb.mxu1 %v1420_v0  ;;  %v1344_v30 = vld [vmem:[#allocation10 + $0x148] sm:$0xff]  ;;  %v1310_v0 = vld [vmem:[#allocation10 + $0x38] sm:$0xff] }
 0x1a6   :  { %1481 = vmatpush.msrb.mxu3 %v1339_v31  ;;  %1504 = vmatpush.msrb.mxu0 %v1371_v32  ;;  %v1342_v31 = vld [vmem:[#allocation10 + $0x138] sm:$0xff]  ;;  %v1308_v32 = vld [vmem:[#allocation10 + $0x28] sm:$0xff] }
 0x1a7   :  { %1611 = vmatpush.msrb.mxu2 %v1388_v33  ;;  %1635 = vmatpush.msrb.mxu1 %v1418_v35  ;;  %v1340_v33 = vld [vmem:[#allocation10 + $0x128] sm:$0xff] }
 0x1a8   :  { %1482 = vmatpush.msrb.mxu3 %v1337_v36  ;;  %1505 = vmatpush.msrb.mxu0 %v1369_v37  ;;  %v4917_v35 = vld [vmem:[%s5571_s7 + $0x40] sm:$0xff]  ;;  %v4922_v36 = vld [vmem:[%s5571_s7 + $0x68] sm:$0xff]  ;;  %v1306_v37 = vld [vmem:[#allocation10 + $0x18] sm:$0xff] }
 0x1a9   :  { %1612 = vmatpush.msrb.mxu2 %v1386_v10  ;;  %1636 = vmatpush.msrb.mxu1 %v1416_v38  ;;  %v1338_v10 = vld [vmem:[#allocation10 + $0x118] sm:$0xff]  ;;  %v4934_v38 = vld [vmem:[%s5571_s7 + $0x58] sm:$0xff] }
 0x1aa   :  { %1483 = vmatpush.msrb.mxu3 %v1335_v40  ;;  %1506 = vmatpush.msrb.mxu0 %v1367_v42  ;;  %v1304_v40 = vld [vmem:[#allocation10 + $0x8] sm:$0xff] }
 0x1ab   :  { %4043 = vmatmul.msk.f32.vlgmr.msra.gmra.mxu1 %vm1055_vm5, %v4852_v26  ;;  %1613 = vmatpush.msrb.mxu2 %v1384_v44  ;;  %v1336_v42 = vld [vmem:[#allocation10 + $0x108] sm:$0xff] }
 0x1ac   :  { %1560 = vmatpush.msra.mxu3 %v1334_v45  ;;  %1583 = vmatpush.msra.mxu0 %v1366_v47  ;;  %v1432_v44 = vld [vmem:[#allocation10 + $0x408] sm:$0xf]  ;;  %v4948_v45 = vld [vmem:[%s5571_s7 + $0x48] sm:$0xff]  ;;  %v4957_v47 = vld [vmem:[%s5571_s7 + $0x38] sm:$0xff] }
 0x1ad   :  { %1637 = vmatpush.msrb.mxu1 %v1414_v48  ;;  %1484 = vmatmul.f32.vlgmr.msrb.gmra.mxu3 %v4829_v17  ;;  %v4962_v48 = vld [vmem:[%s5571_s7 + $0x10] sm:$0xff] }
 0x1ae   :  { %1507 = vmatmul.f32.vlgmr.msrb.gmra.mxu0 %v4837_v46  ;;  %1614 = vmatpush.msrb.mxu2 %v1382_v49  ;;  %v4986_v49 = vld [vmem:[%s5571_s7 + $0x18] sm:$0xff] }
 0x1af   :  { %1561 = vmatpush.msra.mxu3 %v1332_v51  ;;  %1584 = vmatpush.msra.mxu0 %v1364_v52  ;;  %v4996_v51 = vld [vmem:[%s5571_s7 + $0x8] sm:$0xff] }
 0x1b0   :  { %1638 = vmatpush.msrb.mxu1 %v1412_v54  ;;  %1615 = vmatpush.msrb.mxu2 %v1380_v55 }
 0x1b1   :  { %1562 = vmatpush.msra.mxu3 %v1330_v56  ;;  %1585 = vmatpush.msra.mxu0 %v1362_v39 }
 0x1b2   :  { %1639 = vmatpush.msrb.mxu1 %v1410_v57  ;;  %1616 = vmatpush.msrb.mxu2 %v1378_v59 }
 0x1b3   :  { %1563 = vmatpush.msra.mxu3 %v1328_v61  ;;  %1586 = vmatpush.msra.mxu0 %v1360_v62 }
 0x1b4   :  { %1640 = vmatpush.msrb.mxu1 %v1408_v63  ;;  %1617 = vmatpush.msrb.mxu2 %v1376_v3 }
 0x1b5   :  { %4044 = vmatmul.msk.f32.gmra.mxu1 %vm1055_vm5, %v4862_v53  ;;  %1564 = vmatpush.msra.mxu3 %v1326_v4 }
 0x1b6   :  { %1587 = vmatpush.msra.mxu0 %v1358_v5  ;;  %1641 = vmatpush.msrb.mxu1 %v1406_v6 }
 0x1b7   :  { %1487 = vmatmul.f32.gmra.mxu3 %v4834_v34  ;;  %1510 = vmatmul.f32.gmra.mxu0 %v4844_v2 }
 0x1b8   :  { %1618 = vmatpush.msrb.mxu2 %v1374_v7  ;;  %1565 = vmatpush.msra.mxu3 %v1324_v8 }
 0x1b9   :  { %1588 = vmatpush.msra.mxu0 %v1356_v60  ;;  %1642 = vmatpush.msrb.mxu1 %v1404_v9 }
 0x1ba   :  { %1619 = vmatpush.msrb.mxu2 %v1372_v11  ;;  %1566 = vmatpush.msra.mxu3 %v1322_v12 }
 0x1bb   :  { %1589 = vmatpush.msra.mxu0 %v1354_v13  ;;  %1643 = vmatpush.msrb.mxu1 %v1402_v14 }
 0x1bc   :  { %1620 = vmatpush.msrb.mxu2 %v1370_v15  ;;  %1567 = vmatpush.msra.mxu3 %v1320_v20 }
 0x1bd   :  { %1590 = vmatpush.msra.mxu0 %v1352_v16  ;;  %1644 = vmatpush.msrb.mxu1 %v1400_v18 }
 0x1be   :  { %1621 = vmatpush.msrb.mxu2 %v1368_v19  ;;  %1645 = vmatmul.f32.vlgmr.msrb.gmra.mxu1 %v4849_v24  ;;  %v4903_v24 = vld [vmem:[%s5571_s7 + $0x60] sm:$0xff] }
 0x1bf   :  { %1568 = vmatpush.msra.mxu3 %v1318_v21  ;;  %1591 = vmatpush.msra.mxu0 %v1350_v43 }
 0x1c0   :  { %1622 = vmatmul.f32.vlgmr.msrb.gmra.mxu2 %v4837_v46  ;;  %1830 = vmatpush.msra.mxu1 %v4891_v25  ;;  %v4910_v46 = vld [vmem:[%s5571_s7 + $0x50] sm:$0xff] }
 0x1c1   :  { %1569 = vmatpush.msra.mxu3 %v1316_v22  ;;  %1592 = vmatpush.msra.mxu0 %v1348_v23 }
 0x1c2   :  { %1739 = vmatpush.msra.mxu2 %v4896_v27  ;;  %1831 = vmatpush.msra.mxu1 %v4903_v24 }
 0x1c3   :  { %1570 = vmatpush.msra.mxu3 %v1314_v58  ;;  %1593 = vmatpush.msra.mxu0 %v1346_v28 }
 0x1c4   :  { %1832 = vmatpush.msra.mxu1 %v4910_v46  ;;  %1740 = vmatpush.msra.mxu2 %v4922_v36 }
 0x1c5   :  { %1571 = vmatpush.msra.mxu3 %v1312_v29  ;;  %1594 = vmatpush.msra.mxu0 %v1344_v30 }
 0x1c6   :  { %1648 = vmatmul.f32.gmra.mxu1 %v4860_v50  ;;  %v4929_v50 = vld [vmem:[%s5571_s7 + $0x30] sm:$0xff]  ;;  %1741 = vmatpush.msra.mxu2 %v4934_v38 }
 0x1c7   :  { %1572 = vmatpush.msra.mxu3 %v1310_v0  ;;  %1595 = vmatpush.msra.mxu0 %v1342_v31 }
 0x1c8   :  { %1625 = vmatmul.f32.gmra.mxu2 %v4844_v2  ;;  %1833 = vmatpush.msra.mxu1 %v4917_v35  ;;  %v4941_v2 = vld [vmem:[%s5571_s7 + $0x20] sm:$0xff] }
 0x1c9   :  { %1573 = vmatpush.msra.mxu3 %v1308_v32  ;;  %1596 = vmatpush.msra.mxu0 %v1340_v33  ;;  %v1433_v33 = vld [vmem:[%s5573_s9] sm:$0x3]  ;;  %s4444_s9 = smov 64  }
 0x1ca   :  { %1834 = vmatpush.msra.mxu1 %v4929_v50  ;;  %1742 = vmatpush.msra.mxu2 %v4948_v45 }
 0x1cb   :  { %1574 = vmatpush.msra.mxu3 %v1306_v37  ;;  %1597 = vmatpush.msra.mxu0 %v1338_v10 }
 0x1cc   :  { %1835 = vmatpush.msra.mxu1 %v4941_v2  ;;  %1743 = vmatpush.msra.mxu2 %v4957_v47 }
 0x1cd   :  { %1575 = vmatpush.msra.mxu3 %v1304_v40  ;;  %1598 = vmatpush.msra.mxu0 %v1336_v42  ;;  %v1435_v42 = vperm.slane %v1433_v33, 0 }
 0x1ce   :  { %1576 = vmatmul.f32.vlgmr.msra.gmra.mxu3 %v4822_v41  ;;  %1599 = vmatmul.f32.vlgmr.msra.gmra.mxu0 %v4829_v17  ;;  %v4970_v41 = vld [vmem:[%s5571_s7 + $0x28] sm:$0xff]  ;;  %v4976_v17 = vld [vmem:[%s5571_s7] sm:$0xff] }
 0x1cf   :  { %4045 = vmatpush.msk.msrb.mxu3 %vm1062_vm4, %v1432_v44  ;;  %1719 = vmatpush.msrb.mxu0 %v4891_v25 }
 0x1d0   :  { %1836 = vmatpush.msra.mxu1 %v4962_v48  ;;  %1744 = vmatpush.msra.mxu2 %v4970_v41 }
 0x1d1   :  { %1850 = vmatpush.msra.mxu3 %v4896_v27  ;;  %1720 = vmatpush.msrb.mxu0 %v4903_v24 }
 0x1d2   :  { %1837 = vmatpush.msra.mxu1 %v4976_v17  ;;  %1745 = vmatpush.msra.mxu2 %v4986_v49 }
 0x1d3   :  { %1851 = vmatpush.msra.mxu3 %v4922_v36  ;;  %1721 = vmatpush.msrb.mxu0 %v4910_v46 }
 0x1d4   :  { %2076 = vmatpush.msrb.mxu1 %v4891_v25  ;;  %1746 = vmatpush.msra.mxu2 %v4996_v51 }
 0x1d5   :  { %1852 = vmatpush.msra.mxu3 %v4934_v38  ;;  %1722 = vmatpush.msrb.mxu0 %v4917_v35 }
 0x1d6   :  { %1579 = vmatmul.f32.gmra.mxu3 %v4826_v1  ;;  %1602 = vmatmul.f32.gmra.mxu0 %v4834_v34  ;;  %v4443_v1 = vmov 0.0   ;;  %v1086_v34 = vpop.f32.mrf.mxu3 }
 0x1d7   :  { %1723 = vmatpush.msrb.mxu0 %v4929_v50  ;;  %1853 = vmatpush.msra.mxu3 %v4948_v45 }
 0x1d8   :  { %2077 = vmatpush.msrb.mxu1 %v4903_v24  ;;  %1747 = vmatmul.f32.vlgmr.msra.gmra.mxu2 %v4443_v1 }
 0x1d9   :  { %1724 = vmatpush.msrb.mxu0 %v4941_v2  ;;  %1854 = vmatpush.msra.mxu3 %v4957_v47 }
 0x1da   :  { %1973 = vmatpush.msrb.mxu2 %v4896_v27  ;;  %2078 = vmatpush.msrb.mxu1 %v4910_v46 }
 0x1db   :  { %1725 = vmatpush.msrb.mxu0 %v4962_v48  ;;  %1855 = vmatpush.msra.mxu3 %v4970_v41 }
 0x1dc   :  { %1974 = vmatpush.msrb.mxu2 %v4922_v36  ;;  %2079 = vmatpush.msrb.mxu1 %v4917_v35 }
 0x1dd   :  { %1726 = vmatpush.msrb.mxu0 %v4976_v17  ;;  %1856 = vmatpush.msra.mxu3 %v4986_v49 }
 0x1de   :  { %4046 = vmatmul.msk.f32.vlgmr.msrb.gmra.mxu3 %vm1055_vm5, %v4852_v26  ;;  %1727 = vmatmul.f32.vlgmr.msrb.gmra.mxu0 %v4443_v1  ;;  %v1089_v55 = vpop.f32.mrf.mxu3 }
 0x1df   :  { %1953 = vmatpush.msra.mxu0 %v4891_v25  ;;  %1975 = vmatpush.msrb.mxu2 %v4934_v38 }
 0x1e0   :  { %1857 = vmatpush.msra.mxu3 %v4996_v51  ;;  %2080 = vmatpush.msrb.mxu1 %v4929_v50 }
 0x1e1   :  { %1954 = vmatpush.msra.mxu0 %v4903_v24  ;;  %1976 = vmatpush.msrb.mxu2 %v4948_v45 }
 0x1e2   :  { %2096 = vmatpush.msrb.mxu3 %v4896_v27  ;;  %2081 = vmatpush.msrb.mxu1 %v4941_v2 }
 0x1e3   :  { %1955 = vmatpush.msra.mxu0 %v4910_v46  ;;  %1977 = vmatpush.msrb.mxu2 %v4957_v47 }
 0x1e4   :  { %2097 = vmatpush.msrb.mxu3 %v4922_v36  ;;  %2082 = vmatpush.msrb.mxu1 %v4962_v48  ;;  %v1109_v26 = vpop.f32.mrf.mxu2 }
 0x1e5   :  { %1956 = vmatpush.msra.mxu0 %v4917_v35  ;;  %1978 = vmatpush.msrb.mxu2 %v4970_v41 }
 0x1e6   :  { %4047 = vmatmul.msk.f32.gmra.mxu3 %vm1055_vm5, %v4862_v53  ;;  %2083 = vmatpush.msrb.mxu1 %v4976_v17  ;;  %v1049_v53 = vld [vmem:[%s5572_s8] sm:$0x3]  ;;  %s4445_s8 = smov 96  }
 0x1e7   :  { %1957 = vmatpush.msra.mxu0 %v4929_v50  ;;  %2098 = vmatpush.msrb.mxu3 %v4934_v38  ;;  %v1051_v54 = vperm.slane %v1049_v53, 0  ;;  %v1052_v14 = vperm.slane %v1049_v53, 1 }
 0x1e8   :  { %1979 = vmatpush.msrb.mxu2 %v4986_v49 }
 0x1e9   :  { %1958 = vmatpush.msra.mxu0 %v4941_v2  ;;  %2099 = vmatpush.msrb.mxu3 %v4948_v45  ;;  %v1087_v56 = vadd.f32 %v1086_v34, %v1051_v54  ;;  %v1090_v5 = vadd.f32 %v1089_v55, %v1051_v54 }
 0x1ea   :  { %1980 = vmatpush.msrb.mxu2 %v4996_v51 }
 0x1eb   :  { %1959 = vmatpush.msra.mxu0 %v4962_v48  ;;  %2100 = vmatpush.msrb.mxu3 %v4957_v47  ;;  %v1110_v57 = vadd.f32 %v1109_v26, %v1087_v56 }
 0x1ec   :  { %2219 = vmatpush.msra.mxu2 %v4896_v27 }
 0x1ed   :  { %1960 = vmatpush.msra.mxu0 %v4976_v17  ;;  %2101 = vmatpush.msrb.mxu3 %v4970_v41 }
 0x1ee   :  { %2220 = vmatpush.msra.mxu2 %v4922_v36  ;;  %v1132_v52 = vpop.f32.mrf.mxu1  ;;  %v1112_v39 = vpop.f32.mrf.mxu2 }
 0x1ef   :  { %2199 = vmatpush.msrb.mxu0 %v4891_v25  ;;  %2102 = vmatpush.msrb.mxu3 %v4986_v49  ;;  %v1133_v62 = vadd.f32 %v1132_v52, %v1110_v57  ;;  %v1113_v7 = vadd.f32 %v1112_v39, %v1090_v5 }
 0x1f0   :  { %2221 = vmatpush.msra.mxu2 %v4934_v38 }
 0x1f1   :  { %2200 = vmatpush.msrb.mxu0 %v4903_v24  ;;  %2103 = vmatpush.msrb.mxu3 %v4996_v51 }
 0x1f2   :  { %2222 = vmatpush.msra.mxu2 %v4948_v45 }
 0x1f3   :  { %2201 = vmatpush.msrb.mxu0 %v4910_v46 }
 0x1f4   :  { %2223 = vmatpush.msra.mxu2 %v4957_v47 }
 0x1f5   :  { %2202 = vmatpush.msrb.mxu0 %v4917_v35 }
 0x1f6   :  { %2224 = vmatpush.msra.mxu2 %v4970_v41  ;;  %v1201_v6 = vpop.f32.mrf.mxu2 }
 0x1f7   :  { %2203 = vmatpush.msrb.mxu0 %v4929_v50  ;;  %v1135_v61 = vpop.f32.mrf.mxu1  ;;  %v1202_v20 = vadd.f32 %v1201_v6, %v1052_v14 }
 0x1f8   :  { %2225 = vmatpush.msra.mxu2 %v4986_v49  ;;  %v1136_v60 = vadd.f32 %v1135_v61, %v1113_v7 }
 0x1f9   :  { %2204 = vmatpush.msrb.mxu0 %v4941_v2 }
 0x1fa   :  { %2226 = vmatpush.msra.mxu2 %v4996_v51 }
 0x1fb   :  { %2205 = vmatpush.msrb.mxu0 %v4962_v48 }
 0x1fd   :  { %2206 = vmatpush.msrb.mxu0 %v4976_v17 }
 0x1fe   :  { %v1204_v15 = vpop.f32.mrf.mxu2 }
 0x1ff   :  { %v1224_v9 = vpop.f32.mrf.mxu1  ;;  %v1205_v28 = vadd.f32 %v1204_v15, %v1052_v14 }
 0x200   :  { %v1225_v18 = vadd.f32 %v1224_v9, %v1202_v20 }
 0x201   :  { %v1155_v59 = vpop.f32.mrf.mxu0 }
 0x202   :  { %v1156_v63 = vadd.f32 %v1155_v59, %v1133_v62 }
 0x208   :  { %v1178_v3 = vpop.f32.mrf.mxu3 }
 0x209   :  { %v1179_v4 = vadd.f32 %v1178_v3, %v1156_v63  ;;  %v1227_v16 = vpop.f32.mrf.mxu1  ;;  %v1293_v23 = vpop.f32.mrf.mxu2 }
 0x20a   :  { %v1228_v30 = vadd.f32 %v1227_v16, %v1205_v28 }
 0x20b   :  { %1299 = vst [vmem:[#allocation4 + $0x10] sm:$0xff] %v1179_v4  ;;  %v1158_v8 = vpop.f32.mrf.mxu0 }
 0x20c   :  { %v1159_v11 = vadd.f32 %v1158_v8, %v1136_v60  ;;  %v1436_v60 = vperm.slane %v1433_v33, 1 }
 0x211   :  { %v1181_v12 = vpop.f32.mrf.mxu3 }
 0x212   :  { %v1182_v13 = vadd.f32 %v1181_v12, %v1159_v11  ;;  %v1462_v29 = vpop.f32.mrf.mxu1 }
 0x213   :  { %v1296_v10 = vpop.f32.mrf.mxu2  ;;  %v1463_v34 = vadd.f32 %v1462_v29, %v1435_v42 }
 0x214   :  { %1301 = vst [vmem:[#allocation4 + $0x18] sm:$0xff] %v1182_v13 }
 0x215   :  { %v1270_v43 = vpop.f32.mrf.mxu0 }
 0x21b   :  { %v1247_v19 = vpop.f32.mrf.mxu3 }
 0x21c   :  { %v1248_v21 = vadd.f32 %v1247_v19, %v1225_v18  ;;  %v1695_v18 = vld [vmem:[#allocation4 + $0x10] sm:$0x3] }
 0x21d   :  { %v1465_v44 = vpop.f32.mrf.mxu1 }
 0x21e   :  { %v1271_v22 = vadd.f32 %v1270_v43, %v1248_v21  ;;  %v1531_v55 = vpop.f32.mrf.mxu2  ;;  %v1466_v59 = vadd.f32 %v1465_v44, %v1435_v42 }
 0x220   :  { %v1294_v58 = vadd.f32 %v1293_v23, %v1271_v22  ;;  %v1273_v32 = vpop.f32.mrf.mxu0 }
 0x222   :  { %1300 = vst [vmem:[#allocation4] sm:$0xff] %v1294_v58 }
 0x225   :  { %v1250_v0 = vpop.f32.mrf.mxu3 }
 0x226   :  { %v1251_v31 = vadd.f32 %v1250_v0, %v1228_v30 }
 0x228   :  { %v1274_v37 = vadd.f32 %v1273_v32, %v1251_v31  ;;  %v1554_v39 = vpop.f32.mrf.mxu1  ;;  %v1534_v4 = vpop.f32.mrf.mxu2 }
 0x22a   :  { %v1297_v40 = vadd.f32 %v1296_v10, %v1274_v37 }
 0x22b   :  { %v1508_v52 = vpop.f32.mrf.mxu0 }
 0x22c   :  { %1302 = vst [vmem:[#allocation4 + $0x8] sm:$0xff] %v1297_v40 }
 0x230   :  { %v1485_v26 = vpop.f32.mrf.mxu3 }
 0x231   :  { %v1486_v53 = vadd.f32 %v1485_v26, %v1463_v34 }
 0x232   :  { %v1557_v6 = vpop.f32.mrf.mxu1 }
 0x233   :  { %v1509_v54 = vadd.f32 %v1508_v52, %v1486_v53 }
 0x234   :  { %v1511_v63 = vpop.f32.mrf.mxu0 }
 0x235   :  { %v1532_v56 = vadd.f32 %v1531_v55, %v1509_v54 }
 0x237   :  { %v1555_v57 = vadd.f32 %v1554_v39, %v1532_v56  ;;  %v1696_v39 = vld [vmem:[#allocation4] sm:$0x3] }
 0x239   :  { %1675 = vst [vmem:[#allocation5] sm:$0xff] %v1555_v57 }
 0x23a   :  { %v1488_v61 = vpop.f32.mrf.mxu3 }
 0x23b   :  { %v1489_v62 = vadd.f32 %v1488_v61, %v1466_v59  ;;  %v1646_v58 = vpop.f32.mrf.mxu1 }
 0x23d   :  { %v1512_v3 = vadd.f32 %v1511_v63, %v1489_v62 }
 0x23f   :  { %v1535_v5 = vadd.f32 %v1534_v4, %v1512_v3 }
 0x241   :  { %v1558_v7 = vadd.f32 %v1557_v6, %v1535_v5 }
 0x243   :  { %1677 = vst [vmem:[#allocation5 + $0x8] sm:$0xff] %v1558_v7  ;;  %v1623_v20 = vpop.f32.mrf.mxu2  ;;  %v1649_v10 = vpop.f32.mrf.mxu1 }
 0x24a   :  { %v1697_v12 = vld [vmem:[#allocation5 + $0x8] sm:$0xc0] }
 0x24b   :  { %v1600_v8 = vpop.f32.mrf.mxu0  ;;  %v1701_v14 = vrot.slane %v1697_v12, 6  ;;  %v1626_v33 = vpop.f32.mrf.mxu2 }
 0x24d   :  { %v1705_v19 = vadd.f32 %v1701_v14, %v1695_v18 }
 0x251   :  { %v1577_v9 = vpop.f32.mrf.mxu3 }
 0x252   :  { %v1578_v13 = vadd.f32 %v1577_v9, %v1436_v60 }
 0x253   :  { %v1603_v11 = vpop.f32.mrf.mxu0 }
 0x254   :  { %v1601_v15 = vadd.f32 %v1600_v8, %v1578_v13 }
 0x256   :  { %v1624_v23 = vadd.f32 %v1623_v20, %v1601_v15 }
 0x258   :  { %v1647_v0 = vadd.f32 %v1646_v58, %v1624_v23 }
 0x259   :  { %v1580_v16 = vpop.f32.mrf.mxu3 }
 0x25a   :  { %v1581_v43 = vadd.f32 %v1580_v16, %v1436_v60 }
 0x25b   :  { %v1728_v21 = vpop.f32.mrf.mxu0  ;;  %v1748_v57 = vpop.f32.mrf.mxu2 }
 0x25c   :  { %v1751_v22 = vadd.f32 %v1728_v21, %v1705_v19  ;;  %v1604_v29 = vadd.f32 %v1603_v11, %v1581_v43 }
 0x25e   :  { %v1753_v28 = vsub.f32 0.0, %v1751_v22  ;;  %v1627_v37 = vadd.f32 %v1626_v33, %v1604_v29 }
 0x260   :  { %v1754_v30 = vmul.f32 1.442695, %v1753_v28  ;;  %v1650_v42 = vadd.f32 %v1649_v10, %v1627_v37  ;;  %v1808_v37 = vld [vmem:[#allocation4 + $0x10] sm:$0xc] }
 0x261   :  { %v1669_v31 = vpop.f32.mrf.mxu3 }
 0x262   :  { %4116 = vpow2.f32 %v1754_v30  ;;  %v1670_v32 = vadd.f32 %v1669_v31, %v1647_v0 }
 0x264   :  { %1676 = vst [vmem:[#allocation5 + $0x18] sm:$0xff] %v1670_v32  ;;  %v1810_v32 = vld [vmem:[#allocation5 + $0x8] sm:$0x30] }
 0x265   :  { %v1814_v33 = vrot.slane %v1810_v32, 2 }
 0x268   :  { %v4117_v40 = vpop.eup %4116 }
 0x269   :  { %v1756_v44 = vadd.f32 1.0, %v4117_v40  ;;  %v1672_v34 = vpop.f32.mrf.mxu3  ;;  %v1818_v40 = vadd.f32 %v1814_v33, %v1808_v37 }
 0x26a   :  { %v1673_v26 = vadd.f32 %v1672_v34, %v1650_v42 }
 0x26b   :  { %4118 = vrcp.f32 %v1756_v44  ;;  %v1768_v3 = vand.u32 2147483648, %v1756_v44  ;;  %vm1762_vm7 = vweird.f32 %v1756_v44  ;;  %v1766_v4 = vand.u32 2147483647, %v1756_v44 }
 0x26c   :  { %1678 = vst [vmem:[#allocation5 + $0x10] sm:$0xff] %v1673_v26 }
 0x26d   :  { %v1769_v6 = vor.u32 1.1754944e-38, %v1768_v3  ;;  %vm1767_vm9 = vcmp.eq.f32.partialorder %v1766_v4, 8.507059e+37 }
 0x271   :  { %v4119_v53 = vpop.eup %4118 }
 0x272   :  { %v1758_v52 = vmul.f32 %v4119_v53, %v1756_v44  ;;  %vm1763_vm6 = vweird.f32 %v4119_v53 }
 0x273   :  { %v1698_v54 = vld [vmem:[#allocation5 + $0x10] sm:$0xc0]  ;;  %vm1764_vm8 = vmor %vm1762_vm7, %vm1763_vm6 }
 0x274   :  { %v1702_v55 = vrot.slane %v1698_v54, 6  ;;  %v1759_v56 = vsub.f32 1.0, %v1758_v52  ;;  %v1811_v52 = vld [vmem:[#allocation5 + $0x10] sm:$0x30] }
 0x276   :  { %v1706_v59 = vadd.f32 %v1702_v55, %v1696_v39  ;;  %v1760_v61 = vmul.f32 %v4119_v53, %v1759_v56  ;;  %v1815_v56 = vrot.slane %v1811_v52, 2 }
 0x278   :  { %v1752_v62 = vadd.f32 %v1748_v57, %v1706_v59  ;;  %v1761_v63 = vadd.f32 %v4119_v53, %v1760_v61  ;;  %v1809_v57 = vld [vmem:[#allocation4] sm:$0xc] }
 0x279   :  { %v1819_v59 = vadd.f32 %v1815_v56, %v1809_v57  ;;  %v1931_v57 = vld [vmem:[#allocation5 + $0x10] sm:$0xc] }
 0x27a   :  { %4120 = vtanh.f32 %v1752_v62  ;;  %v1765_v5 = vsel %vm1764_vm8, %v4119_v53, %v1761_v63  ;;  %v1773_v9 = vsub.f32 0.0, %v1752_v62 }
 0x27b   :  { %v1770_v8 = vsel %vm1767_vm9, %v1769_v6, %v1765_v5 }
 0x27c   :  { %v1774_v11 = vmul.f32 1.442695, %v1773_v9  ;;  %v1792_v18 = vmul.f32 0.0, %v1770_v8 }
 0x27e   :  { %4122 = vpow2.f32 %v1774_v11 }
 0x280   :  { %v4121_v7 = vpop.eup %4120 }
 0x281   :  { %v1793_v60 = vmul.f32 %v4121_v7, %v1770_v8 }
 0x283   :  { %1795 = vrot.lane.b32.xlu0 %v1793_v60, %s4444_s9 }
 0x284   :  { %v4123_v12 = vpop.eup %4122 }
 0x285   :  { %v1776_v13 = vadd.f32 1.0, %v4123_v12 }
 0x287   :  { %4124 = vrcp.f32 %v1776_v13  ;;  %v1788_v22 = vand.u32 2147483648, %v1776_v13  ;;  %vm1782_vm11 = vweird.f32 %v1776_v13  ;;  %v1786_v23 = vand.u32 2147483647, %v1776_v13 }
 0x289   :  { %v1789_v28 = vor.u32 1.1754944e-38, %v1788_v22  ;;  %vm1787_vm13 = vcmp.eq.f32.partialorder %v1786_v23, 8.507059e+37 }
 0x28d   :  { %v4125_v14 = vpop.eup %4124 }
 0x28e   :  { %v1778_v15 = vmul.f32 %v4125_v14, %v1776_v13  ;;  %vm1783_vm10 = vweird.f32 %v4125_v14 }
 0x28f   :  { %vm1784_vm12 = vmor %vm1782_vm11, %vm1783_vm10 }
 0x290   :  { %v1779_v20 = vsub.f32 1.0, %v1778_v15 }
 0x292   :  { %v1780_v16 = vmul.f32 %v4125_v14, %v1779_v20 }
 0x294   :  { %v1781_v43 = vadd.f32 %v4125_v14, %v1780_v16 }
 0x296   :  { %v1785_v58 = vsel %vm1784_vm12, %v4125_v14, %v1781_v43 }
 0x297   :  { %v1790_v30 = vsel %vm1787_vm13, %v1789_v28, %v1785_v58 }
 0x2f5   :  { %v1796_v19 = vpop.permute.xlu0 %1795 }
 0x2f6   :  { %v5069_v21 = vadd.f32 %v1796_v19, %v1792_v18 }
 0x2f8   :  { %4126 = vtanh.f32 %v5069_v21  ;;  %v1910_v60 = vrot.slane %v5069_v21, 6 }
 0x2fe   :  { %v4127_v29 = vpop.eup %4126 }
 0x2ff   :  { %v1800_v0 = vmul.f32 %v4127_v29, %v1790_v30 }
 0x301   :  { %1802 = vrot.lane.b32.xlu0 %v1800_v0, %s4444_s9 }
 0x373   :  { %v1803_v31 = vpop.permute.xlu0 %1802 }
 0x374   :  { %1806 = vst.msk [vmem:[#allocation2] sm:$0x3] %vm1805_vm14, %v1803_v31  ;;  %4048 = vmatmul.msk.f32.vlgmr.msra.gmra.mxu1 %vm1707_vm15, %v1803_v31  ;;  %4049 = vmatmul.msk.f32.vlgmr.msra.gmra.mxu3 %vm1707_vm15, %v1803_v31 }
 0x375   :  { %1807 = vst.msk [vmem:[#allocation3 + $0xe] sm:$0x3] %vm1805_vm14, %v1803_v31  ;;  %2312 = vmatpush.msra.mxu1 %v4891_v25  ;;  %2332 = vmatpush.msra.mxu3 %v4896_v27 }
 0x377   :  { %2313 = vmatpush.msra.mxu1 %v4903_v24  ;;  %2333 = vmatpush.msra.mxu3 %v4922_v36 }
 0x379   :  { %2314 = vmatpush.msra.mxu1 %v4910_v46  ;;  %2334 = vmatpush.msra.mxu3 %v4934_v38 }
 0x37b   :  { %2315 = vmatpush.msra.mxu1 %v4917_v35  ;;  %2335 = vmatpush.msra.mxu3 %v4948_v45 }
 0x37d   :  { %2316 = vmatpush.msra.mxu1 %v4929_v50  ;;  %2336 = vmatpush.msra.mxu3 %v4957_v47 }
 0x37f   :  { %2317 = vmatpush.msra.mxu1 %v4941_v2  ;;  %2337 = vmatpush.msra.mxu3 %v4970_v41 }
 0x381   :  { %2318 = vmatpush.msra.mxu1 %v4962_v48  ;;  %2338 = vmatpush.msra.mxu3 %v4986_v49 }
 0x383   :  { %2319 = vmatpush.msra.mxu1 %v4976_v17  ;;  %2339 = vmatpush.msra.mxu3 %v4996_v51 }
 0x3f1   :  { %v1839_v10 = vpop.f32.mrf.mxu1 }
 0x3f2   :  { %v1864_v42 = vrot.slane %v1839_v10, 6 }
 0x3f4   :  { %v1868_v44 = vadd.f32 %v1864_v42, %v1818_v40  ;;  %v1930_v42 = vld [vmem:[#allocation5 + $0x8] sm:$0xc] }
 0x3f6   :  { %v1870_v34 = vsub.f32 0.0, %v1868_v44  ;;  %v1934_v44 = vrot.slane %v1930_v42, 6 }
 0x3f7   :  { %v1859_v55 = vpop.f32.mrf.mxu3 }
 0x3f8   :  { %v1871_v26 = vmul.f32 1.442695, %v1870_v34  ;;  %v1865_v39 = vrot.slane %v1859_v55, 6  ;;  %v1928_v34 = vld [vmem:[#allocation4 + $0x10] sm:$0x30] }
 0x3fa   :  { %4128 = vpow2.f32 %v1871_v26  ;;  %v1869_v62 = vadd.f32 %v1865_v39, %v1819_v59 }
 0x3fc   :  { %v1890_v15 = vsub.f32 0.0, %v1869_v62 }
 0x3fe   :  { %v1891_v20 = vmul.f32 1.442695, %v1890_v15 }
 0x400   :  { %v4129_v53 = vpop.eup %4128 }
 0x401   :  { %v1873_v54 = vadd.f32 1.0, %v4129_v53  ;;  %v1938_v53 = vadd.f32 %v1934_v44, %v1928_v34 }
 0x403   :  { %4130 = vrcp.f32 %v1873_v54  ;;  %v1885_v4 = vand.u32 2147483648, %v1873_v54  ;;  %v1883_v6 = vand.u32 2147483647, %v1873_v54  ;;  %vm1879_vm1 = vweird.f32 %v1873_v54 }
 0x404   :  { %4132 = vtanh.f32 %v1869_v62  ;;  %v1935_v62 = vrot.slane %v1931_v57, 6 }
 0x405   :  { %v1886_v8 = vor.u32 1.1754944e-38, %v1885_v4  ;;  %vm1884_vm3 = vcmp.eq.f32.partialorder %v1883_v6, 8.507059e+37  ;;  %4134 = vpow2.f32 %v1891_v20 }
 0x409   :  { %v4131_v61 = vpop.eup %4130 }
 0x40a   :  { %v1875_v63 = vmul.f32 %v4131_v61, %v1873_v54  ;;  %vm1880_vm0 = vweird.f32 %v4131_v61  ;;  %v4133_v11 = vpop.eup %4132 }
 0x40b   :  { %vm1881_vm2 = vmor %vm1879_vm1, %vm1880_vm0  ;;  %v4135_v16 = vpop.eup %4134 }
 0x40c   :  { %v1876_v3 = vsub.f32 1.0, %v1875_v63  ;;  %v1893_v18 = vadd.f32 1.0, %v4135_v16 }
 0x40e   :  { %v1877_v5 = vmul.f32 %v4131_v61, %v1876_v3  ;;  %4136 = vrcp.f32 %v1893_v18  ;;  %v1905_v29 = vand.u32 2147483648, %v1893_v18  ;;  %vm1899_vm5 = vweird.f32 %v1893_v18  ;;  %v1929_v3 = vld [vmem:[#allocation4] sm:$0x30] }
 0x40f   :  { %v1903_v30 = vand.u32 2147483647, %v1893_v18  ;;  %v1939_v4 = vadd.f32 %v1935_v62, %v1929_v3 }
 0x410   :  { %v1878_v7 = vadd.f32 %v4131_v61, %v1877_v5  ;;  %v1906_v31 = vor.u32 1.1754944e-38, %v1905_v29 }
 0x411   :  { %vm1904_vm7 = vcmp.eq.f32.partialorder %v1903_v30, 8.507059e+37 }
 0x412   :  { %v1882_v9 = vsel %vm1881_vm2, %v4131_v61, %v1878_v7 }
 0x413   :  { %v1887_v12 = vsel %vm1884_vm3, %v1886_v8, %v1882_v9 }
 0x414   :  { %v1913_v13 = vmul.f32 %v4133_v11, %v1887_v12  ;;  %v1912_v14 = vmul.f32 %v1910_v60, %v1887_v12  ;;  %v4137_v19 = vpop.eup %4136 }
 0x415   :  { %v1895_v43 = vmul.f32 %v4137_v19, %v1893_v18  ;;  %vm1900_vm4 = vweird.f32 %v4137_v19 }
 0x416   :  { %1915 = vrot.lane.b32.xlu1 %v1913_v13, %s4444_s9  ;;  %vm1901_vm6 = vmor %vm1899_vm5, %vm1900_vm4 }
 0x417   :  { %v1896_v22 = vsub.f32 1.0, %v1895_v43 }
 0x419   :  { %v1897_v23 = vmul.f32 %v4137_v19, %v1896_v22 }
 0x41b   :  { %v1898_v28 = vadd.f32 %v4137_v19, %v1897_v23 }
 0x41d   :  { %v1902_v0 = vsel %vm1901_vm6, %v4137_v19, %v1898_v28 }
 0x41e   :  { %v1907_v33 = vsel %vm1904_vm7, %v1906_v31, %v1902_v0 }
 0x488   :  { %v1916_v58 = vpop.permute.xlu1 %1915 }
 0x489   :  { %v5095_v21 = vadd.f32 %v1916_v58, %v1912_v14 }
 0x48b   :  { %4138 = vtanh.f32 %v5095_v21  ;;  %v2033_v14 = vrot.slane %v5095_v21, 6 }
 0x491   :  { %v4139_v32 = vpop.eup %4138 }
 0x492   :  { %v5098_v37 = vmul.f32 %v4139_v32, %v1907_v33 }
 0x494   :  { %v1940_v10 = vrot.slane %v5098_v37, 2 }
 0x496   :  { %1941 = vrot.lane.b32.xlu1 %v1940_v10, %s4444_s9 }
 0x508   :  { %v1942_v40 = vpop.permute.xlu1 %1941 }
 0x509   :  { %4050 = vmatmul.msk.f32.vlgmr.msra.gmra.mxu0 %vm1707_vm15, %v1942_v40  ;;  %4051 = vmatmul.msk.f32.vlgmr.msrb.gmra.mxu2 %vm1707_vm15, %v1942_v40 }
 0x50a   :  { %2434 = vmatpush.msra.mxu0 %v4891_v25  ;;  %2454 = vmatpush.msrb.mxu2 %v4896_v27 }
 0x50c   :  { %2435 = vmatpush.msra.mxu0 %v4903_v24  ;;  %2455 = vmatpush.msrb.mxu2 %v4922_v36 }
 0x50e   :  { %2436 = vmatpush.msra.mxu0 %v4910_v46  ;;  %2456 = vmatpush.msrb.mxu2 %v4934_v38 }
 0x510   :  { %2437 = vmatpush.msra.mxu0 %v4917_v35  ;;  %2457 = vmatpush.msrb.mxu2 %v4948_v45 }
 0x512   :  { %2438 = vmatpush.msra.mxu0 %v4929_v50  ;;  %2458 = vmatpush.msrb.mxu2 %v4957_v47 }
 0x514   :  { %2439 = vmatpush.msra.mxu0 %v4941_v2  ;;  %2459 = vmatpush.msrb.mxu2 %v4970_v41 }
 0x516   :  { %2440 = vmatpush.msra.mxu0 %v4962_v48  ;;  %2460 = vmatpush.msrb.mxu2 %v4986_v49 }
 0x518   :  { %2441 = vmatpush.msra.mxu0 %v4976_v17  ;;  %2461 = vmatpush.msrb.mxu2 %v4996_v51 }
 0x586   :  { %v1962_v26 = vpop.f32.mrf.mxu0 }
 0x587   :  { %v1987_v52 = vrot.slane %v1962_v26, 4 }
 0x589   :  { %v1991_v54 = vadd.f32 %v1987_v52, %v1938_v53 }
 0x58b   :  { %v1993_v55 = vsub.f32 0.0, %v1991_v54 }
 0x58c   :  { %v1982_v61 = vpop.f32.mrf.mxu2 }
 0x58d   :  { %v1994_v56 = vmul.f32 1.442695, %v1993_v55  ;;  %v1988_v63 = vrot.slane %v1982_v61, 4 }
 0x58f   :  { %4140 = vpow2.f32 %v1994_v56  ;;  %v1992_v6 = vadd.f32 %v1988_v63, %v1939_v4 }
 0x591   :  { %v2013_v43 = vsub.f32 0.0, %v1992_v6 }
 0x593   :  { %v2014_v22 = vmul.f32 1.442695, %v2013_v43 }
 0x595   :  { %v4141_v39 = vpop.eup %4140 }
 0x596   :  { %v1996_v59 = vadd.f32 1.0, %v4141_v39 }
 0x598   :  { %4142 = vrcp.f32 %v1996_v59  ;;  %v2008_v60 = vand.u32 2147483648, %v1996_v59  ;;  %v2006_v11 = vand.u32 2147483647, %v1996_v59  ;;  %vm2002_vm9 = vweird.f32 %v1996_v59 }
 0x599   :  { %4144 = vtanh.f32 %v1992_v6 }
 0x59a   :  { %v2009_v13 = vor.u32 1.1754944e-38, %v2008_v60  ;;  %vm2007_vm11 = vcmp.eq.f32.partialorder %v2006_v11, 8.507059e+37  ;;  %4146 = vpow2.f32 %v2014_v22 }
 0x59e   :  { %v4143_v5 = vpop.eup %4142 }
 0x59f   :  { %v1998_v7 = vmul.f32 %v4143_v5, %v1996_v59  ;;  %vm2003_vm8 = vweird.f32 %v4143_v5  ;;  %v4145_v20 = vpop.eup %4144 }
 0x5a0   :  { %vm2004_vm10 = vmor %vm2002_vm9, %vm2003_vm8  ;;  %v4147_v23 = vpop.eup %4146 }
 0x5a1   :  { %v1999_v8 = vsub.f32 1.0, %v1998_v7  ;;  %v2016_v58 = vadd.f32 1.0, %v4147_v23 }
 0x5a3   :  { %v2000_v9 = vmul.f32 %v4143_v5, %v1999_v8  ;;  %4148 = vrcp.f32 %v2016_v58  ;;  %v2028_v33 = vand.u32 2147483648, %v2016_v58  ;;  %vm2022_vm13 = vweird.f32 %v2016_v58 }
 0x5a4   :  { %v2026_v10 = vand.u32 2147483647, %v2016_v58 }
 0x5a5   :  { %v2001_v12 = vadd.f32 %v4143_v5, %v2000_v9  ;;  %v2029_v42 = vor.u32 1.1754944e-38, %v2028_v33 }
 0x5a6   :  { %vm2027_vm1 = vcmp.eq.f32.partialorder %v2026_v10, 8.507059e+37  ;;  %v2174_v10 = vld [vmem:[#allocation4 + $0x18] sm:$0x3] }
 0x5a7   :  { %v2005_v15 = vsel %vm2004_vm10, %v4143_v5, %v2001_v12 }
 0x5a8   :  { %v2010_v16 = vsel %vm2007_vm11, %v2009_v13, %v2005_v15 }
 0x5a9   :  { %v2036_v18 = vmul.f32 %v4145_v20, %v2010_v16  ;;  %v2035_v19 = vmul.f32 %v2033_v14, %v2010_v16  ;;  %v4149_v28 = vpop.eup %4148 }
 0x5aa   :  { %v2018_v29 = vmul.f32 %v4149_v28, %v2016_v58  ;;  %vm2023_vm12 = vweird.f32 %v4149_v28 }
 0x5ab   :  { %2038 = vrot.lane.b32.xlu2 %v2036_v18, %s4444_s9  ;;  %vm2024_vm0 = vmor %vm2022_vm13, %vm2023_vm12 }
 0x5ac   :  { %v2019_v30 = vsub.f32 1.0, %v2018_v29 }
 0x5ae   :  { %v2020_v0 = vmul.f32 %v4149_v28, %v2019_v30 }
 0x5b0   :  { %v2021_v32 = vadd.f32 %v4149_v28, %v2020_v0 }
 0x5b2   :  { %v2025_v40 = vsel %vm2024_vm0, %v4149_v28, %v2021_v32  ;;  %v2176_v32 = vld [vmem:[#allocation5] sm:$0xc0] }
 0x5b3   :  { %v2030_v34 = vsel %vm2027_vm1, %v2029_v42, %v2025_v40  ;;  %v2180_v33 = vrot.slane %v2176_v32, 6 }
 0x5b5   :  { %v2184_v40 = vadd.f32 %v2180_v33, %v2174_v10 }
 0x605   :  { %v2039_v31 = vpop.permute.xlu2 %2038 }
 0x606   :  { %v5122_v21 = vadd.f32 %v2039_v31, %v2035_v19 }
 0x608   :  { %4150 = vtanh.f32 %v5122_v21  ;;  %v2156_v4 = vrot.slane %v5122_v21, 6 }
 0x60e   :  { %v4151_v44 = vpop.eup %4150 }
 0x60f   :  { %v5125_v26 = vmul.f32 %v4151_v44, %v2030_v34 }
 0x611   :  { %v2063_v53 = vrot.slane %v5125_v26, 4 }
 0x613   :  { %2064 = vrot.lane.b32.xlu2 %v2063_v53, %s4444_s9 }
 0x66d   :  { %v2065_v52 = vpop.permute.xlu2 %2064 }
 0x66e   :  { %4052 = vmatmul.msk.f32.vlgmr.msrb.gmra.mxu1 %vm1707_vm15, %v2065_v52  ;;  %4053 = vmatmul.msk.f32.vlgmr.msrb.gmra.mxu3 %vm1707_vm15, %v2065_v52 }
 0x66f   :  { %2556 = vmatpush.msrb.mxu1 %v4891_v25  ;;  %2576 = vmatpush.msrb.mxu3 %v4896_v27  ;;  %v2053_v25 = vld [vmem:[#allocation5 + $0x8] sm:$0x3] }
 0x670   :  { %v2057_v27 = vrot.slane %v2053_v25, 2  ;;  %v2177_v25 = vld [vmem:[#allocation5 + $0x18] sm:$0xc0] }
 0x671   :  { %2557 = vmatpush.msrb.mxu1 %v4903_v24  ;;  %2577 = vmatpush.msrb.mxu3 %v4922_v36  ;;  %v2051_v24 = vld [vmem:[#allocation4 + $0x10] sm:$0xc0] }
 0x673   :  { %2558 = vmatpush.msrb.mxu1 %v4910_v46  ;;  %2578 = vmatpush.msrb.mxu3 %v4934_v38 }
 0x675   :  { %2559 = vmatpush.msrb.mxu1 %v4917_v35  ;;  %2579 = vmatpush.msrb.mxu3 %v4948_v45  ;;  %v2061_v35 = vadd.f32 %v2057_v27, %v2051_v24  ;;  %v2181_v24 = vrot.slane %v2177_v25, 6 }
 0x677   :  { %2560 = vmatpush.msrb.mxu1 %v4929_v50  ;;  %2580 = vmatpush.msrb.mxu3 %v4957_v47  ;;  %v2054_v47 = vld [vmem:[#allocation5 + $0x10] sm:$0x3] }
 0x679   :  { %2561 = vmatpush.msrb.mxu1 %v4941_v2  ;;  %2581 = vmatpush.msrb.mxu3 %v4970_v41 }
 0x67b   :  { %2562 = vmatpush.msrb.mxu1 %v4962_v48  ;;  %2582 = vmatpush.msrb.mxu3 %v4986_v49  ;;  %v2058_v49 = vrot.slane %v2054_v47, 2 }
 0x67d   :  { %2563 = vmatpush.msrb.mxu1 %v4976_v17  ;;  %2583 = vmatpush.msrb.mxu3 %v4996_v51  ;;  %v2052_v17 = vld [vmem:[#allocation4] sm:$0xc0] }
 0x67e   :  { %v2062_v55 = vadd.f32 %v2058_v49, %v2052_v17 }
 0x6eb   :  { %v2085_v46 = vpop.f32.mrf.mxu1 }
 0x6ec   :  { %v2110_v36 = vrot.slane %v2085_v46, 2  ;;  %v2175_v46 = vld [vmem:[#allocation4 + $0x8] sm:$0x3] }
 0x6ee   :  { %v2114_v50 = vadd.f32 %v2110_v36, %v2061_v35  ;;  %v2185_v36 = vadd.f32 %v2181_v24, %v2175_v46 }
 0x6f0   :  { %v2116_v38 = vsub.f32 0.0, %v2114_v50 }
 0x6f1   :  { %v2105_v48 = vpop.f32.mrf.mxu3 }
 0x6f2   :  { %v2117_v45 = vmul.f32 1.442695, %v2116_v38  ;;  %v2111_v54 = vrot.slane %v2105_v48, 2 }
 0x6f4   :  { %4152 = vpow2.f32 %v2117_v45  ;;  %v2115_v56 = vadd.f32 %v2111_v54, %v2062_v55 }
 0x6f6   :  { %v2136_v9 = vsub.f32 0.0, %v2115_v56 }
 0x6f8   :  { %v2137_v11 = vmul.f32 1.442695, %v2136_v9 }
 0x6fa   :  { %v4153_v2 = vpop.eup %4152 }
 0x6fb   :  { %v2119_v41 = vadd.f32 1.0, %v4153_v2 }
 0x6fd   :  { %4154 = vrcp.f32 %v2119_v41  ;;  %v2131_v59 = vand.u32 2147483648, %v2119_v41  ;;  %v2129_v62 = vand.u32 2147483647, %v2119_v41  ;;  %vm2125_vm3 = vweird.f32 %v2119_v41 }
 0x6fe   :  { %4156 = vtanh.f32 %v2115_v56 }
 0x6ff   :  { %v2132_v3 = vor.u32 1.1754944e-38, %v2131_v59  ;;  %vm2130_vm5 = vcmp.eq.f32.partialorder %v2129_v62, 8.507059e+37  ;;  %4158 = vpow2.f32 %v2137_v11 }
 0x703   :  { %v4155_v51 = vpop.eup %4154 }
 0x704   :  { %v2121_v39 = vmul.f32 %v4155_v51, %v2119_v41  ;;  %vm2126_vm2 = vweird.f32 %v4155_v51  ;;  %v4157_v6 = vpop.eup %4156 }
 0x705   :  { %vm2127_vm4 = vmor %vm2125_vm3, %vm2126_vm2  ;;  %v4159_v12 = vpop.eup %4158 }
 0x706   :  { %v2122_v57 = vsub.f32 1.0, %v2121_v39  ;;  %v2139_v13 = vadd.f32 1.0, %v4159_v12 }
 0x708   :  { %v2123_v61 = vmul.f32 %v4155_v51, %v2122_v57  ;;  %4160 = vrcp.f32 %v2139_v13  ;;  %v2151_v22 = vand.u32 2147483648, %v2139_v13  ;;  %vm2145_vm7 = vweird.f32 %v2139_v13 }
 0x709   :  { %v2149_v23 = vand.u32 2147483647, %v2139_v13 }
 0x70a   :  { %v2124_v63 = vadd.f32 %v4155_v51, %v2123_v61  ;;  %v2152_v28 = vor.u32 1.1754944e-38, %v2151_v22 }
 0x70b   :  { %vm2150_vm9 = vcmp.eq.f32.partialorder %v2149_v23, 8.507059e+37 }
 0x70c   :  { %v2128_v5 = vsel %vm2127_vm4, %v4155_v51, %v2124_v63 }
 0x70d   :  { %v2133_v7 = vsel %vm2130_vm5, %v2132_v3, %v2128_v5 }
 0x70e   :  { %v2159_v8 = vmul.f32 %v4157_v6, %v2133_v7  ;;  %v2158_v60 = vmul.f32 %v2156_v4, %v2133_v7  ;;  %v4161_v14 = vpop.eup %4160 }
 0x70f   :  { %v2141_v15 = vmul.f32 %v4161_v14, %v2139_v13  ;;  %vm2146_vm6 = vweird.f32 %v4161_v14 }
 0x710   :  { %2161 = vrot.lane.b32.xlu0 %v2159_v8, %s4444_s9  ;;  %vm2147_vm8 = vmor %vm2145_vm7, %vm2146_vm6 }
 0x711   :  { %v2142_v20 = vsub.f32 1.0, %v2141_v15 }
 0x713   :  { %v2143_v16 = vmul.f32 %v4161_v14, %v2142_v20 }
 0x715   :  { %v2144_v43 = vadd.f32 %v4161_v14, %v2143_v16 }
 0x717   :  { %v2148_v58 = vsel %vm2147_vm8, %v4161_v14, %v2144_v43  ;;  %v2290_v43 = vld [vmem:[#allocation4 + $0x18] sm:$0xc] }
 0x718   :  { %v2153_v30 = vsel %vm2150_vm9, %v2152_v28, %v2148_v58 }
 0x782   :  { %v2162_v18 = vpop.permute.xlu0 %2161 }
 0x783   :  { %v2164_v19 = vadd.f32 %v2162_v18, %v2158_v60  ;;  %v2292_v18 = vld [vmem:[#allocation5] sm:$0x30] }
 0x785   :  { %4162 = vtanh.f32 %v2164_v19  ;;  %v2273_v17 = vrot.slane %v2164_v19, 6  ;;  %v2296_v19 = vrot.slane %v2292_v18, 2 }
 0x787   :  { %v2300_v23 = vadd.f32 %v2296_v19, %v2290_v43  ;;  %v2412_v43 = vld [vmem:[#allocation5 + $0x18] sm:$0xc] }
 0x78b   :  { %v4163_v29 = vpop.eup %4162 }
 0x78c   :  { %v5149_v0 = vmul.f32 %v4163_v29, %v2153_v30 }
 0x78e   :  { %v2186_v31 = vrot.slane %v5149_v0, 6 }
 0x790   :  { %2187 = vrot.lane.b32.xlu1 %v2186_v31, %s4444_s9 }
 0x802   :  { %v2188_v21 = vpop.permute.xlu1 %2187 }
 0x803   :  { %4054 = vmatmul.msk.f32.vlgmr.msrb.gmra.mxu0 %vm1707_vm15, %v2188_v21  ;;  %4055 = vmatmul.msk.f32.vlgmr.msra.gmra.mxu2 %vm1707_vm15, %v2188_v21  ;;  %v2293_v21 = vld [vmem:[#allocation5 + $0x18] sm:$0x30] }
 0x804   :  { %v2297_v10 = vrot.slane %v2293_v21, 2 }
 0x880   :  { %v2208_v42 = vpop.f32.mrf.mxu0 }
 0x881   :  { %v2231_v44 = vadd.f32 %v2208_v42, %v2184_v40  ;;  %v2291_v42 = vld [vmem:[#allocation4 + $0x8] sm:$0xc] }
 0x883   :  { %v2233_v34 = vsub.f32 0.0, %v2231_v44  ;;  %v2301_v44 = vadd.f32 %v2297_v10, %v2291_v42 }
 0x885   :  { %v2234_v53 = vmul.f32 1.442695, %v2233_v34 }
 0x886   :  { %v2228_v35 = vpop.f32.mrf.mxu2 }
 0x887   :  { %4164 = vpow2.f32 %v2234_v53  ;;  %v2232_v38 = vadd.f32 %v2228_v35, %v2185_v36 }
 0x889   :  { %v2253_v59 = vsub.f32 0.0, %v2232_v38 }
 0x88b   :  { %v2254_v61 = vmul.f32 1.442695, %v2253_v59 }
 0x88d   :  { %v4165_v52 = vpop.eup %4164 }
 0x88e   :  { %v2236_v27 = vadd.f32 1.0, %v4165_v52 }
 0x890   :  { %4166 = vrcp.f32 %v2236_v27  ;;  %v2248_v47 = vand.u32 2147483648, %v2236_v27  ;;  %v2246_v48 = vand.u32 2147483647, %v2236_v27  ;;  %vm2242_vm11 = vweird.f32 %v2236_v27 }
 0x891   :  { %4168 = vtanh.f32 %v2232_v38 }
 0x892   :  { %v2249_v54 = vor.u32 1.1754944e-38, %v2248_v47  ;;  %vm2247_vm13 = vcmp.eq.f32.partialorder %v2246_v48, 8.507059e+37  ;;  %4170 = vpow2.f32 %v2254_v61 }
 0x896   :  { %v4167_v50 = vpop.eup %4166 }
 0x897   :  { %v2238_v45 = vmul.f32 %v4167_v50, %v2236_v27  ;;  %vm2243_vm10 = vweird.f32 %v4167_v50  ;;  %v4169_v51 = vpop.eup %4168 }
 0x898   :  { %vm2244_vm12 = vmor %vm2242_vm11, %vm2243_vm10  ;;  %v4171_v62 = vpop.eup %4170 }
 0x899   :  { %v2239_v2 = vsub.f32 1.0, %v2238_v45  ;;  %v2256_v63 = vadd.f32 1.0, %v4171_v62 }
 0x89b   :  { %v2240_v41 = vmul.f32 %v4167_v50, %v2239_v2  ;;  %4172 = vrcp.f32 %v2256_v63  ;;  %v2268_v9 = vand.u32 2147483648, %v2256_v63  ;;  %vm2262_vm1 = vweird.f32 %v2256_v63 }
 0x89c   :  { %v2266_v11 = vand.u32 2147483647, %v2256_v63 }
 0x89d   :  { %v2241_v49 = vadd.f32 %v4167_v50, %v2240_v41  ;;  %v2269_v13 = vor.u32 1.1754944e-38, %v2268_v9  ;;  %v2411_v9 = vld [vmem:[#allocation5] sm:$0xc] }
 0x89e   :  { %vm2267_vm3 = vcmp.eq.f32.partialorder %v2266_v11, 8.507059e+37  ;;  %v2415_v11 = vrot.slane %v2411_v9, 6 }
 0x89f   :  { %v2245_v55 = vsel %vm2244_vm12, %v4167_v50, %v2241_v49 }
 0x8a0   :  { %v2250_v56 = vsel %vm2247_vm13, %v2249_v54, %v2245_v55 }
 0x8a1   :  { %v2276_v39 = vmul.f32 %v4169_v51, %v2250_v56  ;;  %v2275_v57 = vmul.f32 %v2273_v17, %v2250_v56  ;;  %v4173_v3 = vpop.eup %4172 }
 0x8a2   :  { %v2258_v4 = vmul.f32 %v4173_v3, %v2256_v63  ;;  %vm2263_vm0 = vweird.f32 %v4173_v3 }
 0x8a3   :  { %2278 = vrot.lane.b32.xlu2 %v2276_v39, %s4444_s9  ;;  %vm2264_vm2 = vmor %vm2262_vm1, %vm2263_vm0 }
 0x8a4   :  { %v2259_v5 = vsub.f32 1.0, %v2258_v4 }
 0x8a6   :  { %v2260_v6 = vmul.f32 %v4173_v3, %v2259_v5 }
 0x8a8   :  { %v2261_v60 = vadd.f32 %v4173_v3, %v2260_v6 }
 0x8aa   :  { %v2265_v12 = vsel %vm2264_vm2, %v4173_v3, %v2261_v60 }
 0x8ab   :  { %v2270_v15 = vsel %vm2267_vm3, %v2269_v13, %v2265_v12  ;;  %v2409_v12 = vld [vmem:[#allocation4 + $0x18] sm:$0x30] }
 0x8fd   :  { %v2279_v7 = vpop.permute.xlu2 %2278 }
 0x8fe   :  { %v2281_v8 = vadd.f32 %v2279_v7, %v2275_v57 }
 0x900   :  { %4174 = vtanh.f32 %v2281_v8  ;;  %v2392_v50 = vrot.slane %v2281_v8, 6 }
 0x906   :  { %v4175_v14 = vpop.eup %4174 }
 0x907   :  { %v2283_v20 = vmul.f32 %v4175_v14, %v2270_v15  ;;  %v2419_v14 = vadd.f32 %v2415_v11, %v2409_v12 }
 0x909   :  { %2285 = vrot.lane.b32.xlu0 %v2283_v20, %s4444_s9 }
 0x97b   :  { %v2286_v16 = vpop.permute.xlu0 %2285 }
 0x97c   :  { %2288 = vst.msk [vmem:[#allocation2 + $0x8] sm:$0x3] %vm1805_vm14, %v2286_v16  ;;  %4056 = vmatmul.msk.f32.vlgmr.msra.gmra.mxu1 %vm1707_vm15, %v2286_v16  ;;  %4057 = vmatmul.msk.f32.vlgmr.msra.gmra.mxu3 %vm1707_vm15, %v2286_v16 }
 0x97d   :  { %2289 = vst.msk [vmem:[#allocation3 + $0x6] sm:$0x3] %vm1805_vm14, %v2286_v16 }
 0x9f9   :  { %v2321_v22 = vpop.f32.mrf.mxu1 }
 0x9fa   :  { %v2346_v58 = vrot.slane %v2321_v22, 6 }
 0x9fc   :  { %v2350_v28 = vadd.f32 %v2346_v58, %v2300_v23  ;;  %v2416_v58 = vrot.slane %v2412_v43, 6 }
 0x9fe   :  { %v2352_v29 = vsub.f32 0.0, %v2350_v28 }
 0x9ff   :  { %v2341_v33 = vpop.f32.mrf.mxu3 }
 0xa00   :  { %v2353_v30 = vmul.f32 1.442695, %v2352_v29  ;;  %v2347_v40 = vrot.slane %v2341_v33, 6  ;;  %v2410_v29 = vld [vmem:[#allocation4 + $0x8] sm:$0x30] }
 0xa02   :  { %4176 = vpow2.f32 %v2353_v30  ;;  %v2351_v53 = vadd.f32 %v2347_v40, %v2301_v44  ;;  %v2420_v30 = vadd.f32 %v2416_v58, %v2410_v29 }
 0xa04   :  { %v2372_v48 = vsub.f32 0.0, %v2351_v53 }
 0xa06   :  { %v2373_v49 = vmul.f32 1.442695, %v2372_v48 }
 0xa08   :  { %v4177_v31 = vpop.eup %4176 }
 0xa09   :  { %v2355_v32 = vadd.f32 1.0, %v4177_v31 }
 0xa0b   :  { %4178 = vrcp.f32 %v2355_v32  ;;  %v2367_v27 = vand.u32 2147483648, %v2355_v32  ;;  %v2365_v46 = vand.u32 2147483647, %v2355_v32  ;;  %vm2361_vm5 = vweird.f32 %v2355_v32 }
 0xa0c   :  { %4180 = vtanh.f32 %v2351_v53 }
 0xa0d   :  { %v2368_v36 = vor.u32 1.1754944e-38, %v2367_v27  ;;  %vm2366_vm7 = vcmp.eq.f32.partialorder %v2365_v46, 8.507059e+37  ;;  %4182 = vpow2.f32 %v2373_v49 }
 0xa11   :  { %v4179_v34 = vpop.eup %4178 }
 0xa12   :  { %v2357_v52 = vmul.f32 %v4179_v34, %v2355_v32  ;;  %vm2362_vm4 = vweird.f32 %v4179_v34  ;;  %v4181_v45 = vpop.eup %4180 }
 0xa13   :  { %vm2363_vm6 = vmor %vm2361_vm5, %vm2362_vm4  ;;  %v4183_v54 = vpop.eup %4182  ;;  %vm1925_vm5 = vcmask 519170  }
 0xa14   :  { %v2358_v25 = vsub.f32 1.0, %v2357_v52  ;;  %v2375_v17 = vadd.f32 1.0, %v4183_v54 }
 0xa16   :  { %v2359_v24 = vmul.f32 %v4179_v34, %v2358_v25  ;;  %4184 = vrcp.f32 %v2375_v17  ;;  %v2387_v62 = vand.u32 2147483648, %v2375_v17  ;;  %vm2381_vm9 = vweird.f32 %v2375_v17 }
 0xa17   :  { %v2385_v63 = vand.u32 2147483647, %v2375_v17 }
 0xa18   :  { %v2360_v35 = vadd.f32 %v4179_v34, %v2359_v24  ;;  %v2388_v4 = vor.u32 1.1754944e-38, %v2387_v62 }
 0xa19   :  { %vm2386_vm11 = vcmp.eq.f32.partialorder %v2385_v63, 8.507059e+37 }
 0xa1a   :  { %v2364_v38 = vsel %vm2363_vm6, %v4179_v34, %v2360_v35 }
 0xa1b   :  { %v2369_v2 = vsel %vm2366_vm7, %v2368_v36, %v2364_v38  ;;  %vm2048_vm7 = vcmask 521220  }
 0xa1c   :  { %v2395_v47 = vmul.f32 %v4181_v45, %v2369_v2  ;;  %v2394_v41 = vmul.f32 %v2392_v50, %v2369_v2  ;;  %v4185_v55 = vpop.eup %4184 }
 0xa1d   :  { %v2377_v51 = vmul.f32 %v4185_v55, %v2375_v17  ;;  %vm2382_vm8 = vweird.f32 %v4185_v55 }
 0xa1e   :  { %2397 = vrot.lane.b32.xlu1 %v2395_v47, %s4444_s9  ;;  %vm2383_vm10 = vmor %vm2381_vm9, %vm2382_vm8 }
 0xa1f   :  { %v2378_v56 = vsub.f32 1.0, %v2377_v51 }
 0xa21   :  { %v2379_v39 = vmul.f32 %v4185_v55, %v2378_v56 }
 0xa23   :  { %v2380_v61 = vadd.f32 %v4185_v55, %v2379_v39 }
 0xa25   :  { %v2384_v3 = vsel %vm2383_vm10, %v4185_v55, %v2380_v61 }
 0xa26   :  { %v2389_v6 = vsel %vm2386_vm11, %v2388_v4, %v2384_v3 }
 0xa90   :  { %v2398_v57 = vpop.permute.xlu1 %2397 }
 0xa91   :  { %v2400_v59 = vadd.f32 %v2398_v57, %v2394_v41 }
 0xa93   :  { %4186 = vtanh.f32 %v2400_v59  ;;  %v2514_v53 = vrot.slane %v2400_v59, 6 }
 0xa99   :  { %v4187_v5 = vpop.eup %4186 }
 0xa9a   :  { %v2402_v7 = vmul.f32 %v4187_v5, %v2389_v6  ;;  %v2533_v5 = vld [vmem:[#allocation5] sm:$0x3] }
 0xa9b   :  { %v2537_v6 = vrot.slane %v2533_v5, 2  ;;  %v2680_v5 = vld [vmem:[#allocation11 + $0x38] sm:$0xff] }
 0xa9c   :  { %v2421_v8 = vrot.slane %v2402_v7, 2 }
 0xa9e   :  { %2422 = vrot.lane.b32.xlu2 %v2421_v8, %s4444_s9 }
 0xaf8   :  { %v2423_v60 = vpop.permute.xlu2 %2422 }
 0xaf9   :  { %4058 = vmatmul.msk.f32.vlgmr.msra.gmra.mxu0 %vm1707_vm15, %v2423_v60  ;;  %4059 = vmatmul.msk.f32.vlgmr.msrb.gmra.mxu2 %vm1707_vm15, %v2423_v60 }
 0xb76   :  { %v2443_v13 = vpop.f32.mrf.mxu0 }
 0xb77   :  { %v2468_v15 = vrot.slane %v2443_v13, 4 }
 0xb79   :  { %v2472_v20 = vadd.f32 %v2468_v15, %v2419_v14  ;;  %v2534_v14 = vld [vmem:[#allocation5 + $0x18] sm:$0x3] }
 0xb7b   :  { %v2474_v16 = vsub.f32 0.0, %v2472_v20 }
 0xb7c   :  { %v2463_v23 = vpop.f32.mrf.mxu2 }
 0xb7d   :  { %v2475_v18 = vmul.f32 1.442695, %v2474_v16  ;;  %v2469_v28 = vrot.slane %v2463_v23, 4  ;;  %v2538_v16 = vrot.slane %v2534_v14, 2  ;;  %v2667_v14 = vld [vmem:[%s5574_s10 + $0x50] sm:$0xff] }
 0xb7f   :  { %4188 = vpow2.f32 %v2475_v18  ;;  %v2473_v21 = vadd.f32 %v2469_v28, %v2420_v30 }
 0xb81   :  { %v2494_v35 = vsub.f32 0.0, %v2473_v21 }
 0xb83   :  { %v2495_v36 = vmul.f32 1.442695, %v2494_v35 }
 0xb85   :  { %v4189_v19 = vpop.eup %4188 }
 0xb86   :  { %v2477_v22 = vadd.f32 1.0, %v4189_v19  ;;  %v2532_v19 = vld [vmem:[#allocation4 + $0x8] sm:$0xc0] }
 0xb87   :  { %v2542_v43 = vadd.f32 %v2538_v16, %v2532_v19  ;;  %v2665_v16 = vld [vmem:[%s5574_s10 + $0x40] sm:$0xff]  ;;  %v2666_v19 = vld [vmem:[%s5574_s10 + $0x48] sm:$0xff] }
 0xb88   :  { %4190 = vrcp.f32 %v2477_v22  ;;  %v2489_v10 = vand.u32 2147483648, %v2477_v22  ;;  %v2487_v42 = vand.u32 2147483647, %v2477_v22  ;;  %vm2483_vm13 = vweird.f32 %v2477_v22 }
 0xb89   :  { %4192 = vtanh.f32 %v2473_v21 }
 0xb8a   :  { %v2490_v34 = vor.u32 1.1754944e-38, %v2489_v10  ;;  %vm2488_vm1 = vcmp.eq.f32.partialorder %v2487_v42, 8.507059e+37  ;;  %4194 = vpow2.f32 %v2495_v36 }
 0xb8e   :  { %v4191_v31 = vpop.eup %4190 }
 0xb8f   :  { %v2479_v32 = vmul.f32 %v4191_v31, %v2477_v22  ;;  %vm2484_vm12 = vweird.f32 %v4191_v31  ;;  %v4193_v25 = vpop.eup %4192 }
 0xb90   :  { %vm2485_vm0 = vmor %vm2483_vm13, %vm2484_vm12  ;;  %v4195_v50 = vpop.eup %4194 }
 0xb91   :  { %v2480_v33 = vsub.f32 1.0, %v2479_v32  ;;  %v2497_v38 = vadd.f32 1.0, %v4195_v50 }
 0xb93   :  { %v2481_v40 = vmul.f32 %v4191_v31, %v2480_v33  ;;  %4196 = vrcp.f32 %v2497_v38  ;;  %v2509_v17 = vand.u32 2147483648, %v2497_v38  ;;  %vm2503_vm3 = vweird.f32 %v2497_v38 }
 0xb95   :  { %v2482_v44 = vadd.f32 %v4191_v31, %v2481_v40  ;;  %v2510_v51 = vor.u32 1.1754944e-38, %v2509_v17 }
 0xb97   :  { %v2486_v52 = vsel %vm2485_vm0, %v4191_v31, %v2482_v44 }
 0xb98   :  { %v2491_v27 = vsel %vm2488_vm1, %v2490_v34, %v2486_v52 }
 0xb99   :  { %v2517_v24 = vmul.f32 %v4193_v25, %v2491_v27  ;;  %v2516_v46 = vmul.f32 %v2514_v53, %v2491_v27  ;;  %v4197_v45 = vpop.eup %4196 }
 0xb9a   :  { %v2499_v2 = vmul.f32 %v4197_v45, %v2497_v38  ;;  %vm2504_vm2 = vweird.f32 %v4197_v45 }
 0xb9b   :  { %2519 = vrot.lane.b32.xlu0 %v2517_v24, %s4444_s9  ;;  %vm2505_vm4 = vmor %vm2503_vm3, %vm2504_vm2  ;;  %vm2171_vm2 = vcmask 523270   ;;  %vm2695_vm3 = vcmask 261120  }
 0xb9c   :  { %v2500_v47 = vsub.f32 1.0, %v2499_v2 }
 0xb9e   :  { %v2501_v41 = vmul.f32 %v4197_v45, %v2500_v47 }
 0xba0   :  { %v2502_v54 = vadd.f32 %v4197_v45, %v2501_v41 }
 0xba2   :  { %v2506_v55 = vsel %vm2505_vm4, %v4197_v45, %v2502_v54 }
 0xba3   :  { %2404 = vrot.lane.b32.xlu0 %v2402_v7, %s4444_s9  ;;  %v2531_v7 = vld [vmem:[#allocation4 + $0x18] sm:$0xc0] }
 0xba4   :  { %v2541_v8 = vadd.f32 %v2537_v6, %v2531_v7 }
 0xbab   :  { %1922 = vrot.lane.b32.xlu0 %v5098_v37, %s4444_s9  ;;  %v2507_v37 = vand.u32 2147483647, %v2497_v38 }
 0xbad   :  { %vm2508_vm6 = vcmp.eq.f32.partialorder %v2507_v37, 8.507059e+37  ;;  %v2663_v37 = vld [vmem:[%s5574_s10 + $0x30] sm:$0xff] }
 0xbae   :  { %v2511_v57 = vsel %vm2508_vm6, %v2510_v51, %v2506_v55  ;;  %v2661_v55 = vld [vmem:[%s5574_s10 + $0x20] sm:$0xff]  ;;  %4098 = vmatpush.msra.mxu3 %v2663_v37  ;;  %2764 = vmatpush.msra.mxu1 %v2663_v37  ;;  %v2659_v51 = vld [vmem:[%s5574_s10 + $0x10] sm:$0xff] }
 0xbb0   :  { %4099 = vmatpush.msra.mxu3 %v2661_v55  ;;  %2765 = vmatpush.msra.mxu1 %v2661_v55 }
 0xbb2   :  { %4100 = vmatpush.msra.mxu3 %v2659_v51  ;;  %2766 = vmatpush.msra.mxu1 %v2659_v51 }
 0xc0d   :  { %v2520_v48 = vpop.permute.xlu0 %2519 }
 0xc0e   :  { %v5169_v49 = vadd.f32 %v2520_v48, %v2516_v46 }
 0xc10   :  { %4198 = vtanh.f32 %v5169_v49  ;;  %v2636_v33 = vrot.slane %v5169_v49, 6 }
 0xc15   :  { %v2405_v56 = vpop.permute.xlu0 %2404 }
 0xc16   :  { %v4199_v39 = vpop.eup %4198  ;;  %2407 = vst.msk [vmem:[#allocation2 + $0x8] sm:$0xc] %vm1925_vm5, %v2405_v56 }
 0xc17   :  { %2408 = vst.msk [vmem:[#allocation3 + $0x2] sm:$0xc] %vm1925_vm5, %v2405_v56  ;;  %v2524_v59 = vmul.f32 %v4199_v39, %v2511_v57  ;;  %v2664_v56 = vld [vmem:[%s5574_s10 + $0x38] sm:$0xff]  ;;  %v2662_v39 = vld [vmem:[%s5574_s10 + $0x28] sm:$0xff] }
 0xc18   :  { %v2660_v57 = vld [vmem:[%s5574_s10 + $0x18] sm:$0xff] }
 0xc19   :  { %v2543_v61 = vrot.slane %v2524_v59, 4 }
 0xc1b   :  { %2544 = vrot.lane.b32.xlu1 %v2543_v61, %s4444_s9  ;;  %v2679_v61 = vld [vmem:[#allocation11 + $0x30] sm:$0xff] }
 0xc1d   :  { %v1923_v62 = vpop.permute.xlu0 %1922 }
 0xc1e   :  { %1926 = vst.msk [vmem:[#allocation2] sm:$0xc] %vm1925_vm5, %v1923_v62 }
 0xc1f   :  { %1927 = vst.msk [vmem:[#allocation3 + $0xa] sm:$0xc] %vm1925_vm5, %v1923_v62  ;;  %v2677_v62 = vld [vmem:[#allocation11 + $0x20] sm:$0xff] }
 0xc23   :  { %2526 = vrot.lane.b32.xlu1 %v2524_v59, %s4444_s9  ;;  %v2658_v59 = vld [vmem:[%s5574_s10 + $0x8] sm:$0xff] }
 0xc2b   :  { %2045 = vrot.lane.b32.xlu1 %v5125_v26, %s4444_s9 }
 0xc8d   :  { %v2545_v63 = vpop.permute.xlu1 %2544 }
 0xc8e   :  { %4060 = vmatmul.msk.f32.vlgmr.msrb.gmra.mxu1 %vm1707_vm15, %v2545_v63  ;;  %4061 = vmatmul.msk.f32.vlgmr.msrb.gmra.mxu3 %vm1707_vm15, %v2545_v63  ;;  %v2675_v63 = vld [vmem:[#allocation11 + $0x10] sm:$0xff] }
 0xc95   :  { %v2527_v3 = vpop.permute.xlu1 %2526 }
 0xc96   :  { %2529 = vst.msk [vmem:[#allocation2 + $0x8] sm:$0x30] %vm2048_vm7, %v2527_v3 }
 0xc97   :  { %2530 = vst.msk [vmem:[#allocation3 - $0x2] sm:$0x30] %vm2048_vm7, %v2527_v3  ;;  %v2673_v3 = vld [vmem:[#allocation11] sm:$0xff] }
 0xc9d   :  { %v2046_v4 = vpop.permute.xlu1 %2045 }
 0xc9e   :  { %2049 = vst.msk [vmem:[#allocation2] sm:$0x30] %vm2048_vm7, %v2046_v4 }
 0xc9f   :  { %2050 = vst.msk [vmem:[#allocation3 + $0x6] sm:$0x30] %vm2048_vm7, %v2046_v4 }
 0xd0b   :  { %v2565_v26 = vpop.f32.mrf.mxu1 }
 0xd0c   :  { %v2590_v60 = vrot.slane %v2565_v26, 2  ;;  %v2678_v26 = vld [vmem:[#allocation11 + $0x28] sm:$0xff] }
 0xd0e   :  { %v2594_v9 = vadd.f32 %v2590_v60, %v2541_v8  ;;  %v2671_v60 = vld [vmem:[%s5574_s10 + $0x70] sm:$0xff] }
 0xd0f   :  { %2712 = vmatpush.msrb.mxu0 %v2671_v60 }
 0xd10   :  { %v2596_v11 = vsub.f32 0.0, %v2594_v9  ;;  %v2672_v9 = vld [vmem:[%s5574_s10 + $0x78] sm:$0xff] }
 0xd11   :  { %v2585_v20 = vpop.f32.mrf.mxu3  ;;  %2735 = vmatpush.msra.mxu2 %v2672_v9 }
 0xd12   :  { %v2597_v12 = vmul.f32 1.442695, %v2596_v11  ;;  %v2591_v18 = vrot.slane %v2585_v20, 2  ;;  %v2669_v11 = vld [vmem:[%s5574_s10 + $0x60] sm:$0xff]  ;;  %v2674_v20 = vld [vmem:[#allocation11 + $0x8] sm:$0xff] }
 0xd13   :  { %2713 = vmatpush.msrb.mxu0 %v2669_v11 }
 0xd14   :  { %4200 = vpow2.f32 %v2597_v12  ;;  %v2595_v23 = vadd.f32 %v2591_v18, %v2542_v43  ;;  %v2670_v12 = vld [vmem:[%s5574_s10 + $0x68] sm:$0xff] }
 0xd15   :  { %2736 = vmatpush.msra.mxu2 %v2670_v12  ;;  %2714 = vmatpush.msrb.mxu0 %v2667_v14 }
 0xd16   :  { %v2616_v53 = vsub.f32 0.0, %v2595_v23 }
 0xd17   :  { %2715 = vmatpush.msrb.mxu0 %v2665_v16 }
 0xd18   :  { %v2617_v52 = vmul.f32 1.442695, %v2616_v53  ;;  %v5273_v53 = vld [vmem:[#allocation13 + $0x48] sm:$0xff] }
 0xd1a   :  { %v4201_v13 = vpop.eup %4200 }
 0xd1b   :  { %v2599_v15 = vadd.f32 1.0, %v4201_v13  ;;  %v2676_v13 = vld [vmem:[#allocation11 + $0x18] sm:$0xff] }
 0xd1d   :  { %4202 = vrcp.f32 %v2599_v15  ;;  %v2611_v29 = vand.u32 2147483648, %v2599_v15  ;;  %v2609_v31 = vand.u32 2147483647, %v2599_v15  ;;  %vm2605_vm9 = vweird.f32 %v2599_v15 }
 0xd1e   :  { %4204 = vtanh.f32 %v2595_v23  ;;  %v2685_v23 = vld [vmem:[#allocation11 + $0x60] sm:$0xff] }
 0xd1f   :  { %v2612_v32 = vor.u32 1.1754944e-38, %v2611_v29  ;;  %vm2610_vm11 = vcmp.eq.f32.partialorder %v2609_v31, 8.507059e+37  ;;  %4206 = vpow2.f32 %v2617_v52  ;;  %v2686_v29 = vld [vmem:[#allocation11 + $0x68] sm:$0xff]  ;;  %v2684_v31 = vld [vmem:[#allocation11 + $0x58] sm:$0xff] }
 0xd23   :  { %v4203_v22 = vpop.eup %4202 }
 0xd24   :  { %v2601_v58 = vmul.f32 %v4203_v22, %v2599_v15  ;;  %vm2606_vm8 = vweird.f32 %v4203_v22  ;;  %v4205_v40 = vpop.eup %4204  ;;  %v2668_v15 = vld [vmem:[%s5574_s10 + $0x58] sm:$0xff] }
 0xd25   :  { %vm2607_vm10 = vmor %vm2605_vm9, %vm2606_vm8  ;;  %v4207_v25 = vpop.eup %4206  ;;  %2737 = vmatpush.msra.mxu2 %v2668_v15 }
 0xd26   :  { %v2602_v28 = vsub.f32 1.0, %v2601_v58  ;;  %v2619_v27 = vadd.f32 1.0, %v4207_v25  ;;  %v2683_v58 = vld [vmem:[#allocation11 + $0x50] sm:$0xff] }
 0xd27   :  { %2738 = vmatpush.msra.mxu2 %v2666_v19  ;;  %v5281_v25 = vld [vmem:[#allocation13 + $0x30] sm:$0xff] }
 0xd28   :  { %v2603_v30 = vmul.f32 %v4203_v22, %v2602_v28  ;;  %4208 = vrcp.f32 %v2619_v27  ;;  %v2631_v2 = vand.u32 2147483648, %v2619_v27  ;;  %vm2625_vm13 = vweird.f32 %v2619_v27  ;;  %v2688_v28 = vld [vmem:[#allocation11 + $0x78] sm:$0xff] }
 0xd29   :  { %v2629_v47 = vand.u32 2147483647, %v2619_v27  ;;  %2847 = vmatpush.msrb.mxu2 %v2688_v28 }
 0xd2a   :  { %v2604_v21 = vadd.f32 %v4203_v22, %v2603_v30  ;;  %v2632_v48 = vor.u32 1.1754944e-38, %v2631_v2  ;;  %v2681_v30 = vld [vmem:[#allocation11 + $0x40] sm:$0xff]  ;;  %v2798_v2 = vld [vmem:[%s5577_s13] sm:$0x3] }
 0xd2b   :  { %vm2630_vm1 = vcmp.eq.f32.partialorder %v2629_v47, 8.507059e+37  ;;  %2848 = vmatpush.msrb.mxu2 %v2686_v29  ;;  %v2801_v37 = vperm.slane %v2798_v2, 1 }
 0xd2c   :  { %v2608_v10 = vsel %vm2607_vm10, %v4203_v22, %v2604_v21  ;;  %v2687_v22 = vld [vmem:[#allocation11 + $0x70] sm:$0xff]  ;;  %v2682_v21 = vld [vmem:[#allocation11 + $0x48] sm:$0xff] }
 0xd2d   :  { %v2613_v42 = vsel %vm2610_vm11, %v2612_v32, %v2608_v10  ;;  %2824 = vmatpush.msra.mxu0 %v2687_v22  ;;  %2849 = vmatpush.msrb.mxu2 %v2684_v31  ;;  %v5253_v32 = vld [vmem:[#allocation13 + $0x70] sm:$0xff]  ;;  %v5259_v10 = vld [vmem:[#allocation13 + $0x60] sm:$0xff] }
 0xd2e   :  { %v2639_v44 = vmul.f32 %v4205_v40, %v2613_v42  ;;  %v2638_v34 = vmul.f32 %v2636_v33, %v2613_v42  ;;  %v4209_v24 = vpop.eup %4208  ;;  %v5255_v33 = vld [vmem:[#allocation13 + $0x78] sm:$0xff]  ;;  %v5261_v40 = vld [vmem:[#allocation13 + $0x68] sm:$0xff]  ;;  %v5265_v42 = vld [vmem:[#allocation13 + $0x50] sm:$0xff] }
 0xd2f   :  { %v2621_v46 = vmul.f32 %v4209_v24, %v2619_v27  ;;  %vm2626_vm12 = vweird.f32 %v4209_v24  ;;  %2825 = vmatpush.msra.mxu0 %v2685_v23  ;;  %2850 = vmatpush.msrb.mxu2 %v2682_v21  ;;  %v5283_v27 = vld [vmem:[#allocation13 + $0x38] sm:$0xff] }
 0xd30   :  { %2641 = vrot.lane.b32.xlu2 %v2639_v44, %s4444_s9  ;;  %vm2627_vm0 = vmor %vm2625_vm13, %vm2626_vm12  ;;  %v5267_v44 = vld [vmem:[#allocation13 + $0x58] sm:$0xff] }
 0xd31   :  { %v2622_v35 = vsub.f32 1.0, %v2621_v46  ;;  %2826 = vmatpush.msra.mxu0 %v2683_v58  ;;  %v5291_v46 = vld [vmem:[#allocation13 + $0x28] sm:$0xff] }
 0xd33   :  { %v2623_v36 = vmul.f32 %v4209_v24, %v2622_v35  ;;  %2827 = vmatpush.msra.mxu0 %v2681_v30  ;;  %v5297_v35 = vld [vmem:[#allocation13 + $0x10] sm:$0xff] }
 0xd35   :  { %v2624_v45 = vadd.f32 %v4209_v24, %v2623_v36  ;;  %v5299_v36 = vld [vmem:[#allocation13 + $0x18] sm:$0xff] }
 0xd37   :  { %v2628_v41 = vsel %vm2627_vm0, %v4209_v24, %v2624_v45  ;;  %v5289_v24 = vld [vmem:[#allocation13 + $0x20] sm:$0xff]  ;;  %v5311_v45 = vld [vmem:[#allocation13 + $0x8] sm:$0xff] }
 0xd38   :  { %v2633_v54 = vsel %vm2630_vm1, %v2632_v48, %v2628_v41  ;;  %v2800_v41 = vperm.slane %v2798_v2, 0 }
 0xd8a   :  { %v2642_v50 = vpop.permute.xlu2 %2641 }
 0xd8b   :  { %v2644_v38 = vadd.f32 %v2642_v50, %v2638_v34  ;;  %v5271_v34 = vld [vmem:[#allocation13 + $0x40] sm:$0xff] }
 0xd8d   :  { %4210 = vtanh.f32 %v2644_v38  ;;  %v5309_v38 = vld [vmem:[#allocation13] sm:$0xff] }
 0xd93   :  { %v4211_v49 = vpop.eup %4210 }
 0xd94   :  { %v2646_v17 = vmul.f32 %v4211_v49, %v2633_v54 }
 0xd96   :  { %2648 = vrot.lane.b32.xlu2 %v2646_v17, %s4444_s9 }
 0xd9e   :  { %2168 = vrot.lane.b32.xlu2 %v5149_v0, %s4444_s9  ;;  %v2657_v0 = vld [vmem:[%s5574_s10] sm:$0xff] }
 0xd9f   :  { %4101 = vmatpush.msra.mxu3 %v2657_v0  ;;  %2767 = vmatpush.msra.mxu1 %v2657_v0 }
 0xda1   :  { %2787 = vmatpush.msrb.mxu3 %v2664_v56  ;;  %2870 = vmatpush.msrb.mxu1 %v2679_v61  ;;  %v2904_v61 = vld [vmem:[%s5578_s14] sm:$0x3] }
 0xda2   :  { %v2907_v60 = vperm.slane %v2904_v61, 1 }
 0xda3   :  { %2788 = vmatpush.msrb.mxu3 %v2662_v39  ;;  %2871 = vmatpush.msrb.mxu1 %v2677_v62 }
 0xda5   :  { %2789 = vmatpush.msrb.mxu3 %v2660_v57  ;;  %2872 = vmatpush.msrb.mxu1 %v2675_v63 }
 0xda7   :  { %2790 = vmatpush.msrb.mxu3 %v2658_v59  ;;  %2873 = vmatpush.msrb.mxu1 %v2673_v3 }
 0xdf0   :  { %v2649_v4 = vpop.permute.xlu2 %2648 }
 0xdf1   :  { %2651 = vst.msk [vmem:[#allocation2 + $0x8] sm:$0xc0] %vm2171_vm2, %v2649_v4 }
 0xdf2   :  { %2652 = vst.msk [vmem:[#allocation3 - $0x6] sm:$0xc0] %vm2171_vm2, %v2649_v4  ;;  %v2906_v4 = vperm.slane %v2904_v61, 0 }
 0xdf8   :  { %v2169_v6 = vpop.permute.xlu2 %2168  ;;  %v2654_v7 = vld [vmem:[#allocation2 + $0x8] sm:$0xff] }
 0xdf9   :  { %2172 = vst.msk [vmem:[#allocation2] sm:$0xc0] %vm2171_vm2, %v2169_v6  ;;  %v2655_v8 = vld [vmem:[#allocation3] sm:$0xff]  ;;  %4067 = vmatmul.msk.f32.vlgmr.msra.gmra.mxu3 %vm2695_vm3, %v2654_v7 }
 0xdfa   :  { %2173 = vst.msk [vmem:[#allocation3 + $0x2] sm:$0xc0] %vm2171_vm2, %v2169_v6  ;;  %2691 = vrot.lane.b32.xlu0 %v2655_v8, %s4445_s8  ;;  %2893 = vmatpush.msra.mxu3 %v2680_v5 }
 0xdfc   :  { %2894 = vmatpush.msra.mxu3 %v2678_v26 }
 0xdfe   :  { %2895 = vmatpush.msra.mxu3 %v2676_v13 }
 0xe00   :  { %v2653_v18 = vld [vmem:[#allocation2] sm:$0xff]  ;;  %2896 = vmatpush.msra.mxu3 %v2674_v20 }
 0xe01   :  { %v2656_v43 = vld [vmem:[#allocation3 + $0x8] sm:$0xff]  ;;  %4066 = vmatmul.msk.f32.vlgmr.msra.gmra.mxu1 %vm2695_vm3, %v2653_v18  ;;  %4068 = vmatmul.msk.f32.vlgmr.msrb.gmra.mxu3 %vm2695_vm3, %v2653_v18 }
 0xe02   :  { %2693 = vrot.lane.b32.xlu1 %v2656_v43, %s4445_s8  ;;  %3064 = vmatpush.msra.mxu1 %v5253_v32 }
 0xe03   :  { %3084 = vmatpush.msrb.mxu3 %v5255_v33 }
 0xe04   :  { %3065 = vmatpush.msra.mxu1 %v5259_v10 }
 0xe05   :  { %3085 = vmatpush.msrb.mxu3 %v5261_v40 }
 0xe06   :  { %3066 = vmatpush.msra.mxu1 %v5265_v42 }
 0xe07   :  { %3086 = vmatpush.msrb.mxu3 %v5267_v44 }
 0xe08   :  { %3067 = vmatpush.msra.mxu1 %v5271_v34 }
 0xe09   :  { %4069 = vmatmul.msk.f32.gmra.mxu3 %vm2695_vm3, %v2654_v7  ;;  %4074 = vmatmul.msk.f32.vlgmr.msrb.gmra.mxu1 %vm2695_vm3, %v2653_v18 }
 0xe0a   :  { %3087 = vmatpush.msrb.mxu3 %v5273_v53  ;;  %3068 = vmatpush.msra.mxu1 %v5281_v25 }
 0xe0c   :  { %3088 = vmatpush.msrb.mxu3 %v5283_v27  ;;  %3069 = vmatpush.msra.mxu1 %v5289_v24 }
 0xe0e   :  { %3089 = vmatpush.msrb.mxu3 %v5291_v46  ;;  %3070 = vmatpush.msra.mxu1 %v5297_v35 }
 0xe10   :  { %3090 = vmatpush.msrb.mxu3 %v5299_v36  ;;  %3071 = vmatpush.msra.mxu1 %v5309_v38 }
 0xe11   :  { %4075 = vmatmul.msk.f32.gmra.mxu1 %vm2695_vm3, %v2654_v7  ;;  %4076 = vmatmul.msk.f32.vlgmr.msra.gmra.mxu3 %vm2695_vm3, %v2653_v18 }
 0xe12   :  { %3091 = vmatpush.msrb.mxu3 %v5311_v45  ;;  %3308 = vmatpush.msrb.mxu1 %v5253_v32 }
 0xe14   :  { %3328 = vmatpush.msra.mxu3 %v5255_v33  ;;  %3309 = vmatpush.msrb.mxu1 %v5259_v10 }
 0xe16   :  { %3329 = vmatpush.msra.mxu3 %v5261_v40  ;;  %3310 = vmatpush.msrb.mxu1 %v5265_v42 }
 0xe18   :  { %3330 = vmatpush.msra.mxu3 %v5267_v44  ;;  %3311 = vmatpush.msrb.mxu1 %v5271_v34 }
 0xe19   :  { %4077 = vmatmul.msk.f32.gmra.mxu3 %vm2695_vm3, %v2654_v7 }
 0xe1a   :  { %3331 = vmatpush.msra.mxu3 %v5273_v53  ;;  %3312 = vmatpush.msrb.mxu1 %v5281_v25 }
 0xe1c   :  { %3332 = vmatpush.msra.mxu3 %v5283_v27  ;;  %3313 = vmatpush.msrb.mxu1 %v5289_v24 }
 0xe1e   :  { %3333 = vmatpush.msra.mxu3 %v5291_v46  ;;  %3314 = vmatpush.msrb.mxu1 %v5297_v35 }
 0xe20   :  { %3334 = vmatpush.msra.mxu3 %v5299_v36  ;;  %3315 = vmatpush.msrb.mxu1 %v5309_v38 }
 0xe22   :  { %3335 = vmatpush.msra.mxu3 %v5311_v45 }
 0xe6c   :  { %v2692_v52 = vpop.permute.xlu0 %2691 }
 0xe6d   :  { %4062 = vmatmul.msk.f32.vlgmr.msrb.gmra.mxu0 %vm2695_vm3, %v2692_v52  ;;  %4064 = vmatmul.msk.f32.vlgmr.msra.gmra.mxu2 %vm2695_vm3, %v2692_v52 }
 0xe6e   :  { %2954 = vmatpush.msrb.mxu0 %v5253_v32  ;;  %2974 = vmatpush.msra.mxu2 %v5255_v33 }
 0xe70   :  { %2955 = vmatpush.msrb.mxu0 %v5259_v10  ;;  %2975 = vmatpush.msra.mxu2 %v5261_v40 }
 0xe72   :  { %2956 = vmatpush.msrb.mxu0 %v5265_v42  ;;  %2976 = vmatpush.msra.mxu2 %v5267_v44 }
 0xe74   :  { %v2694_v50 = vpop.permute.xlu1 %2693  ;;  %2957 = vmatpush.msrb.mxu0 %v5271_v34  ;;  %2977 = vmatpush.msra.mxu2 %v5273_v53 }
 0xe75   :  { %4063 = vmatmul.msk.f32.gmra.mxu0 %vm2695_vm3, %v2694_v50  ;;  %4065 = vmatmul.msk.f32.gmra.mxu2 %vm2695_vm3, %v2694_v50 }
 0xe76   :  { %2958 = vmatpush.msrb.mxu0 %v5281_v25  ;;  %2978 = vmatpush.msra.mxu2 %v5283_v27 }
 0xe78   :  { %2959 = vmatpush.msrb.mxu0 %v5289_v24  ;;  %2979 = vmatpush.msra.mxu2 %v5291_v46 }
 0xe7a   :  { %2960 = vmatpush.msrb.mxu0 %v5297_v35  ;;  %2980 = vmatpush.msra.mxu2 %v5299_v36 }
 0xe7c   :  { %2961 = vmatpush.msrb.mxu0 %v5309_v38  ;;  %2981 = vmatpush.msra.mxu2 %v5311_v45 }
 0xe7d   :  { %4070 = vmatmul.msk.f32.vlgmr.msra.gmra.mxu0 %vm2695_vm3, %v2692_v52  ;;  %4072 = vmatmul.msk.f32.vlgmr.msrb.gmra.mxu2 %vm2695_vm3, %v2692_v52 }
 0xe7e   :  { %3186 = vmatpush.msra.mxu0 %v5253_v32  ;;  %3206 = vmatpush.msrb.mxu2 %v5255_v33  ;;  %v2769_v47 = vpop.f32.mrf.mxu1 }
 0xe80   :  { %3187 = vmatpush.msra.mxu0 %v5259_v10  ;;  %3207 = vmatpush.msrb.mxu2 %v5261_v40 }
 0xe82   :  { %3188 = vmatpush.msra.mxu0 %v5265_v42  ;;  %3208 = vmatpush.msrb.mxu2 %v5267_v44 }
 0xe84   :  { %3189 = vmatpush.msra.mxu0 %v5271_v34  ;;  %3209 = vmatpush.msrb.mxu2 %v5273_v53 }
 0xe85   :  { %4071 = vmatmul.msk.f32.gmra.mxu0 %vm2695_vm3, %v2694_v50  ;;  %4073 = vmatmul.msk.f32.gmra.mxu2 %vm2695_vm3, %v2694_v50 }
 0xe86   :  { %3190 = vmatpush.msra.mxu0 %v5281_v25  ;;  %3210 = vmatpush.msrb.mxu2 %v5283_v27  ;;  %v2875_v62 = vpop.f32.mrf.mxu1 }
 0xe88   :  { %3191 = vmatpush.msra.mxu0 %v5289_v24  ;;  %3211 = vmatpush.msrb.mxu2 %v5291_v46 }
 0xe8a   :  { %3192 = vmatpush.msra.mxu0 %v5297_v35  ;;  %3212 = vmatpush.msrb.mxu2 %v5299_v36 }
 0xe8c   :  { %3193 = vmatpush.msra.mxu0 %v5309_v38  ;;  %3213 = vmatpush.msrb.mxu2 %v5311_v45 }
 0xe8d   :  { %2962 = vmatmul.f32.vlgmr.msrb.gmra.mxu0 %v4443_v1  ;;  %2982 = vmatmul.f32.vlgmr.msra.gmra.mxu2 %v4443_v1  ;;  %v2772_v1 = vpop.f32.mrf.mxu3 }
 0xe8e   :  { %3430 = vmatpush.msrb.mxu0 %v5253_v32  ;;  %3450 = vmatpush.msra.mxu2 %v5255_v33  ;;  %v2878_v12 = vpop.f32.mrf.mxu1 }
 0xe90   :  { %3431 = vmatpush.msrb.mxu0 %v5259_v10  ;;  %3451 = vmatpush.msra.mxu2 %v5261_v40 }
 0xe92   :  { %3432 = vmatpush.msrb.mxu0 %v5265_v42  ;;  %3452 = vmatpush.msra.mxu2 %v5267_v44 }
 0xe94   :  { %3433 = vmatpush.msrb.mxu0 %v5271_v34  ;;  %3453 = vmatpush.msra.mxu2 %v5273_v53 }
 0xe95   :  { %v2792_v48 = vpop.f32.mrf.mxu3 }
 0xe96   :  { %3434 = vmatpush.msrb.mxu0 %v5281_v25  ;;  %3454 = vmatpush.msra.mxu2 %v5283_v27 }
 0xe98   :  { %3435 = vmatpush.msrb.mxu0 %v5289_v24  ;;  %3455 = vmatpush.msra.mxu2 %v5291_v46 }
 0xe9a   :  { %3436 = vmatpush.msrb.mxu0 %v5297_v35  ;;  %3456 = vmatpush.msra.mxu2 %v5299_v36 }
 0xe9c   :  { %3437 = vmatpush.msrb.mxu0 %v5309_v38  ;;  %3457 = vmatpush.msra.mxu2 %v5311_v45 }
 0xe9d   :  { %v2795_v57 = vpop.f32.mrf.mxu3 }
 0xea5   :  { %v2898_v8 = vpop.f32.mrf.mxu3 }
 0xead   :  { %v2901_v16 = vpop.f32.mrf.mxu3 }
 0xeea   :  { %v2717_v49 = vpop.f32.mrf.mxu0 }
 0xeeb   :  { %v2770_v54 = vadd.f32 %v2769_v47, %v2717_v49 }
 0xeed   :  { %v2804_v17 = vadd.f32 %v2800_v41, %v2770_v54 }
 0xeef   :  { %2808 = vst [vmem:[#allocation4 + $0x10] sm:$0xff] %v2804_v17 }
 0xef0   :  { %v2740_v55 = vpop.f32.mrf.mxu2 }
 0xef1   :  { %v2793_v51 = vadd.f32 %v2792_v48, %v2740_v55 }
 0xef2   :  { %v2720_v0 = vpop.f32.mrf.mxu0 }
 0xef3   :  { %v2805_v56 = vadd.f32 %v2801_v37, %v2793_v51  ;;  %v2773_v39 = vadd.f32 %v2772_v1, %v2720_v0 }
 0xef5   :  { %2809 = vst [vmem:[#allocation4] sm:$0xff] %v2805_v56  ;;  %v2806_v59 = vadd.f32 %v2800_v41, %v2773_v39 }
 0xef6   :  { %v2934_v58 = vld [vmem:[#allocation4 + $0x10] sm:$0x3] }
 0xef7   :  { %2810 = vst [vmem:[#allocation4 + $0x18] sm:$0xff] %v2806_v59 }
 0xef8   :  { %v2743_v63 = vpop.f32.mrf.mxu2 }
 0xef9   :  { %v2796_v3 = vadd.f32 %v2795_v57, %v2743_v63 }
 0xefa   :  { %v2829_v5 = vpop.f32.mrf.mxu0 }
 0xefb   :  { %v2807_v6 = vadd.f32 %v2801_v37, %v2796_v3  ;;  %v2876_v7 = vadd.f32 %v2875_v62, %v2829_v5 }
 0xefc   :  { %v2935_v47 = vld [vmem:[#allocation4] sm:$0x3] }
 0xefd   :  { %2811 = vst [vmem:[#allocation4 + $0x8] sm:$0xff] %v2807_v6  ;;  %v2910_v26 = vadd.f32 %v2906_v4, %v2876_v7 }
 0xeff   :  { %2914 = vst [vmem:[#allocation5] sm:$0xff] %v2910_v26 }
 0xf00   :  { %v2852_v9 = vpop.f32.mrf.mxu2 }
 0xf01   :  { %v2899_v11 = vadd.f32 %v2898_v8, %v2852_v9 }
 0xf02   :  { %v2832_v13 = vpop.f32.mrf.mxu0 }
 0xf03   :  { %v2911_v14 = vadd.f32 %v2907_v60, %v2899_v11  ;;  %v2879_v15 = vadd.f32 %v2878_v12, %v2832_v13 }
 0xf05   :  { %2915 = vst [vmem:[#allocation5 + $0x18] sm:$0xff] %v2911_v14  ;;  %v2912_v20 = vadd.f32 %v2906_v4, %v2879_v15 }
 0xf07   :  { %2916 = vst [vmem:[#allocation5 + $0x8] sm:$0xff] %v2912_v20 }
 0xf08   :  { %v2855_v18 = vpop.f32.mrf.mxu2 }
 0xf09   :  { %v2902_v19 = vadd.f32 %v2901_v16, %v2855_v18 }
 0xf0a   :  { %v2963_v28 = vpop.f32.mrf.mxu0 }
 0xf0b   :  { %v2913_v43 = vadd.f32 %v2907_v60, %v2902_v19 }
 0xf0d   :  { %2917 = vst [vmem:[#allocation5 + $0x10] sm:$0xff] %v2913_v43 }
 0xf0e   :  { %v2936_v22 = vld [vmem:[#allocation5 + $0x8] sm:$0xc0] }
 0xf0f   :  { %v2940_v23 = vrot.slane %v2936_v22, 6  ;;  %v3044_v22 = vld [vmem:[#allocation5 + $0x8] sm:$0x30] }
 0xf10   :  { %v2983_v48 = vpop.f32.mrf.mxu2 }
 0xf11   :  { %v2944_v29 = vadd.f32 %v2940_v23, %v2934_v58  ;;  %v3048_v23 = vrot.slane %v3044_v22, 2  ;;  %v3042_v58 = vld [vmem:[#allocation4 + $0x10] sm:$0xc] }
 0xf13   :  { %v2986_v30 = vadd.f32 %v2963_v28, %v2944_v29  ;;  %v3052_v29 = vadd.f32 %v3048_v23, %v3042_v58 }
 0xf14   :  { %v2937_v52 = vld [vmem:[#allocation5 + $0x10] sm:$0xc0] }
 0xf15   :  { %v2988_v31 = vsub.f32 0.0, %v2986_v30  ;;  %v2941_v2 = vrot.slane %v2937_v52, 6 }
 0xf17   :  { %v2989_v21 = vmul.f32 1.442695, %v2988_v31  ;;  %v2945_v41 = vadd.f32 %v2941_v2, %v2935_v47 }
 0xf19   :  { %4212 = vpow2.f32 %v2989_v21  ;;  %v2987_v54 = vadd.f32 %v2983_v48, %v2945_v41 }
 0xf1b   :  { %v3008_v63 = vsub.f32 0.0, %v2987_v54 }
 0xf1d   :  { %v3009_v3 = vmul.f32 1.442695, %v3008_v63 }
 0xf1f   :  { %v4213_v50 = vpop.eup %4212 }
 0xf20   :  { %v2991_v1 = vadd.f32 1.0, %v4213_v50 }
 0xf22   :  { %4214 = vrcp.f32 %v2991_v1  ;;  %v3003_v55 = vand.u32 2147483648, %v2991_v1  ;;  %v3001_v0 = vand.u32 2147483647, %v2991_v1  ;;  %vm2997_vm6 = vweird.f32 %v2991_v1 }
 0xf23   :  { %4216 = vtanh.f32 %v2987_v54 }
 0xf24   :  { %v3004_v39 = vor.u32 1.1754944e-38, %v3003_v55  ;;  %vm3002_vm9 = vcmp.eq.f32.partialorder %v3001_v0, 8.507059e+37  ;;  %4218 = vpow2.f32 %v3009_v3 }
 0xf28   :  { %v4215_v49 = vpop.eup %4214 }
 0xf29   :  { %v2993_v17 = vmul.f32 %v4215_v49, %v2991_v1  ;;  %vm2998_vm4 = vweird.f32 %v4215_v49  ;;  %v4217_v59 = vpop.eup %4216  ;;  %v3045_v1 = vld [vmem:[#allocation5 + $0x10] sm:$0x30] }
 0xf2a   :  { %vm2999_vm8 = vmor %vm2997_vm6, %vm2998_vm4  ;;  %v4219_v4 = vpop.eup %4218  ;;  %v3049_v41 = vrot.slane %v3045_v1, 2 }
 0xf2b   :  { %v2994_v37 = vsub.f32 1.0, %v2993_v17  ;;  %v3011_v5 = vadd.f32 1.0, %v4219_v4 }
 0xf2d   :  { %v2995_v51 = vmul.f32 %v4215_v49, %v2994_v37  ;;  %4220 = vrcp.f32 %v3011_v5  ;;  %v3023_v13 = vand.u32 2147483648, %v3011_v5  ;;  %vm3017_vm11 = vweird.f32 %v3011_v5 }
 0xf2e   :  { %v3021_v14 = vand.u32 2147483647, %v3011_v5 }
 0xf2f   :  { %v2996_v56 = vadd.f32 %v4215_v49, %v2995_v51  ;;  %v3024_v20 = vor.u32 1.1754944e-38, %v3023_v13 }
 0xf30   :  { %vm3022_vm13 = vcmp.eq.f32.partialorder %v3021_v14, 8.507059e+37 }
 0xf31   :  { %v3000_v57 = vsel %vm2999_vm8, %v4215_v49, %v2996_v56  ;;  %v3043_v49 = vld [vmem:[#allocation4] sm:$0xc] }
 0xf32   :  { %v3005_v61 = vsel %vm3002_vm9, %v3004_v39, %v3000_v57  ;;  %v3053_v54 = vadd.f32 %v3049_v41, %v3043_v49 }
 0xf33   :  { %v3028_v62 = vmul.f32 %v4217_v59, %v3005_v61  ;;  %v4221_v6 = vpop.eup %4220  ;;  %v3027_v60 = vmul.f32 0.0, %v3005_v61 }
 0xf34   :  { %v3013_v7 = vmul.f32 %v4221_v6, %v3011_v5  ;;  %vm3018_vm10 = vweird.f32 %v4221_v6 }
 0xf35   :  { %3030 = vrot.lane.b32.xlu2 %v3028_v62, %s4444_s9  ;;  %vm3019_vm12 = vmor %vm3017_vm11, %vm3018_vm10 }
 0xf36   :  { %v3014_v26 = vsub.f32 1.0, %v3013_v7 }
 0xf38   :  { %v3015_v8 = vmul.f32 %v4221_v6, %v3014_v26 }
 0xf3a   :  { %v3016_v12 = vadd.f32 %v4221_v6, %v3015_v8 }
 0xf3c   :  { %v3020_v15 = vsel %vm3019_vm12, %v4221_v6, %v3016_v12 }
 0xf3d   :  { %v3025_v18 = vsel %vm3022_vm13, %v3024_v20, %v3020_v15 }
 0xf8f   :  { %v3031_v9 = vpop.permute.xlu2 %3030 }
 0xf90   :  { %v5382_v11 = vadd.f32 %v3031_v9, %v3027_v60 }
 0xf92   :  { %4222 = vtanh.f32 %v5382_v11  ;;  %v3144_v61 = vrot.slane %v5382_v11, 6 }
 0xf98   :  { %v4223_v16 = vpop.eup %4222 }
 0xf99   :  { %v3035_v19 = vmul.f32 %v4223_v16, %v3025_v18 }
 0xf9b   :  { %3037 = vrot.lane.b32.xlu0 %v3035_v19, %s4444_s9 }
0x100d   :  { %v3038_v43 = vpop.permute.xlu0 %3037 }
0x100e   :  { %3040 = vst.msk [vmem:[#allocation2] sm:$0x3] %vm1805_vm14, %v3038_v43  ;;  %4078 = vmatmul.msk.f32.vlgmr.msra.gmra.mxu1 %vm1707_vm15, %v3038_v43  ;;  %4079 = vmatmul.msk.f32.vlgmr.msrb.gmra.mxu3 %vm1707_vm15, %v3038_v43 }
0x100f   :  { %3041 = vst.msk [vmem:[#allocation3 + $0xe] sm:$0x3] %vm1805_vm14, %v3038_v43  ;;  %3543 = vmatpush.msra.mxu1 %v5253_v32  ;;  %3563 = vmatpush.msrb.mxu3 %v5255_v33 }
0x1011   :  { %3544 = vmatpush.msra.mxu1 %v5259_v10  ;;  %3564 = vmatpush.msrb.mxu3 %v5261_v40 }
0x1013   :  { %3545 = vmatpush.msra.mxu1 %v5265_v42  ;;  %3565 = vmatpush.msrb.mxu3 %v5267_v44 }
0x1015   :  { %3546 = vmatpush.msra.mxu1 %v5271_v34  ;;  %3566 = vmatpush.msrb.mxu3 %v5273_v53 }
0x1017   :  { %3547 = vmatpush.msra.mxu1 %v5281_v25  ;;  %3567 = vmatpush.msrb.mxu3 %v5283_v27 }
0x1019   :  { %3548 = vmatpush.msra.mxu1 %v5289_v24  ;;  %3568 = vmatpush.msrb.mxu3 %v5291_v46 }
0x101b   :  { %3549 = vmatpush.msra.mxu1 %v5297_v35  ;;  %3569 = vmatpush.msrb.mxu3 %v5299_v36 }
0x101d   :  { %3550 = vmatpush.msra.mxu1 %v5309_v38  ;;  %3570 = vmatpush.msrb.mxu3 %v5311_v45 }
0x108b   :  { %v3073_v28 = vpop.f32.mrf.mxu1 }
0x108c   :  { %v3098_v30 = vrot.slane %v3073_v28, 6 }
0x108e   :  { %v3102_v31 = vadd.f32 %v3098_v30, %v3052_v29  ;;  %v3163_v29 = vld [vmem:[#allocation5 + $0x8] sm:$0xc] }
0x108f   :  { %v3167_v30 = vrot.slane %v3163_v29, 6 }
0x1090   :  { %v3104_v21 = vsub.f32 0.0, %v3102_v31  ;;  %v3161_v31 = vld [vmem:[#allocation4 + $0x10] sm:$0x30] }
0x1091   :  { %v3093_v47 = vpop.f32.mrf.mxu3 }
0x1092   :  { %v3105_v52 = vmul.f32 1.442695, %v3104_v21  ;;  %v3099_v48 = vrot.slane %v3093_v47, 6 }
0x1094   :  { %4224 = vpow2.f32 %v3105_v52  ;;  %v3103_v37 = vadd.f32 %v3099_v48, %v3053_v54  ;;  %v3171_v52 = vadd.f32 %v3167_v30, %v3161_v31  ;;  %v3164_v48 = vld [vmem:[#allocation5 + $0x10] sm:$0xc] }
0x1096   :  { %v3124_v6 = vsub.f32 0.0, %v3103_v37 }
0x1098   :  { %v3125_v7 = vmul.f32 1.442695, %v3124_v6 }
0x109a   :  { %v4225_v50 = vpop.eup %4224 }
0x109b   :  { %v3107_v2 = vadd.f32 1.0, %v4225_v50 }
0x109d   :  { %4226 = vrcp.f32 %v3107_v2  ;;  %v3119_v0 = vand.u32 2147483648, %v3107_v2  ;;  %v3117_v39 = vand.u32 2147483647, %v3107_v2  ;;  %vm3113_vm1 = vweird.f32 %v3107_v2 }
0x109e   :  { %4228 = vtanh.f32 %v3103_v37 }
0x109f   :  { %v3120_v59 = vor.u32 1.1754944e-38, %v3119_v0  ;;  %vm3118_vm6 = vcmp.eq.f32.partialorder %v3117_v39, 8.507059e+37  ;;  %4230 = vpow2.f32 %v3125_v7 }
0x10a3   :  { %v4227_v17 = vpop.eup %4226 }
0x10a4   :  { %v3109_v55 = vmul.f32 %v4227_v17, %v3107_v2  ;;  %vm3114_vm0 = vweird.f32 %v4227_v17  ;;  %v4229_v63 = vpop.eup %4228 }
0x10a5   :  { %vm3115_vm4 = vmor %vm3113_vm1, %vm3114_vm0  ;;  %v4231_v26 = vpop.eup %4230 }
0x10a6   :  { %v3110_v51 = vsub.f32 1.0, %v3109_v55  ;;  %v3127_v8 = vadd.f32 1.0, %v4231_v26  ;;  %v3162_v55 = vld [vmem:[#allocation4] sm:$0x30] }
0x10a8   :  { %v3111_v56 = vmul.f32 %v4227_v17, %v3110_v51  ;;  %4232 = vrcp.f32 %v3127_v8  ;;  %v3139_v20 = vand.u32 2147483648, %v3127_v8  ;;  %vm3133_vm9 = vweird.f32 %v3127_v8 }
0x10a9   :  { %v3137_v16 = vand.u32 2147483647, %v3127_v8 }
0x10aa   :  { %v3112_v57 = vadd.f32 %v4227_v17, %v3111_v56  ;;  %v3140_v19 = vor.u32 1.1754944e-38, %v3139_v20 }
0x10ab   :  { %vm3138_vm11 = vcmp.eq.f32.partialorder %v3137_v16, 8.507059e+37 }
0x10ac   :  { %v3116_v62 = vsel %vm3115_vm4, %v4227_v17, %v3112_v57  ;;  %v3168_v17 = vrot.slane %v3164_v48, 6 }
0x10ad   :  { %v3121_v3 = vsel %vm3118_vm6, %v3120_v59, %v3116_v62 }
0x10ae   :  { %v3147_v4 = vmul.f32 %v4229_v63, %v3121_v3  ;;  %v3146_v5 = vmul.f32 %v3144_v61, %v3121_v3  ;;  %v4233_v60 = vpop.eup %4232  ;;  %v3172_v51 = vadd.f32 %v3168_v17, %v3162_v55 }
0x10af   :  { %v3129_v9 = vmul.f32 %v4233_v60, %v3127_v8  ;;  %vm3134_vm8 = vweird.f32 %v4233_v60 }
0x10b0   :  { %3149 = vrot.lane.b32.xlu1 %v3147_v4, %s4444_s9  ;;  %vm3135_vm10 = vmor %vm3133_vm9, %vm3134_vm8 }
0x10b1   :  { %v3130_v12 = vsub.f32 1.0, %v3129_v9 }
0x10b3   :  { %v3131_v13 = vmul.f32 %v4233_v60, %v3130_v12 }
0x10b5   :  { %v3132_v15 = vadd.f32 %v4233_v60, %v3131_v13 }
0x10b7   :  { %v3136_v18 = vsel %vm3135_vm10, %v4233_v60, %v3132_v15 }
0x10b8   :  { %v3141_v22 = vsel %vm3138_vm11, %v3140_v19, %v3136_v18 }
0x1122   :  { %v3150_v14 = vpop.permute.xlu1 %3149 }
0x1123   :  { %v5408_v11 = vadd.f32 %v3150_v14, %v3146_v5 }
0x1125   :  { %4234 = vtanh.f32 %v5408_v11  ;;  %v3266_v4 = vrot.slane %v5408_v11, 6 }
0x112b   :  { %v4235_v43 = vpop.eup %4234 }
0x112c   :  { %v5411_v23 = vmul.f32 %v4235_v43, %v3141_v22 }
0x112e   :  { %v3173_v58 = vrot.slane %v5411_v23, 2 }
0x1130   :  { %3174 = vrot.lane.b32.xlu2 %v3173_v58, %s4444_s9 }
0x118a   :  { %v3175_v28 = vpop.permute.xlu2 %3174 }
0x118b   :  { %4080 = vmatmul.msk.f32.vlgmr.msra.gmra.mxu0 %vm1707_vm15, %v3175_v28  ;;  %4081 = vmatmul.msk.f32.vlgmr.msrb.gmra.mxu2 %vm1707_vm15, %v3175_v28 }
0x118c   :  { %3665 = vmatpush.msra.mxu0 %v5253_v32  ;;  %3685 = vmatpush.msrb.mxu2 %v5255_v33 }
0x118e   :  { %3666 = vmatpush.msra.mxu0 %v5259_v10  ;;  %3686 = vmatpush.msrb.mxu2 %v5261_v40 }
0x1190   :  { %3667 = vmatpush.msra.mxu0 %v5265_v42  ;;  %3687 = vmatpush.msrb.mxu2 %v5267_v44 }
0x1192   :  { %3668 = vmatpush.msra.mxu0 %v5271_v34  ;;  %3688 = vmatpush.msrb.mxu2 %v5273_v53 }
0x1194   :  { %3669 = vmatpush.msra.mxu0 %v5281_v25  ;;  %3689 = vmatpush.msrb.mxu2 %v5283_v27 }
0x1196   :  { %3670 = vmatpush.msra.mxu0 %v5289_v24  ;;  %3690 = vmatpush.msrb.mxu2 %v5291_v46 }
0x1198   :  { %3671 = vmatpush.msra.mxu0 %v5297_v35  ;;  %3691 = vmatpush.msrb.mxu2 %v5299_v36 }
0x119a   :  { %3672 = vmatpush.msra.mxu0 %v5309_v38  ;;  %3692 = vmatpush.msrb.mxu2 %v5311_v45 }
0x1208   :  { %v3195_v21 = vpop.f32.mrf.mxu0 }
0x1209   :  { %v3220_v50 = vrot.slane %v3195_v21, 4 }
0x120b   :  { %v3224_v1 = vadd.f32 %v3220_v50, %v3171_v52 }
0x120d   :  { %v3226_v2 = vsub.f32 0.0, %v3224_v1 }
0x120e   :  { %v3215_v54 = vpop.f32.mrf.mxu2 }
0x120f   :  { %v3227_v47 = vmul.f32 1.442695, %v3226_v2  ;;  %v3221_v37 = vrot.slane %v3215_v54, 4 }
0x1211   :  { %4236 = vpow2.f32 %v3227_v47  ;;  %v3225_v56 = vadd.f32 %v3221_v37, %v3172_v51 }
0x1213   :  { %v3246_v60 = vsub.f32 0.0, %v3225_v56 }
0x1215   :  { %v3247_v9 = vmul.f32 1.442695, %v3246_v60 }
0x1217   :  { %v4237_v41 = vpop.eup %4236 }
0x1218   :  { %v3229_v49 = vadd.f32 1.0, %v4237_v41 }
0x121a   :  { %4238 = vrcp.f32 %v3229_v49  ;;  %v3241_v59 = vand.u32 2147483648, %v3229_v49  ;;  %v3239_v62 = vand.u32 2147483647, %v3229_v49  ;;  %vm3235_vm13 = vweird.f32 %v3229_v49 }
0x121b   :  { %4240 = vtanh.f32 %v3225_v56 }
0x121c   :  { %v3242_v3 = vor.u32 1.1754944e-38, %v3241_v59  ;;  %vm3240_vm1 = vcmp.eq.f32.partialorder %v3239_v62, 8.507059e+37  ;;  %4242 = vpow2.f32 %v3247_v9 }
0x1220   :  { %v4239_v0 = vpop.eup %4238 }
0x1221   :  { %v3231_v39 = vmul.f32 %v4239_v0, %v3229_v49  ;;  %vm3236_vm12 = vweird.f32 %v4239_v0  ;;  %v4241_v6 = vpop.eup %4240 }
0x1222   :  { %vm3237_vm0 = vmor %vm3235_vm13, %vm3236_vm12  ;;  %v4243_v12 = vpop.eup %4242 }
0x1223   :  { %v3232_v57 = vsub.f32 1.0, %v3231_v39  ;;  %v3249_v13 = vadd.f32 1.0, %v4243_v12 }
0x1225   :  { %v3233_v61 = vmul.f32 %v4239_v0, %v3232_v57  ;;  %4244 = vrcp.f32 %v3249_v13  ;;  %v3261_v43 = vand.u32 2147483648, %v3249_v13  ;;  %vm3255_vm6 = vweird.f32 %v3249_v13 }
0x1226   :  { %v3259_v22 = vand.u32 2147483647, %v3249_v13 }
0x1227   :  { %v3234_v63 = vadd.f32 %v4239_v0, %v3233_v61  ;;  %v3262_v28 = vor.u32 1.1754944e-38, %v3261_v43  ;;  %v3405_v43 = vld [vmem:[#allocation4 + $0x18] sm:$0x3] }
0x1228   :  { %vm3260_vm9 = vcmp.eq.f32.partialorder %v3259_v22, 8.507059e+37 }
0x1229   :  { %v3238_v5 = vsel %vm3237_vm0, %v4239_v0, %v3234_v63 }
0x122a   :  { %v3243_v7 = vsel %vm3240_vm1, %v3242_v3, %v3238_v5 }
0x122b   :  { %v3269_v26 = vmul.f32 %v4241_v6, %v3243_v7  ;;  %v3268_v8 = vmul.f32 %v3266_v4, %v3243_v7  ;;  %v4245_v14 = vpop.eup %4244 }
0x122c   :  { %v3251_v15 = vmul.f32 %v4245_v14, %v3249_v13  ;;  %vm3256_vm4 = vweird.f32 %v4245_v14 }
0x122d   :  { %3271 = vrot.lane.b32.xlu0 %v3269_v26, %s4444_s9  ;;  %vm3257_vm8 = vmor %vm3255_vm6, %vm3256_vm4 }
0x122e   :  { %v3252_v20 = vsub.f32 1.0, %v3251_v15 }
0x1230   :  { %v3253_v16 = vmul.f32 %v4245_v14, %v3252_v20 }
0x1232   :  { %v3254_v19 = vadd.f32 %v4245_v14, %v3253_v16 }
0x1234   :  { %v3258_v58 = vsel %vm3257_vm8, %v4245_v14, %v3254_v19 }
0x1235   :  { %v3263_v30 = vsel %vm3260_vm9, %v3262_v28, %v3258_v58 }
0x129f   :  { %v3272_v18 = vpop.permute.xlu0 %3271 }
0x12a0   :  { %v5435_v11 = vadd.f32 %v3272_v18, %v3268_v8 }
0x12a2   :  { %4246 = vtanh.f32 %v5435_v11  ;;  %v3388_v55 = vrot.slane %v5435_v11, 6  ;;  %v3407_v11 = vld [vmem:[#allocation5] sm:$0xc0] }
0x12a3   :  { %v3411_v19 = vrot.slane %v3407_v11, 6 }
0x12a5   :  { %v3415_v22 = vadd.f32 %v3411_v19, %v3405_v43 }
0x12a8   :  { %v4247_v29 = vpop.eup %4246 }
0x12a9   :  { %v5438_v31 = vmul.f32 %v4247_v29, %v3263_v30 }
0x12ab   :  { %v3295_v21 = vrot.slane %v5438_v31, 4 }
0x12ad   :  { %3296 = vrot.lane.b32.xlu1 %v3295_v21, %s4444_s9 }
0x131f   :  { %v3297_v52 = vpop.permute.xlu1 %3296 }
0x1320   :  { %4082 = vmatmul.msk.f32.vlgmr.msrb.gmra.mxu1 %vm1707_vm15, %v3297_v52  ;;  %4083 = vmatmul.msk.f32.vlgmr.msra.gmra.mxu3 %vm1707_vm15, %v3297_v52  ;;  %v3408_v52 = vld [vmem:[#allocation5 + $0x18] sm:$0xc0] }
0x1321   :  { %3787 = vmatpush.msrb.mxu1 %v5253_v32  ;;  %3807 = vmatpush.msra.mxu3 %v5255_v33  ;;  %v3285_v32 = vld [vmem:[#allocation5 + $0x8] sm:$0x3] }
0x1322   :  { %v3289_v33 = vrot.slane %v3285_v32, 2 }
0x1323   :  { %3788 = vmatpush.msrb.mxu1 %v5259_v10  ;;  %3808 = vmatpush.msra.mxu3 %v5261_v40  ;;  %v3283_v10 = vld [vmem:[#allocation4 + $0x10] sm:$0xc0] }
0x1325   :  { %3789 = vmatpush.msrb.mxu1 %v5265_v42  ;;  %3809 = vmatpush.msra.mxu3 %v5267_v44  ;;  %v3293_v42 = vadd.f32 %v3289_v33, %v3283_v10  ;;  %v3412_v33 = vrot.slane %v3408_v52, 6  ;;  %v3406_v10 = vld [vmem:[#allocation4 + $0x8] sm:$0x3] }
0x1327   :  { %3790 = vmatpush.msrb.mxu1 %v5271_v34  ;;  %3810 = vmatpush.msra.mxu3 %v5273_v53 }
0x1329   :  { %3791 = vmatpush.msrb.mxu1 %v5281_v25  ;;  %3811 = vmatpush.msra.mxu3 %v5283_v27 }
0x132b   :  { %3792 = vmatpush.msrb.mxu1 %v5289_v24  ;;  %3812 = vmatpush.msra.mxu3 %v5291_v46  ;;  %v3286_v24 = vld [vmem:[#allocation5 + $0x10] sm:$0x3] }
0x132d   :  { %3793 = vmatpush.msrb.mxu1 %v5297_v35  ;;  %3813 = vmatpush.msra.mxu3 %v5299_v36  ;;  %v3290_v36 = vrot.slane %v3286_v24, 2 }
0x132f   :  { %3794 = vmatpush.msrb.mxu1 %v5309_v38  ;;  %3814 = vmatpush.msra.mxu3 %v5311_v45  ;;  %v3284_v38 = vld [vmem:[#allocation4] sm:$0xc0] }
0x1330   :  { %v3294_v1 = vadd.f32 %v3290_v36, %v3284_v38 }
0x139d   :  { %v3317_v40 = vpop.f32.mrf.mxu1 }
0x139e   :  { %v3342_v44 = vrot.slane %v3317_v40, 2 }
0x13a0   :  { %v3346_v34 = vadd.f32 %v3342_v44, %v3293_v42  ;;  %v3416_v42 = vadd.f32 %v3412_v33, %v3406_v10 }
0x13a2   :  { %v3348_v53 = vsub.f32 0.0, %v3346_v34 }
0x13a3   :  { %v3337_v35 = vpop.f32.mrf.mxu3 }
0x13a4   :  { %v3349_v25 = vmul.f32 1.442695, %v3348_v53  ;;  %v3343_v50 = vrot.slane %v3337_v35, 2 }
0x13a6   :  { %4248 = vpow2.f32 %v3349_v25  ;;  %v3347_v2 = vadd.f32 %v3343_v50, %v3294_v1 }
0x13a8   :  { %v3368_v59 = vsub.f32 0.0, %v3347_v2 }
0x13aa   :  { %v3369_v61 = vmul.f32 1.442695, %v3368_v59 }
0x13ac   :  { %v4249_v27 = vpop.eup %4248 }
0x13ad   :  { %v3351_v46 = vadd.f32 1.0, %v4249_v27 }
0x13af   :  { %4250 = vrcp.f32 %v3351_v46  ;;  %v3363_v48 = vand.u32 2147483648, %v3351_v46  ;;  %v3361_v54 = vand.u32 2147483647, %v3351_v46  ;;  %vm3357_vm11 = vweird.f32 %v3351_v46 }
0x13b0   :  { %4252 = vtanh.f32 %v3347_v2 }
0x13b1   :  { %v3364_v37 = vor.u32 1.1754944e-38, %v3363_v48  ;;  %vm3362_vm13 = vcmp.eq.f32.partialorder %v3361_v54, 8.507059e+37  ;;  %4254 = vpow2.f32 %v3369_v61 }
0x13b5   :  { %v4251_v45 = vpop.eup %4250 }
0x13b6   :  { %v3353_v47 = vmul.f32 %v4251_v45, %v3351_v46  ;;  %vm3358_vm10 = vweird.f32 %v4251_v45  ;;  %v4253_v0 = vpop.eup %4252 }
0x13b7   :  { %vm3359_vm12 = vmor %vm3357_vm11, %vm3358_vm10  ;;  %v4255_v62 = vpop.eup %4254 }
0x13b8   :  { %v3354_v41 = vsub.f32 1.0, %v3353_v47  ;;  %v3371_v63 = vadd.f32 1.0, %v4255_v62 }
0x13ba   :  { %v3355_v49 = vmul.f32 %v4251_v45, %v3354_v41  ;;  %4256 = vrcp.f32 %v3371_v63  ;;  %v3383_v60 = vand.u32 2147483648, %v3371_v63  ;;  %vm3377_vm1 = vweird.f32 %v3371_v63 }
0x13bb   :  { %v3381_v9 = vand.u32 2147483647, %v3371_v63 }
0x13bc   :  { %v3356_v17 = vadd.f32 %v4251_v45, %v3355_v49  ;;  %v3384_v13 = vor.u32 1.1754944e-38, %v3383_v60 }
0x13bd   :  { %vm3382_vm6 = vcmp.eq.f32.partialorder %v3381_v9, 8.507059e+37 }
0x13be   :  { %v3360_v51 = vsel %vm3359_vm12, %v4251_v45, %v3356_v17 }
0x13bf   :  { %v3365_v56 = vsel %vm3362_vm13, %v3364_v37, %v3360_v51 }
0x13c0   :  { %v3391_v39 = vmul.f32 %v4253_v0, %v3365_v56  ;;  %v3390_v57 = vmul.f32 %v3388_v55, %v3365_v56  ;;  %v4257_v3 = vpop.eup %4256 }
0x13c1   :  { %v3373_v4 = vmul.f32 %v4257_v3, %v3371_v63  ;;  %vm3378_vm0 = vweird.f32 %v4257_v3 }
0x13c2   :  { %3393 = vrot.lane.b32.xlu2 %v3391_v39, %s4444_s9  ;;  %vm3379_vm4 = vmor %vm3377_vm1, %vm3378_vm0 }
0x13c3   :  { %v3374_v5 = vsub.f32 1.0, %v3373_v4 }
0x13c5   :  { %v3375_v6 = vmul.f32 %v4257_v3, %v3374_v5 }
0x13c7   :  { %v3376_v8 = vadd.f32 %v4257_v3, %v3375_v6  ;;  %v3523_v6 = vld [vmem:[#allocation5] sm:$0x30] }
0x13c9   :  { %v3380_v12 = vsel %vm3379_vm4, %v4257_v3, %v3376_v8 }
0x13ca   :  { %v3385_v15 = vsel %vm3382_vm6, %v3384_v13, %v3380_v12 }
0x141c   :  { %v3394_v7 = vpop.permute.xlu2 %3393 }
0x141d   :  { %v3396_v26 = vadd.f32 %v3394_v7, %v3390_v57  ;;  %v3527_v7 = vrot.slane %v3523_v6, 2 }
0x141f   :  { %4258 = vtanh.f32 %v3396_v26  ;;  %v3504_v50 = vrot.slane %v3396_v26, 6  ;;  %v3521_v26 = vld [vmem:[#allocation4 + $0x18] sm:$0xc] }
0x1420   :  { %v3531_v60 = vadd.f32 %v3527_v7, %v3521_v26  ;;  %v3643_v7 = vld [vmem:[#allocation5 + $0x18] sm:$0xc] }
0x1425   :  { %v4259_v14 = vpop.eup %4258 }
0x1426   :  { %v5462_v20 = vmul.f32 %v4259_v14, %v3385_v15 }
0x1428   :  { %v3417_v16 = vrot.slane %v5462_v20, 6 }
0x142a   :  { %3418 = vrot.lane.b32.xlu0 %v3417_v16, %s4444_s9  ;;  %v3524_v16 = vld [vmem:[#allocation5 + $0x18] sm:$0x30] }
0x142b   :  { %v3528_v19 = vrot.slane %v3524_v16, 2 }
0x149c   :  { %v3419_v18 = vpop.permute.xlu0 %3418 }
0x149d   :  { %4084 = vmatmul.msk.f32.vlgmr.msrb.gmra.mxu0 %vm1707_vm15, %v3419_v18  ;;  %4085 = vmatmul.msk.f32.vlgmr.msra.gmra.mxu2 %vm1707_vm15, %v3419_v18 }
0x151a   :  { %v3439_v58 = vpop.f32.mrf.mxu0 }
0x151b   :  { %v3462_v28 = vadd.f32 %v3439_v58, %v3415_v22  ;;  %v3522_v22 = vld [vmem:[#allocation4 + $0x8] sm:$0xc] }
0x151c   :  { %v3532_v58 = vadd.f32 %v3528_v19, %v3522_v22 }
0x151d   :  { %v3464_v29 = vsub.f32 0.0, %v3462_v28 }
0x151f   :  { %v3465_v30 = vmul.f32 1.442695, %v3464_v29 }
0x1520   :  { %v3459_v40 = vpop.f32.mrf.mxu2 }
0x1521   :  { %4260 = vpow2.f32 %v3465_v30  ;;  %v3463_v34 = vadd.f32 %v3459_v40, %v3416_v42 }
0x1523   :  { %v3484_v41 = vsub.f32 0.0, %v3463_v34 }
0x1525   :  { %v3485_v48 = vmul.f32 1.442695, %v3484_v41 }
0x1527   :  { %v4261_v21 = vpop.eup %4260 }
0x1528   :  { %v3467_v32 = vadd.f32 1.0, %v4261_v21 }
0x152a   :  { %4262 = vrcp.f32 %v3467_v32  ;;  %v3479_v27 = vand.u32 2147483648, %v3467_v32  ;;  %v3477_v46 = vand.u32 2147483647, %v3467_v32  ;;  %vm3473_vm9 = vweird.f32 %v3467_v32 }
0x152b   :  { %4264 = vtanh.f32 %v3463_v34 }
0x152c   :  { %v3480_v36 = vor.u32 1.1754944e-38, %v3479_v27  ;;  %vm3478_vm11 = vcmp.eq.f32.partialorder %v3477_v46, 8.507059e+37  ;;  %4266 = vpow2.f32 %v3485_v48 }
0x1530   :  { %v4263_v44 = vpop.eup %4262 }
0x1531   :  { %v3469_v53 = vmul.f32 %v4263_v44, %v3467_v32  ;;  %vm3474_vm8 = vweird.f32 %v4263_v44  ;;  %v4265_v1 = vpop.eup %4264 }
0x1532   :  { %vm3475_vm10 = vmor %vm3473_vm9, %vm3474_vm8  ;;  %v4267_v49 = vpop.eup %4266 }
0x1533   :  { %v3470_v25 = vsub.f32 1.0, %v3469_v53  ;;  %v3487_v54 = vadd.f32 1.0, %v4267_v49 }
0x1535   :  { %v3471_v24 = vmul.f32 %v4263_v44, %v3470_v25  ;;  %4268 = vrcp.f32 %v3487_v54  ;;  %v3499_v57 = vand.u32 2147483648, %v3487_v54  ;;  %vm3493_vm13 = vweird.f32 %v3487_v54 }
0x1536   :  { %v3497_v59 = vand.u32 2147483647, %v3487_v54 }
0x1537   :  { %v3472_v35 = vadd.f32 %v4263_v44, %v3471_v24  ;;  %v3500_v62 = vor.u32 1.1754944e-38, %v3499_v57 }
0x1538   :  { %vm3498_vm1 = vcmp.eq.f32.partialorder %v3497_v59, 8.507059e+37  ;;  %v3640_v59 = vld [vmem:[#allocation4 + $0x18] sm:$0x30] }
0x1539   :  { %v3476_v38 = vsel %vm3475_vm10, %v4263_v44, %v3472_v35 }
0x153a   :  { %v3481_v45 = vsel %vm3478_vm11, %v3480_v36, %v3476_v38 }
0x153b   :  { %v3507_v2 = vmul.f32 %v4265_v1, %v3481_v45  ;;  %v3506_v47 = vmul.f32 %v3504_v50, %v3481_v45  ;;  %v4269_v17 = vpop.eup %4268 }
0x153c   :  { %v3489_v37 = vmul.f32 %v4269_v17, %v3487_v54  ;;  %vm3494_vm12 = vweird.f32 %v4269_v17 }
0x153d   :  { %3509 = vrot.lane.b32.xlu1 %v3507_v2, %s4444_s9  ;;  %vm3495_vm0 = vmor %vm3493_vm13, %vm3494_vm12 }
0x153e   :  { %v3490_v55 = vsub.f32 1.0, %v3489_v37 }
0x1540   :  { %v3491_v51 = vmul.f32 %v4269_v17, %v3490_v55 }
0x1542   :  { %v3492_v39 = vadd.f32 %v4269_v17, %v3491_v51 }
0x1544   :  { %v3496_v61 = vsel %vm3495_vm0, %v4269_v17, %v3492_v39  ;;  %v3642_v39 = vld [vmem:[#allocation5] sm:$0xc] }
0x1545   :  { %v3501_v3 = vsel %vm3498_vm1, %v3500_v62, %v3496_v61  ;;  %v3646_v57 = vrot.slane %v3642_v39, 6 }
0x1547   :  { %v3650_v62 = vadd.f32 %v3646_v57, %v3640_v59 }
0x15af   :  { %v3510_v0 = vpop.permute.xlu1 %3509 }
0x15b0   :  { %v3512_v56 = vadd.f32 %v3510_v0, %v3506_v47 }
0x15b2   :  { %4270 = vtanh.f32 %v3512_v56  ;;  %v3623_v42 = vrot.slane %v3512_v56, 6 }
0x15b8   :  { %v4271_v63 = vpop.eup %4270 }
0x15b9   :  { %v3514_v4 = vmul.f32 %v4271_v63, %v3501_v3 }
0x15bb   :  { %3516 = vrot.lane.b32.xlu2 %v3514_v4, %s4444_s9 }
0x1615   :  { %v3517_v5 = vpop.permute.xlu2 %3516 }
0x1616   :  { %3519 = vst.msk [vmem:[#allocation2 + $0x8] sm:$0x3] %vm1805_vm14, %v3517_v5  ;;  %4086 = vmatmul.msk.f32.vlgmr.msra.gmra.mxu1 %vm1707_vm15, %v3517_v5  ;;  %4087 = vmatmul.msk.f32.vlgmr.msrb.gmra.mxu3 %vm1707_vm15, %v3517_v5 }
0x1617   :  { %3520 = vst.msk [vmem:[#allocation3 + $0x6] sm:$0x3] %vm1805_vm14, %v3517_v5 }
0x1693   :  { %v3552_v8 = vpop.f32.mrf.mxu1 }
0x1694   :  { %v3577_v9 = vrot.slane %v3552_v8, 6 }
0x1696   :  { %v3581_v12 = vadd.f32 %v3577_v9, %v3531_v60  ;;  %v3647_v60 = vrot.slane %v3643_v7, 6 }
0x1698   :  { %v3583_v13 = vsub.f32 0.0, %v3581_v12  ;;  %v3641_v12 = vld [vmem:[#allocation4 + $0x8] sm:$0x30] }
0x1699   :  { %v3572_v11 = vpop.f32.mrf.mxu3 }
0x169a   :  { %v3584_v14 = vmul.f32 1.442695, %v3583_v13  ;;  %v3578_v43 = vrot.slane %v3572_v11, 6  ;;  %v3651_v13 = vadd.f32 %v3647_v60, %v3641_v12 }
0x169c   :  { %4272 = vpow2.f32 %v3584_v14  ;;  %v3582_v29 = vadd.f32 %v3578_v43, %v3532_v58 }
0x169e   :  { %v3603_v24 = vsub.f32 0.0, %v3582_v29 }
0x16a0   :  { %v3604_v46 = vmul.f32 1.442695, %v3603_v24 }
0x16a2   :  { %v4273_v15 = vpop.eup %4272 }
0x16a3   :  { %v3586_v18 = vadd.f32 1.0, %v4273_v15 }
0x16a5   :  { %4274 = vrcp.f32 %v3586_v18  ;;  %v3598_v52 = vand.u32 2147483648, %v3586_v18  ;;  %v3596_v33 = vand.u32 2147483647, %v3586_v18  ;;  %vm3592_vm4 = vweird.f32 %v3586_v18 }
0x16a6   :  { %4276 = vtanh.f32 %v3582_v29 }
0x16a7   :  { %v3599_v40 = vor.u32 1.1754944e-38, %v3598_v52  ;;  %vm3597_vm8 = vcmp.eq.f32.partialorder %v3596_v33, 8.507059e+37  ;;  %4278 = vpow2.f32 %v3604_v46 }
0x16ab   :  { %v4275_v28 = vpop.eup %4274 }
0x16ac   :  { %v3588_v30 = vmul.f32 %v4275_v28, %v3586_v18  ;;  %vm3593_vm14 = vweird.f32 %v4275_v28  ;;  %v4277_v34 = vpop.eup %4276 }
0x16ad   :  { %vm3594_vm6 = vmor %vm3592_vm4, %vm3593_vm14  ;;  %v4279_v35 = vpop.eup %4278 }
0x16ae   :  { %v3589_v21 = vsub.f32 1.0, %v3588_v30  ;;  %v3606_v36 = vadd.f32 1.0, %v4279_v35 }
0x16b0   :  { %v3590_v32 = vmul.f32 %v4275_v28, %v3589_v21  ;;  %4280 = vrcp.f32 %v3606_v36  ;;  %v3618_v48 = vand.u32 2147483648, %v3606_v36  ;;  %vm3612_vm10 = vweird.f32 %v3606_v36 }
0x16b1   :  { %v3616_v49 = vand.u32 2147483647, %v3606_v36 }
0x16b2   :  { %v3591_v10 = vadd.f32 %v4275_v28, %v3590_v32  ;;  %v3619_v17 = vor.u32 1.1754944e-38, %v3618_v48 }
0x16b3   :  { %vm3617_vm12 = vcmp.eq.f32.partialorder %v3616_v49, 8.507059e+37 }
0x16b4   :  { %v3595_v44 = vsel %vm3594_vm6, %v4275_v28, %v3591_v10 }
0x16b5   :  { %v3600_v53 = vsel %vm3597_vm8, %v3599_v40, %v3595_v44 }
0x16b6   :  { %v3626_v25 = vmul.f32 %v4277_v34, %v3600_v53  ;;  %v3625_v27 = vmul.f32 %v3623_v42, %v3600_v53  ;;  %v4281_v50 = vpop.eup %4280 }
0x16b7   :  { %v3608_v38 = vmul.f32 %v4281_v50, %v3606_v36  ;;  %vm3613_vm9 = vweird.f32 %v4281_v50 }
0x16b8   :  { %3628 = vrot.lane.b32.xlu0 %v3626_v25, %s4444_s9  ;;  %vm3614_vm11 = vmor %vm3612_vm10, %vm3613_vm9 }
0x16b9   :  { %v3609_v1 = vsub.f32 1.0, %v3608_v38 }
0x16bb   :  { %v3610_v45 = vmul.f32 %v4281_v50, %v3609_v1 }
0x16bd   :  { %v3611_v41 = vadd.f32 %v4281_v50, %v3610_v45 }
0x16bf   :  { %v3615_v54 = vsel %vm3614_vm11, %v4281_v50, %v3611_v41 }
0x16c0   :  { %v3620_v55 = vsel %vm3617_vm12, %v3619_v17, %v3615_v54  ;;  %v3764_v17 = vld [vmem:[#allocation5] sm:$0x3] }
0x172a   :  { %v3629_v2 = vpop.permute.xlu0 %3628 }
0x172b   :  { %v3631_v47 = vadd.f32 %v3629_v2, %v3625_v27 }
0x172d   :  { %4282 = vtanh.f32 %v3631_v47  ;;  %v3745_v28 = vrot.slane %v3631_v47, 6 }
0x1733   :  { %v4283_v37 = vpop.eup %4282 }
0x1734   :  { %v3633_v51 = vmul.f32 %v4283_v37, %v3620_v55  ;;  %v3768_v37 = vrot.slane %v3764_v17, 2  ;;  %v3762_v55 = vld [vmem:[#allocation4 + $0x18] sm:$0xc0] }
0x1736   :  { %v3652_v0 = vrot.slane %v3633_v51, 2 }
0x1738   :  { %3653 = vrot.lane.b32.xlu1 %v3652_v0, %s4444_s9 }
0x17aa   :  { %v3654_v56 = vpop.permute.xlu1 %3653 }
0x17ab   :  { %4088 = vmatmul.msk.f32.vlgmr.msra.gmra.mxu0 %vm1707_vm15, %v3654_v56  ;;  %4089 = vmatmul.msk.f32.vlgmr.msrb.gmra.mxu2 %vm1707_vm15, %v3654_v56 }
0x1828   :  { %v3674_v61 = vpop.f32.mrf.mxu0 }
0x1829   :  { %v3699_v63 = vrot.slane %v3674_v61, 4  ;;  %v3765_v61 = vld [vmem:[#allocation5 + $0x18] sm:$0x3] }
0x182b   :  { %v3703_v3 = vadd.f32 %v3699_v63, %v3650_v62 }
0x182d   :  { %v3705_v4 = vsub.f32 0.0, %v3703_v3  ;;  %v3769_v3 = vrot.slane %v3765_v61, 2 }
0x182e   :  { %v3694_v8 = vpop.f32.mrf.mxu2 }
0x182f   :  { %v3706_v5 = vmul.f32 1.442695, %v3705_v4  ;;  %v3700_v9 = vrot.slane %v3694_v8, 4 }
0x1831   :  { %4284 = vpow2.f32 %v3706_v5  ;;  %v3704_v15 = vadd.f32 %v3700_v9, %v3651_v13  ;;  %v3763_v5 = vld [vmem:[#allocation4 + $0x8] sm:$0xc0] }
0x1833   :  { %v3725_v33 = vsub.f32 0.0, %v3704_v15 }
0x1835   :  { %v3726_v10 = vmul.f32 1.442695, %v3725_v33 }
0x1837   :  { %v4285_v6 = vpop.eup %4284 }
0x1838   :  { %v3708_v26 = vadd.f32 1.0, %v4285_v6  ;;  %v3773_v6 = vadd.f32 %v3769_v3, %v3763_v5 }
0x183a   :  { %4286 = vrcp.f32 %v3708_v26  ;;  %v3720_v11 = vand.u32 2147483648, %v3708_v26  ;;  %v3718_v43 = vand.u32 2147483647, %v3708_v26  ;;  %vm3714_vm0 = vweird.f32 %v3708_v26 }
0x183b   :  { %4288 = vtanh.f32 %v3704_v15 }
0x183c   :  { %v3721_v58 = vor.u32 1.1754944e-38, %v3720_v11  ;;  %vm3719_vm14 = vcmp.eq.f32.partialorder %v3718_v43, 8.507059e+37  ;;  %4290 = vpow2.f32 %v3726_v10 }
0x1840   :  { %v4287_v14 = vpop.eup %4286 }
0x1841   :  { %v3710_v16 = vmul.f32 %v4287_v14, %v3708_v26  ;;  %vm3715_vm13 = vweird.f32 %v4287_v14  ;;  %v4289_v30 = vpop.eup %4288 }
0x1842   :  { %vm3716_vm1 = vmor %vm3714_vm0, %vm3715_vm13  ;;  %v4291_v40 = vpop.eup %4290 }
0x1843   :  { %v3711_v18 = vsub.f32 1.0, %v3710_v16  ;;  %v3728_v42 = vadd.f32 1.0, %v4291_v40 }
0x1845   :  { %v3712_v19 = vmul.f32 %v4287_v14, %v3711_v18  ;;  %4292 = vrcp.f32 %v3728_v42  ;;  %v3740_v35 = vand.u32 2147483648, %v3728_v42  ;;  %vm3734_vm6 = vweird.f32 %v3728_v42 }
0x1847   :  { %v3713_v22 = vadd.f32 %v4287_v14, %v3712_v19  ;;  %v3741_v50 = vor.u32 1.1754944e-38, %v3740_v35  ;;  %v3891_v35 = vld [vmem:[%s5579_s15 + $0x18] sm:$0xff] }
0x1848   :  { %3947 = vmatpush.msra.mxu2 %v3891_v35 }
0x1849   :  { %v3717_v29 = vsel %vm3716_vm1, %v4287_v14, %v3713_v22 }
0x184a   :  { %v3722_v21 = vsel %vm3719_vm14, %v3721_v58, %v3717_v29 }
0x184b   :  { %v3748_v52 = vmul.f32 %v4289_v30, %v3722_v21  ;;  %v3747_v32 = vmul.f32 %v3745_v28, %v3722_v21  ;;  %v4293_v44 = vpop.eup %4292 }
0x184c   :  { %v3730_v34 = vmul.f32 %v4293_v44, %v3728_v42  ;;  %vm3735_vm4 = vweird.f32 %v4293_v44 }
0x184d   :  { %3750 = vrot.lane.b32.xlu2 %v3748_v52, %s4444_s9  ;;  %vm3736_vm8 = vmor %vm3734_vm6, %vm3735_vm4 }
0x184e   :  { %v3731_v53 = vsub.f32 1.0, %v3730_v34 }
0x1850   :  { %v3732_v25 = vmul.f32 %v4293_v44, %v3731_v53 }
0x1852   :  { %v3733_v46 = vadd.f32 %v4293_v44, %v3732_v25 }
0x1854   :  { %v3737_v36 = vsel %vm3736_vm8, %v4293_v44, %v3733_v46 }
0x1855   :  { %3635 = vrot.lane.b32.xlu2 %v3633_v51, %s4444_s9 }
0x185d   :  { %3156 = vrot.lane.b32.xlu2 %v5411_v23, %s4444_s9  ;;  %v3738_v23 = vand.u32 2147483647, %v3728_v42 }
0x185f   :  { %vm3739_vm9 = vcmp.eq.f32.partialorder %v3738_v23, 8.507059e+37  ;;  %v3890_v23 = vld [vmem:[%s5579_s15 + $0x10] sm:$0xff] }
0x1860   :  { %v3742_v45 = vsel %vm3739_vm9, %v3741_v50, %v3737_v36  ;;  %v3889_v36 = vld [vmem:[%s5579_s15 + $0x8] sm:$0xff]  ;;  %3948 = vmatpush.msra.mxu2 %v3890_v23  ;;  %v3888_v50 = vld [vmem:[%s5579_s15] sm:$0xff] }
0x1862   :  { %3949 = vmatpush.msra.mxu2 %v3889_v36 }
0x1864   :  { %3950 = vmatpush.msra.mxu2 %v3888_v50 }
0x18a7   :  { %v3751_v27 = vpop.permute.xlu2 %3750 }
0x18a8   :  { %v5482_v24 = vadd.f32 %v3751_v27, %v3747_v32 }
0x18aa   :  { %4294 = vtanh.f32 %v5482_v24  ;;  %v3867_v16 = vrot.slane %v5482_v24, 6 }
0x18af   :  { %v3636_v38 = vpop.permute.xlu2 %3635 }
0x18b0   :  { %v4295_v1 = vpop.eup %4294  ;;  %3638 = vst.msk [vmem:[#allocation2 + $0x8] sm:$0xc] %vm1925_vm5, %v3636_v38 }
0x18b1   :  { %3639 = vst.msk [vmem:[#allocation3 + $0x2] sm:$0xc] %vm1925_vm5, %v3636_v38  ;;  %v3755_v2 = vmul.f32 %v4295_v1, %v3742_v45  ;;  %v3894_v38 = vld [vmem:[%s5579_s15 + $0x30] sm:$0xff]  ;;  %v3893_v1 = vld [vmem:[%s5579_s15 + $0x28] sm:$0xff]  ;;  %v3892_v45 = vld [vmem:[%s5579_s15 + $0x20] sm:$0xff] }
0x18b3   :  { %v3774_v47 = vrot.slane %v3755_v2, 4 }
0x18b5   :  { %3775 = vrot.lane.b32.xlu0 %v3774_v47, %s4444_s9 }
0x18b7   :  { %v3157_v41 = vpop.permute.xlu2 %3156 }
0x18b8   :  { %3159 = vst.msk [vmem:[#allocation2] sm:$0xc] %vm1925_vm5, %v3157_v41 }
0x18b9   :  { %3160 = vst.msk [vmem:[#allocation3 + $0xa] sm:$0xc] %vm1925_vm5, %v3157_v41 }
0x18bd   :  { %3757 = vrot.lane.b32.xlu0 %v3755_v2, %s4444_s9 }
0x18c5   :  { %3278 = vrot.lane.b32.xlu0 %v5438_v31, %s4444_s9  ;;  %v3772_v31 = vadd.f32 %v3768_v37, %v3762_v55  ;;  %v3969_v55 = vld [vmem:[%s5581_s17 + $0x18] sm:$0xff] }
0x18c6   :  { %3992 = vmatpush.msra.mxu1 %v3969_v55 }
0x1927   :  { %v3776_v48 = vpop.permute.xlu0 %3775 }
0x1928   :  { %4090 = vmatmul.msk.f32.vlgmr.msrb.gmra.mxu1 %vm1707_vm15, %v3776_v48  ;;  %4091 = vmatmul.msk.f32.vlgmr.msra.gmra.mxu3 %vm1707_vm15, %v3776_v48 }
0x192f   :  { %v3758_v49 = vpop.permute.xlu0 %3757 }
0x1930   :  { %3760 = vst.msk [vmem:[#allocation2 + $0x8] sm:$0x30] %vm2048_vm7, %v3758_v49 }
0x1931   :  { %3761 = vst.msk [vmem:[#allocation3 - $0x2] sm:$0x30] %vm2048_vm7, %v3758_v49 }
0x1937   :  { %v3279_v54 = vpop.permute.xlu0 %3278 }
0x1938   :  { %3281 = vst.msk [vmem:[#allocation2] sm:$0x30] %vm2048_vm7, %v3279_v54 }
0x1939   :  { %3282 = vst.msk [vmem:[#allocation3 + $0x6] sm:$0x30] %vm2048_vm7, %v3279_v54 }
0x19a5   :  { %v3796_v51 = vpop.f32.mrf.mxu1 }
0x19a6   :  { %v3821_v0 = vrot.slane %v3796_v51, 2  ;;  %v3968_v51 = vld [vmem:[%s5581_s17 + $0x10] sm:$0xff] }
0x19a7   :  { %3993 = vmatpush.msra.mxu1 %v3968_v51 }
0x19a8   :  { %v3825_v56 = vadd.f32 %v3821_v0, %v3772_v31  ;;  %v3967_v31 = vld [vmem:[%s5581_s17 + $0x8] sm:$0xff]  ;;  %v3966_v0 = vld [vmem:[%s5581_s17] sm:$0xff] }
0x19a9   :  { %3994 = vmatpush.msra.mxu1 %v3967_v31 }
0x19aa   :  { %v3827_v39 = vsub.f32 0.0, %v3825_v56  ;;  %v4114_v56 = vld [vmem:[%s5580_s16] ss:$0 sm:$0xff] }
0x19ab   :  { %v3816_v63 = vpop.f32.mrf.mxu3  ;;  %3995 = vmatpush.msra.mxu1 %v3966_v0 }
0x19ac   :  { %v3828_v57 = vmul.f32 1.442695, %v3827_v39  ;;  %v3822_v4 = vrot.slane %v3816_v63, 2 }
0x19ae   :  { %4296 = vpow2.f32 %v3828_v57  ;;  %v3826_v26 = vadd.f32 %v3822_v4, %v3773_v6 }
0x19b0   :  { %v3847_v58 = vsub.f32 0.0, %v3826_v26 }
0x19b2   :  { %v3848_v28 = vmul.f32 1.442695, %v3847_v58 }
0x19b4   :  { %v4297_v59 = vpop.eup %4296 }
0x19b5   :  { %v3830_v62 = vadd.f32 1.0, %v4297_v59 }
0x19b7   :  { %4298 = vrcp.f32 %v3830_v62  ;;  %v3842_v9 = vand.u32 2147483648, %v3830_v62  ;;  %v3840_v13 = vand.u32 2147483647, %v3830_v62  ;;  %vm3836_vm5 = vweird.f32 %v3830_v62 }
0x19b8   :  { %4300 = vtanh.f32 %v3826_v26 }
0x19b9   :  { %v3843_v15 = vor.u32 1.1754944e-38, %v3842_v9  ;;  %vm3841_vm10 = vcmp.eq.f32.partialorder %v3840_v13, 8.507059e+37  ;;  %4302 = vpow2.f32 %v3848_v28 }
0x19bd   :  { %v4299_v7 = vpop.eup %4298 }
0x19be   :  { %v3832_v8 = vmul.f32 %v4299_v7, %v3830_v62  ;;  %vm3837_vm15 = vweird.f32 %v4299_v7  ;;  %v4301_v11 = vpop.eup %4300 }
0x19bf   :  { %vm3838_vm7 = vmor %vm3836_vm5, %vm3837_vm15  ;;  %v4303_v29 = vpop.eup %4302 }
0x19c0   :  { %v3833_v60 = vsub.f32 1.0, %v3832_v8  ;;  %v3850_v30 = vadd.f32 1.0, %v4303_v29 }
0x19c2   :  { %v3834_v12 = vmul.f32 %v4299_v7, %v3833_v60  ;;  %4304 = vrcp.f32 %v3850_v30  ;;  %v3862_v44 = vand.u32 2147483648, %v3850_v30  ;;  %vm3856_vm12 = vweird.f32 %v3850_v30 }
0x19c3   :  { %v3860_v34 = vand.u32 2147483647, %v3850_v30 }
0x19c4   :  { %v3835_v14 = vadd.f32 %v4299_v7, %v3834_v12  ;;  %v3863_v25 = vor.u32 1.1754944e-38, %v3862_v44 }
0x19c5   :  { %vm3861_vm0 = vcmp.eq.f32.partialorder %v3860_v34, 8.507059e+37 }
0x19c6   :  { %v3839_v18 = vsel %vm3838_vm7, %v4299_v7, %v3835_v14  ;;  %v4115_v7 = vld [vmem:[%s5582_s18] ss:$0 sm:$0xff] }
0x19c7   :  { %v3844_v19 = vsel %vm3841_vm10, %v3843_v15, %v3839_v18 }
0x19c8   :  { %v3870_v43 = vmul.f32 %v4301_v11, %v3844_v19  ;;  %v3869_v22 = vmul.f32 %v3867_v16, %v3844_v19  ;;  %v4305_v21 = vpop.eup %4304 }
0x19c9   :  { %v3852_v52 = vmul.f32 %v4305_v21, %v3850_v30  ;;  %vm3857_vm11 = vweird.f32 %v4305_v21 }
0x19ca   :  { %3872 = vrot.lane.b32.xlu1 %v3870_v43, %s4444_s9  ;;  %vm3858_vm13 = vmor %vm3856_vm12, %vm3857_vm11 }
0x19cb   :  { %v3853_v32 = vsub.f32 1.0, %v3852_v52 }
0x19cd   :  { %v3854_v33 = vmul.f32 %v4305_v21, %v3853_v32 }
0x19cf   :  { %v3855_v42 = vadd.f32 %v4305_v21, %v3854_v33 }
0x19d1   :  { %v3859_v53 = vsel %vm3858_vm13, %v4305_v21, %v3855_v42 }
0x19d2   :  { %v3864_v24 = vsel %vm3861_vm0, %v3863_v25, %v3859_v53 }
0x1a3c   :  { %v3873_v10 = vpop.permute.xlu1 %3872 }
0x1a3d   :  { %v3875_v40 = vadd.f32 %v3873_v10, %v3869_v22 }
0x1a3f   :  { %4306 = vtanh.f32 %v3875_v40 }
0x1a45   :  { %v4307_v27 = vpop.eup %4306 }
0x1a46   :  { %v3877_v46 = vmul.f32 %v4307_v27, %v3864_v24 }
0x1a48   :  { %3879 = vrot.lane.b32.xlu1 %v3877_v46, %s4444_s9 }
0x1a50   :  { %3400 = vrot.lane.b32.xlu1 %v5462_v20, %s4444_s9  ;;  %v3895_v20 = vld [vmem:[%s5579_s15 + $0x38] sm:$0xff] }
0x1a51   :  { %3918 = vmatpush.msrb.mxu0 %v3895_v20 }
0x1a53   :  { %3919 = vmatpush.msrb.mxu0 %v3894_v38 }
0x1a55   :  { %3920 = vmatpush.msrb.mxu0 %v3893_v1 }
0x1a57   :  { %3921 = vmatpush.msrb.mxu0 %v3892_v45 }
0x1aba   :  { %v3880_v2 = vpop.permute.xlu1 %3879 }
0x1abb   :  { %3882 = vst.msk [vmem:[#allocation2 + $0x8] sm:$0xc0] %vm2171_vm2, %v3880_v2 }
0x1abc   :  { %3883 = vst.msk [vmem:[#allocation3 - $0x6] sm:$0xc0] %vm2171_vm2, %v3880_v2 }
0x1ac2   :  { %v3401_v47 = vpop.permute.xlu1 %3400  ;;  %v3885_v54 = vld [vmem:[#allocation2 + $0x8] sm:$0xff] }
0x1ac3   :  { %3403 = vst.msk [vmem:[#allocation2] sm:$0xc0] %vm2171_vm2, %v3401_v47  ;;  %v3886_v41 = vld [vmem:[#allocation3] sm:$0xff] }
0x1ac4   :  { %3404 = vst.msk [vmem:[#allocation3 + $0x2] sm:$0xc0] %vm2171_vm2, %v3401_v47  ;;  %3898 = vrot.lane.b32.xlu2 %v3886_v41, %s4445_s8 }
0x1aca   :  { %v3884_v48 = vld [vmem:[#allocation2] sm:$0xff] }
0x1acb   :  { %v3887_v49 = vld [vmem:[#allocation3 + $0x8] sm:$0xff]  ;;  %4094 = vmatmul.msk.f32.vlgmr.msra.gmra.mxu2 %vm2695_vm3, %v3884_v48 }
0x1acc   :  { %3900 = vrot.lane.b32.xlu0 %v3887_v49, %s4445_s8 }
0x1ad3   :  { %4095 = vmatmul.msk.f32.gmra.mxu2 %vm2695_vm3, %v3885_v54 }
0x1b1e   :  { %v3899_v17 = vpop.permute.xlu2 %3898 }
0x1b1f   :  { %4092 = vmatmul.msk.f32.vlgmr.msrb.gmra.mxu0 %vm2695_vm3, %v3899_v17 }
0x1b3e   :  { %v3901_v37 = vpop.permute.xlu0 %3900 }
0x1b3f   :  { %4093 = vmatmul.msk.f32.gmra.mxu0 %vm2695_vm3, %v3901_v37 }
0x1b4e   :  { %v3952_v39 = vpop.f32.mrf.mxu2 }
0x1b56   :  { %v3955_v63 = vpop.f32.mrf.mxu2 }
0x1b9c   :  { %v3923_v57 = vpop.f32.mrf.mxu0 }
0x1b9d   :  { %v3953_v59 = vadd.f32 %v3952_v39, %v3923_v57 }
0x1b9f   :  { %v3962_v61 = vadd.f32 %v4114_v56, %v3953_v59 }
0x1ba1   :  { %v3964_v62 = vmax.f32 %v3962_v61, 0.0 }
0x1ba3   :  { %4096 = vmatmul.msk.f32.vlgmr.msra.gmra.mxu1 %vm2695_vm3, %v3964_v62 }
0x1bbc   :  { %v3926_v3 = vpop.f32.mrf.mxu0 }
0x1bbd   :  { %v3956_v4 = vadd.f32 %v3955_v63, %v3926_v3 }
0x1bbf   :  { %v3963_v5 = vadd.f32 %v4114_v56, %v3956_v4 }
0x1bc1   :  { %v3965_v6 = vmax.f32 %v3963_v5, 0.0 }
0x1bc3   :  { %4097 = vmatmul.msk.f32.gmra.mxu1 %vm2695_vm3, %v3965_v6 }
0x1c20   :  { %v3997_v26 = vpop.f32.mrf.mxu1 }
0x1c21   :  { %v3998_v8 = vadd.f32 %v4115_v7, %v3997_v26 }
0x1c23   :  { %4003 = vst [vmem:[%s5583_s19] sm:$0xff] %v3998_v8 }
0x1c40   :  { %v4000_v60 = vpop.f32.mrf.mxu1 }
0x1c41   :  { %v4001_v9 = vadd.f32 %v4115_v7, %v4000_v60 }
0x1c43   :  { %4004 = vst [vmem:[%s5583_s19 + $0x8] sm:$0xff] %v4001_v9 }
0x1c44   :  { %4009 = vsyncpa [#allocation7], 1 }
0x1c45   :  { %4010 = vsyncpa [#allocation9], 1 }
0x1c46   :  { %4011 = vsyncpa [#allocation12], 1 }

</bundles_post_ra>
